<compile_context>
chip_gen: v6e
topology: v6e:2x2x1
jax: 0.10.0
libtpu: 0.0.40
codegen_flags: <defaults>
</compile_context>

<pallas_src>
import functools
from math import floor

import jax
import jax.numpy as jnp
import numpy as np
from jax.experimental import pallas as pl
from jax.experimental.pallas import tpu as pltpu


def conv2d_output_shape(h_w, kernel_size=1, stride=1, padding=0, dilation=1):
    if not isinstance(kernel_size, tuple):
        kernel_size = (int(kernel_size), int(kernel_size))
    h = floor((h_w[0] + 2 * padding - dilation * (kernel_size[0] - 1) - 1) / stride + 1)
    w = floor((h_w[1] + 2 * padding - dilation * (kernel_size[1] - 1) - 1) / stride + 1)
    return (h, w)


# ---------------------------------------------------------------------------
# Fused network kernel: conv1 -> conv2 -> conv3 -> fc1 -> fc2, all in VMEM.
# ---------------------------------------------------------------------------
def _fused_cnn_kernel(p1_ref, w1_ref, b1_ref,
                      g2_ref, w2_ref, b2_ref,
                      g3_ref, w3_ref, b3_ref,
                      fw1_ref, fb1_ref, fw2_ref, fb2_ref,
                      o_ref, *,
                      tile_b, s1, s2, s3, k2, k3, c1, c2, c3):
    f32, bf16 = jnp.float32, jnp.bfloat16

    def leaky(z):                       # nn.LeakyReLU() default slope = 0.01
        return jnp.where(z >= 0, z, 0.01 * z)

    # ---- conv1: one MXU matmul over the whole batch tile (bf16 in, f32 acc) ----
    z1 = jnp.dot(p1_ref[...], w1_ref[...], preferred_element_type=f32) + b1_ref[...]
    y1 = leaky(z1).astype(bf16)                               # (tile_b*s1, c1)

    g2, w2, b2 = g2_ref[...], w2_ref[...], b2_ref[...]
    g3, w3, b3 = g3_ref[...], w3_ref[...], b3_ref[...]
    fw1, fb1 = fw1_ref[...], fb1_ref[...]
    fw2, fb2 = fw2_ref[...], fb2_ref[...]

    outs = []
    for b in range(tile_b):                                   # static unroll
        y1b = y1[b * s1:(b + 1) * s1, :]                      # (s1, c1), aligned slice

        # conv2: im2col row gather as a constant 0/1 matmul (stays on MXU/VMEM),
        # then one small matmul per kernel tap.
        p2 = jnp.dot(g2, y1b, preferred_element_type=f32)     # (k2*s2, c1) f32
        z2 = b2
        for t in range(k2):
            z2 = z2 + jnp.dot(p2[t * s2:(t + 1) * s2, :].astype(bf16),
                              w2[t * c1:(t + 1) * c1, :],
                              preferred_element_type=f32)
        y2 = leaky(z2).astype(bf16)                           # (s2, c2)

        # conv3: same gather-matmul trick.
        p3 = jnp.dot(g3, y2, preferred_element_type=f32)      # (k3*s3, c2) f32
        z3 = b3
        for t in range(k3):
            z3 = z3 + jnp.dot(p3[t * s3:(t + 1) * s3, :].astype(bf16),
                              w3[t * c2:(t + 1) * c2, :],
                              preferred_element_type=f32)
        y3 = leaky(z3)                                        # (s3, c3) f32

        # fc1: torch NCHW flatten is folded into fw1's row order (no transpose).
        h1 = fb1
        for p in range(s3):
            h1 = h1 + jnp.dot(y3[p:p + 1, :].astype(bf16),
                              fw1[p * c3:(p + 1) * c3, :],
                              preferred_element_type=f32)
        h1 = jnp.maximum(h1, 0.0).astype(bf16)                # (1, hidden)

        # fc2: lane-dense, 128-padded output columns.
        out = jnp.dot(h1, fw2, preferred_element_type=f32) + fb2
        outs.append(jnp.maximum(out, 0.0))

    o_ref[...] = jnp.concatenate(outs, axis=0).astype(o_ref.dtype)


# ---------------------------------------------------------------------------
# Host-side helpers (run once at init / under jit)
# ---------------------------------------------------------------------------
def _im2col_nhwc(x, kh, kw, stride):
    """(N,H,W,C) -> (N*OH*OW, KH*KW*C) with reduction ordered (kh, kw, c)."""
    n, h, w, c = x.shape
    oh = (h - kh) // stride + 1
    ow = (w - kw) // stride + 1
    cols = []
    for i in range(kh):
        for j in range(kw):
            cols.append(x[:, i:i + (oh - 1) * stride + 1:stride,
                             j:j + (ow - 1) * stride + 1:stride, :])
    p = jnp.stack(cols, axis=3)                  # (n, oh, ow, kh*kw, c)
    return p.reshape(n * oh * ow, kh * kw * c)


def _gather_matrix(in_hw, k_hw, stride):
    """0/1 matrix G so that (G @ act) lists, tap-major, the im2col rows of a
    spatially-flattened (H*W, C) activation: row t*S + p = input row feeding
    output position p under kernel tap t = ki*kw + kj."""
    ih, iw = in_hw
    kh, kw = k_hw
    oh = (ih - kh) // stride + 1
    ow = (iw - kw) // stride + 1
    s = oh * ow
    g = np.zeros((kh * kw * s, ih * iw), np.float32)
    for ki in range(kh):
        for kj in range(kw):
            t = ki * kw + kj
            for a in range(oh):
                for b in range(ow):
                    g[t * s + a * ow + b,
                      (a * stride + ki) * iw + (b * stride + kj)] = 1.0
    return jnp.asarray(g, jnp.bfloat16)


# ---------------------------------------------------------------------------
# Module equivalent
# ---------------------------------------------------------------------------
class Conv2dPallas:
    def __init__(self, shape, hidden_dim, out_dim, key):
        h, w, c = shape
        self.in_shape = (h, w, c)
        self.hidden_dim = int(hidden_dim)
        self.out_dim = int(out_dim)

        c1_hw = conv2d_output_shape((h, w), 8, 4)
        c2_hw = conv2d_output_shape(c1_hw, 4, 2)
        c3_hw = conv2d_output_shape(c2_hw, 3, 1)
        self.c1_hw, self.c2_hw, self.c3_hw = c1_hw, c2_hw, c3_hw
        self.fc_w = 64 * c3_hw[0] * c3_hw[1]
        self.out_pad = ((self.out_dim + 127) // 128) * 128    # lane-dense output

        ks = jax.random.split(key, 10)

        def init(k, shp, fan_in):
            bound = 1.0 / (fan_in ** 0.5)        # torch default kaiming-uniform-ish
            return jax.random.uniform(k, shp, jnp.float32, -bound, bound)

        # Raw parameters in torch layouts: conv (O, I, KH, KW); linear (out, in).
        self.w1 = init(ks[0], (32, c, 8, 8), c * 8 * 8)
        self.b1 = init(ks[1], (32,), c * 8 * 8)
        self.w2 = init(ks[2], (64, 32, 4, 4), 32 * 4 * 4)
        self.b2 = init(ks[3], (64,), 32 * 4 * 4)
        self.w3 = init(ks[4], (64, 64, 3, 3), 64 * 3 * 3)
        self.b3 = init(ks[5], (64,), 64 * 3 * 3)
        self.fw1 = init(ks[6], (hidden_dim, self.fc_w), self.fc_w)
        self.fb1 = init(ks[7], (hidden_dim,), self.fc_w)
        self.fw2 = init(ks[8], (out_dim, hidden_dim), hidden_dim)
        self.fb2 = init(ks[9], (out_dim,), hidden_dim)

        # --- Kernel-ready parameters, precomputed ONCE (hoisted out of forward) ---
        def conv_w_mat(w_oihw):          # rows ordered (kh, kw, in)
            o, i, kh, kw = w_oihw.shape
            return (jnp.transpose(w_oihw, (2, 3, 1, 0))
                    .reshape(kh * kw * i, o).astype(jnp.bfloat16))

        self._w1m = conv_w_mat(self.w1)
        self._w2m = conv_w_mat(self.w2)
        self._w3m = conv_w_mat(self.w3)
        self._b1m = self.b1.reshape(1, -1).astype(jnp.float32)
        self._b2m = self.b2.reshape(1, -1).astype(jnp.float32)
        self._b3m = self.b3.reshape(1, -1).astype(jnp.float32)
        self._g2 = _gather_matrix(c1_hw, (4, 4), 2)
        self._g3 = _gather_matrix(c2_hw, (3, 3), 1)
        # Fold the torch NCHW flatten into fc1's row ordering -> rows are
        # (spatial position, channel), so the kernel never transposes activations.
        s3 = c3_hw[0] * c3_hw[1]
        fw1r = jnp.transpose(self.fw1.reshape(hidden_dim, 64, s3), (2, 1, 0))
        self._fw1m = fw1r.reshape(s3 * 64, hidden_dim).astype(jnp.bfloat16)
        self._fb1m = self.fb1.reshape(1, -1).astype(jnp.float32)
        # Lane-dense final layer: zero-pad out_dim up to 128 columns.
        fw2p = jnp.zeros((hidden_dim, self.out_pad), jnp.float32)
        self._fw2m = fw2p.at[:, :out_dim].set(self.fw2.T).astype(jnp.bfloat16)
        self._fb2m = jnp.zeros((1, self.out_pad), jnp.float32).at[0, :out_dim].set(self.fb2)

        self._forward = jax.jit(self._forward_impl)

    def _forward_impl(self, x):
        h, w, c = self.in_shape
        n = x.shape[0]
        s1 = self.c1_hw[0] * self.c1_hw[1]
        s2 = self.c2_hw[0] * self.c2_hw[1]
        s3 = self.c3_hw[0] * self.c3_hw[1]
        k1 = 8 * 8 * c
        hidden = self.hidden_dim

        tile_b = min(8, n)                           # batch rows per grid step
        n_pad = ((n + tile_b - 1) // tile_b) * tile_b

        xb = x.astype(jnp.bfloat16)
        if n_pad != n:
            xb = jnp.concatenate(
                [xb, jnp.zeros((n_pad - n, h, w, c), jnp.bfloat16)], axis=0)

        # conv1 im2col (plain JAX, fused under jit; 4x inflation of a tiny input).
        # TODO(synk): pull the conv1 patch gather into the kernel as well (needs
        # in-kernel strided spatial slicing); conv2/conv3 gathers already run in VMEM.
        patches = _im2col_nhwc(xb, 8, 8, 4)          # (n_pad*s1, k1) bf16

        kernel = functools.partial(
            _fused_cnn_kernel, tile_b=tile_b, s1=s1, s2=s2, s3=s3,
            k2=16, k3=9, c1=32, c2=64, c3=64)

        flops_per_item = 2 * (
            s1 * k1 * 32 + self._g2.shape[0] * self._g2.shape[1] * 32
            + 16 * s2 * 32 * 64 + self._g3.shape[0] * self._g3.shape[1] * 64
            + 9 * s3 * 64 * 64 + s3 * 64 * hidden + hidden * self.out_pad)
        weight_bytes = sum(int(a.size) * a.dtype.itemsize for a in (
            self._w1m, self._b1m, self._g2, self._w2m, self._b2m, self._g3,
            self._w3m, self._b3m, self._fw1m, self._fb1m, self._fw2m, self._fb2m))
        cost = pl.CostEstimate(
            flops=int(n_pad * flops_per_item),
            transcendentals=0,
            bytes_accessed=int(patches.size * 2 + weight_bytes
                               + n_pad * self.out_pad * 4))

        out = pl.pallas_call(
            kernel,
            out_shape=jax.ShapeDtypeStruct((n_pad, self.out_pad), jnp.float32),
            grid=(n_pad // tile_b,),
            in_specs=[
                pl.BlockSpec((tile_b * s1, k1), lambda i: (i, 0)),
                pl.BlockSpec(self._w1m.shape, lambda i: (0, 0)),
                pl.BlockSpec(self._b1m.shape, lambda i: (0, 0)),
                pl.BlockSpec(self._g2.shape, lambda i: (0, 0)),
                pl.BlockSpec(self._w2m.shape, lambda i: (0, 0)),
                pl.BlockSpec(self._b2m.shape, lambda i: (0, 0)),
                pl.BlockSpec(self._g3.shape, lambda i: (0, 0)),
                pl.BlockSpec(self._w3m.shape, lambda i: (0, 0)),
                pl.BlockSpec(self._b3m.shape, lambda i: (0, 0)),
                pl.BlockSpec(self._fw1m.shape, lambda i: (0, 0)),
                pl.BlockSpec(self._fb1m.shape, lambda i: (0, 0)),
                pl.BlockSpec(self._fw2m.shape, lambda i: (0, 0)),
                pl.BlockSpec(self._fb2m.shape, lambda i: (0, 0)),
            ],
            out_specs=pl.BlockSpec((tile_b, self.out_pad), lambda i: (i, 0)),
            compiler_params=pltpu.CompilerParams(
                dimension_semantics=("parallel",),   # megacore-shard batch tiles
                vmem_limit_bytes=32 * 1024 * 1024),
            cost_estimate=cost,
        )(patches, self._w1m, self._b1m, self._g2, self._w2m, self._b2m,
          self._g3, self._w3m, self._b3m, self._fw1m, self._fb1m,
          self._fw2m, self._fb2m)

        return out[:n, :self.out_dim]

    def __call__(self, x):
        return self._forward(x)


# ---------------------------------------------------------------------------
# Pure-JAX f32 reference of the torch forward (for a sanity check only)
# ---------------------------------------------------------------------------
def _reference_forward(model, x):
    def conv(x, w, b, stride):
        o, i, kh, kw = w.shape
        n, h, wd, c = x.shape
        oh = (h - kh) // stride + 1
        ow = (wd - kw) // stride + 1
        y = jnp.zeros((n, oh, ow, o), jnp.float32)
        for ki in range(kh):
            for kj in range(kw):
                xs = x[:, ki:ki + (oh - 1) * stride + 1:stride,
                          kj:kj + (ow - 1) * stride + 1:stride, :]
                y = y + jnp.einsum('nhwc,oc->nhwo', xs, w[:, :, ki, kj])
        return y + b

    def leaky(z):
        return jnp.where(z >= 0, z, 0.01 * z)

    x = leaky(conv(x, model.w1, model.b1, 4))
    x = leaky(conv(x, model.w2, model.b2, 2))
    x = leaky(conv(x, model.w3, model.b3, 1))
    n = x.shape[0]
    x = jnp.transpose(x, (0, 3, 1, 2)).reshape(n, model.fc_w)   # torch NCHW flatten
    x = jnp.maximum(x @ model.fw1.T + model.fb1, 0.0)
    x = jnp.maximum(x @ model.fw2.T + model.fb2, 0.0)
    return x


if __name__ == "__main__":
    key = jax.random.PRNGKey(0)
    k_param, k_x = jax.random.split(key)

    # 36x36x4 input -> conv spatial maps 8x8 -> 3x3 -> 1x1, fc_w = 64.
    shape = (36, 36, 4)
    hidden_dim, out_dim = 32, 8
    batch = 2

    model = Conv2dPallas(shape, hidden_dim, out_dim, k_param)
    x = jax.random.normal(k_x, (batch,) + shape, dtype=jnp.float32)

    y = model(x)
    jax.block_until_ready(y)
    assert y.shape == (batch, out_dim), y.shape

    # Sanity check vs. an f32 XLA reference (generous bf16 tolerance).
    y_ref = _reference_forward(model, x)
    err = float(jnp.max(jnp.abs(y - y_ref)))
    scale = float(jnp.max(jnp.abs(y_ref)))
    assert err <= 0.05 * scale + 1e-2, (err, scale)

    print("KERNEL_OK")
</pallas_src>

<mosaic_0001>
module attributes {stable_mosaic.version = 11 : i64} {
  func.func @_fused_cnn_kernel(%arg0: i32, %arg1: memref<128x256xbf16, #tpu.memory_space<vmem>>, %arg2: memref<256x32xbf16, #tpu.memory_space<vmem>>, %arg3: memref<1x32xf32, #tpu.memory_space<vmem>>, %arg4: memref<144x64xbf16, #tpu.memory_space<vmem>>, %arg5: memref<512x64xbf16, #tpu.memory_space<vmem>>, %arg6: memref<1x64xf32, #tpu.memory_space<vmem>>, %arg7: memref<9x9xbf16, #tpu.memory_space<vmem>>, %arg8: memref<576x64xbf16, #tpu.memory_space<vmem>>, %arg9: memref<1x64xf32, #tpu.memory_space<vmem>>, %arg10: memref<64x32xbf16, #tpu.memory_space<vmem>>, %arg11: memref<1x32xf32, #tpu.memory_space<vmem>>, %arg12: memref<32x128xbf16, #tpu.memory_space<vmem>>, %arg13: memref<1x128xf32, #tpu.memory_space<vmem>>, %arg14: memref<2x128xf32, #tpu.memory_space<vmem>>) attributes {dimension_semantics = [#tpu.dimension_semantics<parallel>], iteration_bounds = array<i64: 1>, scalar_prefetch = 0 : i64, scratch_operands = 0 : i64, tpu.core_type = #tpu.core_type<tc>, window_params = [{transform_indices = @transform_0, window_bounds = array<i64: 128, 256>}, {pipeline_mode = #tpu.pipeline_mode<synchronous>, transform_indices = @transform_1, window_bounds = array<i64: 256, 32>}, {pipeline_mode = #tpu.pipeline_mode<synchronous>, transform_indices = @transform_2, window_bounds = array<i64: 1, 32>}, {pipeline_mode = #tpu.pipeline_mode<synchronous>, transform_indices = @transform_3, window_bounds = array<i64: 144, 64>}, {pipeline_mode = #tpu.pipeline_mode<synchronous>, transform_indices = @transform_4, window_bounds = array<i64: 512, 64>}, {pipeline_mode = #tpu.pipeline_mode<synchronous>, transform_indices = @transform_5, window_bounds = array<i64: 1, 64>}, {pipeline_mode = #tpu.pipeline_mode<synchronous>, transform_indices = @transform_6, window_bounds = array<i64: 9, 9>}, {pipeline_mode = #tpu.pipeline_mode<synchronous>, transform_indices = @transform_7, window_bounds = array<i64: 576, 64>}, {pipeline_mode = #tpu.pipeline_mode<synchronous>, transform_indices = @transform_8, window_bounds = array<i64: 1, 64>}, {pipeline_mode = #tpu.pipeline_mode<synchronous>, transform_indices = @transform_9, window_bounds = array<i64: 64, 32>}, {pipeline_mode = #tpu.pipeline_mode<synchronous>, transform_indices = @transform_10, window_bounds = array<i64: 1, 32>}, {pipeline_mode = #tpu.pipeline_mode<synchronous>, transform_indices = @transform_11, window_bounds = array<i64: 32, 128>}, {pipeline_mode = #tpu.pipeline_mode<synchronous>, transform_indices = @transform_12, window_bounds = array<i64: 1, 128>}, {transform_indices = @transform_13, window_bounds = array<i64: 2, 128>}]} {
    %c0 = arith.constant 0 : index
    %c0_0 = arith.constant 0 : index
    %0 = vector.load %arg1[%c0, %c0_0] : memref<128x256xbf16, #tpu.memory_space<vmem>>, vector<128x256xbf16>
    %c0_1 = arith.constant 0 : index
    %c0_2 = arith.constant 0 : index
    %1 = vector.load %arg2[%c0_1, %c0_2] : memref<256x32xbf16, #tpu.memory_space<vmem>>, vector<256x32xbf16>
    %cst = arith.constant dense<0.000000e+00> : vector<128x32xf32>
    %2 = tpu.matmul %0, %1, %cst {dimension_numbers = #tpu.dot_dimension_numbers<[1], [0], [0], [1], [0, 0, 1, 1], [], []>} : vector<128x256xbf16>, vector<256x32xbf16>, vector<128x32xf32> -> vector<128x32xf32>
    %c0_3 = arith.constant 0 : index
    %c0_4 = arith.constant 0 : index
    %3 = vector.load %arg3[%c0_3, %c0_4] : memref<1x32xf32, #tpu.memory_space<vmem>>, vector<1x32xf32>
    %4 = vector.broadcast %3 : vector<1x32xf32> to vector<128x32xf32>
    %5 = arith.addf %2, %4 : vector<128x32xf32>
    %cst_5 = arith.constant 0.000000e+00 : f32
    %6 = vector.broadcast %cst_5 : f32 to vector<128x32xf32>
    %7 = arith.cmpf oge, %5, %6 : vector<128x32xf32>
    %cst_6 = arith.constant 0.00999999977 : f32
    %8 = vector.broadcast %cst_6 : f32 to vector<128x32xf32>
    %9 = arith.mulf %8, %5 : vector<128x32xf32>
    %10 = arith.select %7, %5, %9 : vector<128x32xi1>, vector<128x32xf32>
    %11 = arith.truncf %10 : vector<128x32xf32> to vector<128x32xbf16>
    %c0_7 = arith.constant 0 : index
    %c0_8 = arith.constant 0 : index
    %12 = vector.load %arg4[%c0_7, %c0_8] : memref<144x64xbf16, #tpu.memory_space<vmem>>, vector<144x64xbf16>
    %c0_9 = arith.constant 0 : index
    %c0_10 = arith.constant 0 : index
    %13 = vector.load %arg5[%c0_9, %c0_10] : memref<512x64xbf16, #tpu.memory_space<vmem>>, vector<512x64xbf16>
    %c0_11 = arith.constant 0 : index
    %c0_12 = arith.constant 0 : index
    %14 = vector.load %arg6[%c0_11, %c0_12] : memref<1x64xf32, #tpu.memory_space<vmem>>, vector<1x64xf32>
    %c0_13 = arith.constant 0 : index
    %c0_14 = arith.constant 0 : index
    %15 = vector.load %arg7[%c0_13, %c0_14] : memref<9x9xbf16, #tpu.memory_space<vmem>>, vector<9x9xbf16>
    %c0_15 = arith.constant 0 : index
    %c0_16 = arith.constant 0 : index
    %16 = vector.load %arg8[%c0_15, %c0_16] : memref<576x64xbf16, #tpu.memory_space<vmem>>, vector<576x64xbf16>
    %c0_17 = arith.constant 0 : index
    %c0_18 = arith.constant 0 : index
    %17 = vector.load %arg9[%c0_17, %c0_18] : memref<1x64xf32, #tpu.memory_space<vmem>>, vector<1x64xf32>
    %c0_19 = arith.constant 0 : index
    %c0_20 = arith.constant 0 : index
    %18 = vector.load %arg10[%c0_19, %c0_20] : memref<64x32xbf16, #tpu.memory_space<vmem>>, vector<64x32xbf16>
    %c0_21 = arith.constant 0 : index
    %c0_22 = arith.constant 0 : index
    %19 = vector.load %arg11[%c0_21, %c0_22] : memref<1x32xf32, #tpu.memory_space<vmem>>, vector<1x32xf32>
    %c0_23 = arith.constant 0 : index
    %c0_24 = arith.constant 0 : index
    %20 = vector.load %arg12[%c0_23, %c0_24] : memref<32x128xbf16, #tpu.memory_space<vmem>>, vector<32x128xbf16>
    %c0_25 = arith.constant 0 : index
    %c0_26 = arith.constant 0 : index
    %21 = vector.load %arg13[%c0_25, %c0_26] : memref<1x128xf32, #tpu.memory_space<vmem>>, vector<1x128xf32>
    %22 = vector.extract_strided_slice %11 {offsets = [0, 0], sizes = [64, 32], strides = [1, 1]} : vector<128x32xbf16> to vector<64x32xbf16>
    %cst_27 = arith.constant dense<0.000000e+00> : vector<144x32xf32>
    %23 = tpu.matmul %12, %22, %cst_27 {dimension_numbers = #tpu.dot_dimension_numbers<[1], [0], [0], [1], [0, 0, 1, 1], [], []>} : vector<144x64xbf16>, vector<64x32xbf16>, vector<144x32xf32> -> vector<144x32xf32>
    %24 = vector.extract_strided_slice %23 {offsets = [0, 0], sizes = [9, 32], strides = [1, 1]} : vector<144x32xf32> to vector<9x32xf32>
    %25 = arith.truncf %24 : vector<9x32xf32> to vector<9x32xbf16>
    %26 = vector.extract_strided_slice %13 {offsets = [0, 0], sizes = [32, 64], strides = [1, 1]} : vector<512x64xbf16> to vector<32x64xbf16>
    %cst_28 = arith.constant dense<0.000000e+00> : vector<9x64xf32>
    %27 = tpu.matmul %25, %26, %cst_28 {dimension_numbers = #tpu.dot_dimension_numbers<[1], [0], [0], [1], [0, 0, 1, 1], [], []>} : vector<9x32xbf16>, vector<32x64xbf16>, vector<9x64xf32> -> vector<9x64xf32>
    %28 = vector.broadcast %14 : vector<1x64xf32> to vector<9x64xf32>
    %29 = arith.addf %28, %27 : vector<9x64xf32>
    %30 = vector.extract_strided_slice %23 {offsets = [9, 0], sizes = [9, 32], strides = [1, 1]} : vector<144x32xf32> to vector<9x32xf32>
    %31 = arith.truncf %30 : vector<9x32xf32> to vector<9x32xbf16>
    %32 = vector.extract_strided_slice %13 {offsets = [32, 0], sizes = [32, 64], strides = [1, 1]} : vector<512x64xbf16> to vector<32x64xbf16>
    %cst_29 = arith.constant dense<0.000000e+00> : vector<9x64xf32>
    %33 = tpu.matmul %31, %32, %cst_29 {dimension_numbers = #tpu.dot_dimension_numbers<[1], [0], [0], [1], [0, 0, 1, 1], [], []>} : vector<9x32xbf16>, vector<32x64xbf16>, vector<9x64xf32> -> vector<9x64xf32>
    %34 = arith.addf %29, %33 : vector<9x64xf32>
    %35 = vector.extract_strided_slice %23 {offsets = [18, 0], sizes = [9, 32], strides = [1, 1]} : vector<144x32xf32> to vector<9x32xf32>
    %36 = arith.truncf %35 : vector<9x32xf32> to vector<9x32xbf16>
    %37 = vector.extract_strided_slice %13 {offsets = [64, 0], sizes = [32, 64], strides = [1, 1]} : vector<512x64xbf16> to vector<32x64xbf16>
    %cst_30 = arith.constant dense<0.000000e+00> : vector<9x64xf32>
    %38 = tpu.matmul %36, %37, %cst_30 {dimension_numbers = #tpu.dot_dimension_numbers<[1], [0], [0], [1], [0, 0, 1, 1], [], []>} : vector<9x32xbf16>, vector<32x64xbf16>, vector<9x64xf32> -> vector<9x64xf32>
    %39 = arith.addf %34, %38 : vector<9x64xf32>
    %40 = vector.extract_strided_slice %23 {offsets = [27, 0], sizes = [9, 32], strides = [1, 1]} : vector<144x32xf32> to vector<9x32xf32>
    %41 = arith.truncf %40 : vector<9x32xf32> to vector<9x32xbf16>
    %42 = vector.extract_strided_slice %13 {offsets = [96, 0], sizes = [32, 64], strides = [1, 1]} : vector<512x64xbf16> to vector<32x64xbf16>
    %cst_31 = arith.constant dense<0.000000e+00> : vector<9x64xf32>
    %43 = tpu.matmul %41, %42, %cst_31 {dimension_numbers = #tpu.dot_dimension_numbers<[1], [0], [0], [1], [0, 0, 1, 1], [], []>} : vector<9x32xbf16>, vector<32x64xbf16>, vector<9x64xf32> -> vector<9x64xf32>
    %44 = arith.addf %39, %43 : vector<9x64xf32>
    %45 = vector.extract_strided_slice %23 {offsets = [36, 0], sizes = [9, 32], strides = [1, 1]} : vector<144x32xf32> to vector<9x32xf32>
    %46 = arith.truncf %45 : vector<9x32xf32> to vector<9x32xbf16>
    %47 = vector.extract_strided_slice %13 {offsets = [128, 0], sizes = [32, 64], strides = [1, 1]} : vector<512x64xbf16> to vector<32x64xbf16>
    %cst_32 = arith.constant dense<0.000000e+00> : vector<9x64xf32>
    %48 = tpu.matmul %46, %47, %cst_32 {dimension_numbers = #tpu.dot_dimension_numbers<[1], [0], [0], [1], [0, 0, 1, 1], [], []>} : vector<9x32xbf16>, vector<32x64xbf16>, vector<9x64xf32> -> vector<9x64xf32>
    %49 = arith.addf %44, %48 : vector<9x64xf32>
    %50 = vector.extract_strided_slice %23 {offsets = [45, 0], sizes = [9, 32], strides = [1, 1]} : vector<144x32xf32> to vector<9x32xf32>
    %51 = arith.truncf %50 : vector<9x32xf32> to vector<9x32xbf16>
    %52 = vector.extract_strided_slice %13 {offsets = [160, 0], sizes = [32, 64], strides = [1, 1]} : vector<512x64xbf16> to vector<32x64xbf16>
    %cst_33 = arith.constant dense<0.000000e+00> : vector<9x64xf32>
    %53 = tpu.matmul %51, %52, %cst_33 {dimension_numbers = #tpu.dot_dimension_numbers<[1], [0], [0], [1], [0, 0, 1, 1], [], []>} : vector<9x32xbf16>, vector<32x64xbf16>, vector<9x64xf32> -> vector<9x64xf32>
    %54 = arith.addf %49, %53 : vector<9x64xf32>
    %55 = vector.extract_strided_slice %23 {offsets = [54, 0], sizes = [9, 32], strides = [1, 1]} : vector<144x32xf32> to vector<9x32xf32>
    %56 = arith.truncf %55 : vector<9x32xf32> to vector<9x32xbf16>
    %57 = vector.extract_strided_slice %13 {offsets = [192, 0], sizes = [32, 64], strides = [1, 1]} : vector<512x64xbf16> to vector<32x64xbf16>
    %cst_34 = arith.constant dense<0.000000e+00> : vector<9x64xf32>
    %58 = tpu.matmul %56, %57, %cst_34 {dimension_numbers = #tpu.dot_dimension_numbers<[1], [0], [0], [1], [0, 0, 1, 1], [], []>} : vector<9x32xbf16>, vector<32x64xbf16>, vector<9x64xf32> -> vector<9x64xf32>
    %59 = arith.addf %54, %58 : vector<9x64xf32>
    %60 = vector.extract_strided_slice %23 {offsets = [63, 0], sizes = [9, 32], strides = [1, 1]} : vector<144x32xf32> to vector<9x32xf32>
    %61 = arith.truncf %60 : vector<9x32xf32> to vector<9x32xbf16>
    %62 = vector.extract_strided_slice %13 {offsets = [224, 0], sizes = [32, 64], strides = [1, 1]} : vector<512x64xbf16> to vector<32x64xbf16>
    %cst_35 = arith.constant dense<0.000000e+00> : vector<9x64xf32>
    %63 = tpu.matmul %61, %62, %cst_35 {dimension_numbers = #tpu.dot_dimension_numbers<[1], [0], [0], [1], [0, 0, 1, 1], [], []>} : vector<9x32xbf16>, vector<32x64xbf16>, vector<9x64xf32> -> vector<9x64xf32>
    %64 = arith.addf %59, %63 : vector<9x64xf32>
    %65 = vector.extract_strided_slice %23 {offsets = [72, 0], sizes = [9, 32], strides = [1, 1]} : vector<144x32xf32> to vector<9x32xf32>
    %66 = arith.truncf %65 : vector<9x32xf32> to vector<9x32xbf16>
    %67 = vector.extract_strided_slice %13 {offsets = [256, 0], sizes = [32, 64], strides = [1, 1]} : vector<512x64xbf16> to vector<32x64xbf16>
    %cst_36 = arith.constant dense<0.000000e+00> : vector<9x64xf32>
    %68 = tpu.matmul %66, %67, %cst_36 {dimension_numbers = #tpu.dot_dimension_numbers<[1], [0], [0], [1], [0, 0, 1, 1], [], []>} : vector<9x32xbf16>, vector<32x64xbf16>, vector<9x64xf32> -> vector<9x64xf32>
    %69 = arith.addf %64, %68 : vector<9x64xf32>
    %70 = vector.extract_strided_slice %23 {offsets = [81, 0], sizes = [9, 32], strides = [1, 1]} : vector<144x32xf32> to vector<9x32xf32>
    %71 = arith.truncf %70 : vector<9x32xf32> to vector<9x32xbf16>
    %72 = vector.extract_strided_slice %13 {offsets = [288, 0], sizes = [32, 64], strides = [1, 1]} : vector<512x64xbf16> to vector<32x64xbf16>
    %cst_37 = arith.constant dense<0.000000e+00> : vector<9x64xf32>
    %73 = tpu.matmul %71, %72, %cst_37 {dimension_numbers = #tpu.dot_dimension_numbers<[1], [0], [0], [1], [0, 0, 1, 1], [], []>} : vector<9x32xbf16>, vector<32x64xbf16>, vector<9x64xf32> -> vector<9x64xf32>
    %74 = arith.addf %69, %73 : vector<9x64xf32>
    %75 = vector.extract_strided_slice %23 {offsets = [90, 0], sizes = [9, 32], strides = [1, 1]} : vector<144x32xf32> to vector<9x32xf32>
    %76 = arith.truncf %75 : vector<9x32xf32> to vector<9x32xbf16>
    %77 = vector.extract_strided_slice %13 {offsets = [320, 0], sizes = [32, 64], strides = [1, 1]} : vector<512x64xbf16> to vector<32x64xbf16>
    %cst_38 = arith.constant dense<0.000000e+00> : vector<9x64xf32>
    %78 = tpu.matmul %76, %77, %cst_38 {dimension_numbers = #tpu.dot_dimension_numbers<[1], [0], [0], [1], [0, 0, 1, 1], [], []>} : vector<9x32xbf16>, vector<32x64xbf16>, vector<9x64xf32> -> vector<9x64xf32>
    %79 = arith.addf %74, %78 : vector<9x64xf32>
    %80 = vector.extract_strided_slice %23 {offsets = [99, 0], sizes = [9, 32], strides = [1, 1]} : vector<144x32xf32> to vector<9x32xf32>
    %81 = arith.truncf %80 : vector<9x32xf32> to vector<9x32xbf16>
    %82 = vector.extract_strided_slice %13 {offsets = [352, 0], sizes = [32, 64], strides = [1, 1]} : vector<512x64xbf16> to vector<32x64xbf16>
    %cst_39 = arith.constant dense<0.000000e+00> : vector<9x64xf32>
    %83 = tpu.matmul %81, %82, %cst_39 {dimension_numbers = #tpu.dot_dimension_numbers<[1], [0], [0], [1], [0, 0, 1, 1], [], []>} : vector<9x32xbf16>, vector<32x64xbf16>, vector<9x64xf32> -> vector<9x64xf32>
    %84 = arith.addf %79, %83 : vector<9x64xf32>
    %85 = vector.extract_strided_slice %23 {offsets = [108, 0], sizes = [9, 32], strides = [1, 1]} : vector<144x32xf32> to vector<9x32xf32>
    %86 = arith.truncf %85 : vector<9x32xf32> to vector<9x32xbf16>
    %87 = vector.extract_strided_slice %13 {offsets = [384, 0], sizes = [32, 64], strides = [1, 1]} : vector<512x64xbf16> to vector<32x64xbf16>
    %cst_40 = arith.constant dense<0.000000e+00> : vector<9x64xf32>
    %88 = tpu.matmul %86, %87, %cst_40 {dimension_numbers = #tpu.dot_dimension_numbers<[1], [0], [0], [1], [0, 0, 1, 1], [], []>} : vector<9x32xbf16>, vector<32x64xbf16>, vector<9x64xf32> -> vector<9x64xf32>
    %89 = arith.addf %84, %88 : vector<9x64xf32>
    %90 = vector.extract_strided_slice %23 {offsets = [117, 0], sizes = [9, 32], strides = [1, 1]} : vector<144x32xf32> to vector<9x32xf32>
    %91 = arith.truncf %90 : vector<9x32xf32> to vector<9x32xbf16>
    %92 = vector.extract_strided_slice %13 {offsets = [416, 0], sizes = [32, 64], strides = [1, 1]} : vector<512x64xbf16> to vector<32x64xbf16>
    %cst_41 = arith.constant dense<0.000000e+00> : vector<9x64xf32>
    %93 = tpu.matmul %91, %92, %cst_41 {dimension_numbers = #tpu.dot_dimension_numbers<[1], [0], [0], [1], [0, 0, 1, 1], [], []>} : vector<9x32xbf16>, vector<32x64xbf16>, vector<9x64xf32> -> vector<9x64xf32>
    %94 = arith.addf %89, %93 : vector<9x64xf32>
    %95 = vector.extract_strided_slice %23 {offsets = [126, 0], sizes = [9, 32], strides = [1, 1]} : vector<144x32xf32> to vector<9x32xf32>
    %96 = arith.truncf %95 : vector<9x32xf32> to vector<9x32xbf16>
    %97 = vector.extract_strided_slice %13 {offsets = [448, 0], sizes = [32, 64], strides = [1, 1]} : vector<512x64xbf16> to vector<32x64xbf16>
    %cst_42 = arith.constant dense<0.000000e+00> : vector<9x64xf32>
    %98 = tpu.matmul %96, %97, %cst_42 {dimension_numbers = #tpu.dot_dimension_numbers<[1], [0], [0], [1], [0, 0, 1, 1], [], []>} : vector<9x32xbf16>, vector<32x64xbf16>, vector<9x64xf32> -> vector<9x64xf32>
    %99 = arith.addf %94, %98 : vector<9x64xf32>
    %100 = vector.extract_strided_slice %23 {offsets = [135, 0], sizes = [9, 32], strides = [1, 1]} : vector<144x32xf32> to vector<9x32xf32>
    %101 = arith.truncf %100 : vector<9x32xf32> to vector<9x32xbf16>
    %102 = vector.extract_strided_slice %13 {offsets = [480, 0], sizes = [32, 64], strides = [1, 1]} : vector<512x64xbf16> to vector<32x64xbf16>
    %cst_43 = arith.constant dense<0.000000e+00> : vector<9x64xf32>
    %103 = tpu.matmul %101, %102, %cst_43 {dimension_numbers = #tpu.dot_dimension_numbers<[1], [0], [0], [1], [0, 0, 1, 1], [], []>} : vector<9x32xbf16>, vector<32x64xbf16>, vector<9x64xf32> -> vector<9x64xf32>
    %104 = arith.addf %99, %103 : vector<9x64xf32>
    %cst_44 = arith.constant 0.000000e+00 : f32
    %105 = vector.broadcast %cst_44 : f32 to vector<9x64xf32>
    %106 = arith.cmpf oge, %104, %105 : vector<9x64xf32>
    %cst_45 = arith.constant 0.00999999977 : f32
    %107 = vector.broadcast %cst_45 : f32 to vector<9x64xf32>
    %108 = arith.mulf %107, %104 : vector<9x64xf32>
    %109 = arith.select %106, %104, %108 : vector<9x64xi1>, vector<9x64xf32>
    %110 = arith.truncf %109 : vector<9x64xf32> to vector<9x64xbf16>
    %cst_46 = arith.constant dense<0.000000e+00> : vector<9x64xf32>
    %111 = tpu.matmul %15, %110, %cst_46 {dimension_numbers = #tpu.dot_dimension_numbers<[1], [0], [0], [1], [0, 0, 1, 1], [], []>} : vector<9x9xbf16>, vector<9x64xbf16>, vector<9x64xf32> -> vector<9x64xf32>
    %112 = vector.extract_strided_slice %111 {offsets = [0, 0], sizes = [1, 64], strides = [1, 1]} : vector<9x64xf32> to vector<1x64xf32>
    %113 = arith.truncf %112 : vector<1x64xf32> to vector<1x64xbf16>
    %114 = vector.extract_strided_slice %16 {offsets = [0, 0], sizes = [64, 64], strides = [1, 1]} : vector<576x64xbf16> to vector<64x64xbf16>
    %cst_47 = arith.constant dense<0.000000e+00> : vector<1x64xf32>
    %115 = tpu.matmul %113, %114, %cst_47 {dimension_numbers = #tpu.dot_dimension_numbers<[1], [0], [0], [1], [0, 0, 1, 1], [], []>} : vector<1x64xbf16>, vector<64x64xbf16>, vector<1x64xf32> -> vector<1x64xf32>
    %116 = arith.addf %17, %115 : vector<1x64xf32>
    %117 = vector.extract_strided_slice %111 {offsets = [1, 0], sizes = [1, 64], strides = [1, 1]} : vector<9x64xf32> to vector<1x64xf32>
    %118 = arith.truncf %117 : vector<1x64xf32> to vector<1x64xbf16>
    %119 = vector.extract_strided_slice %16 {offsets = [64, 0], sizes = [64, 64], strides = [1, 1]} : vector<576x64xbf16> to vector<64x64xbf16>
    %cst_48 = arith.constant dense<0.000000e+00> : vector<1x64xf32>
    %120 = tpu.matmul %118, %119, %cst_48 {dimension_numbers = #tpu.dot_dimension_numbers<[1], [0], [0], [1], [0, 0, 1, 1], [], []>} : vector<1x64xbf16>, vector<64x64xbf16>, vector<1x64xf32> -> vector<1x64xf32>
    %121 = arith.addf %116, %120 : vector<1x64xf32>
    %122 = vector.extract_strided_slice %111 {offsets = [2, 0], sizes = [1, 64], strides = [1, 1]} : vector<9x64xf32> to vector<1x64xf32>
    %123 = arith.truncf %122 : vector<1x64xf32> to vector<1x64xbf16>
    %124 = vector.extract_strided_slice %16 {offsets = [128, 0], sizes = [64, 64], strides = [1, 1]} : vector<576x64xbf16> to vector<64x64xbf16>
    %cst_49 = arith.constant dense<0.000000e+00> : vector<1x64xf32>
    %125 = tpu.matmul %123, %124, %cst_49 {dimension_numbers = #tpu.dot_dimension_numbers<[1], [0], [0], [1], [0, 0, 1, 1], [], []>} : vector<1x64xbf16>, vector<64x64xbf16>, vector<1x64xf32> -> vector<1x64xf32>
    %126 = arith.addf %121, %125 : vector<1x64xf32>
    %127 = vector.extract_strided_slice %111 {offsets = [3, 0], sizes = [1, 64], strides = [1, 1]} : vector<9x64xf32> to vector<1x64xf32>
    %128 = arith.truncf %127 : vector<1x64xf32> to vector<1x64xbf16>
    %129 = vector.extract_strided_slice %16 {offsets = [192, 0], sizes = [64, 64], strides = [1, 1]} : vector<576x64xbf16> to vector<64x64xbf16>
    %cst_50 = arith.constant dense<0.000000e+00> : vector<1x64xf32>
    %130 = tpu.matmul %128, %129, %cst_50 {dimension_numbers = #tpu.dot_dimension_numbers<[1], [0], [0], [1], [0, 0, 1, 1], [], []>} : vector<1x64xbf16>, vector<64x64xbf16>, vector<1x64xf32> -> vector<1x64xf32>
    %131 = arith.addf %126, %130 : vector<1x64xf32>
    %132 = vector.extract_strided_slice %111 {offsets = [4, 0], sizes = [1, 64], strides = [1, 1]} : vector<9x64xf32> to vector<1x64xf32>
    %133 = arith.truncf %132 : vector<1x64xf32> to vector<1x64xbf16>
    %134 = vector.extract_strided_slice %16 {offsets = [256, 0], sizes = [64, 64], strides = [1, 1]} : vector<576x64xbf16> to vector<64x64xbf16>
    %cst_51 = arith.constant dense<0.000000e+00> : vector<1x64xf32>
    %135 = tpu.matmul %133, %134, %cst_51 {dimension_numbers = #tpu.dot_dimension_numbers<[1], [0], [0], [1], [0, 0, 1, 1], [], []>} : vector<1x64xbf16>, vector<64x64xbf16>, vector<1x64xf32> -> vector<1x64xf32>
    %136 = arith.addf %131, %135 : vector<1x64xf32>
    %137 = vector.extract_strided_slice %111 {offsets = [5, 0], sizes = [1, 64], strides = [1, 1]} : vector<9x64xf32> to vector<1x64xf32>
    %138 = arith.truncf %137 : vector<1x64xf32> to vector<1x64xbf16>
    %139 = vector.extract_strided_slice %16 {offsets = [320, 0], sizes = [64, 64], strides = [1, 1]} : vector<576x64xbf16> to vector<64x64xbf16>
    %cst_52 = arith.constant dense<0.000000e+00> : vector<1x64xf32>
    %140 = tpu.matmul %138, %139, %cst_52 {dimension_numbers = #tpu.dot_dimension_numbers<[1], [0], [0], [1], [0, 0, 1, 1], [], []>} : vector<1x64xbf16>, vector<64x64xbf16>, vector<1x64xf32> -> vector<1x64xf32>
    %141 = arith.addf %136, %140 : vector<1x64xf32>
    %142 = vector.extract_strided_slice %111 {offsets = [6, 0], sizes = [1, 64], strides = [1, 1]} : vector<9x64xf32> to vector<1x64xf32>
    %143 = arith.truncf %142 : vector<1x64xf32> to vector<1x64xbf16>
    %144 = vector.extract_strided_slice %16 {offsets = [384, 0], sizes = [64, 64], strides = [1, 1]} : vector<576x64xbf16> to vector<64x64xbf16>
    %cst_53 = arith.constant dense<0.000000e+00> : vector<1x64xf32>
    %145 = tpu.matmul %143, %144, %cst_53 {dimension_numbers = #tpu.dot_dimension_numbers<[1], [0], [0], [1], [0, 0, 1, 1], [], []>} : vector<1x64xbf16>, vector<64x64xbf16>, vector<1x64xf32> -> vector<1x64xf32>
    %146 = arith.addf %141, %145 : vector<1x64xf32>
    %147 = vector.extract_strided_slice %111 {offsets = [7, 0], sizes = [1, 64], strides = [1, 1]} : vector<9x64xf32> to vector<1x64xf32>
    %148 = arith.truncf %147 : vector<1x64xf32> to vector<1x64xbf16>
    %149 = vector.extract_strided_slice %16 {offsets = [448, 0], sizes = [64, 64], strides = [1, 1]} : vector<576x64xbf16> to vector<64x64xbf16>
    %cst_54 = arith.constant dense<0.000000e+00> : vector<1x64xf32>
    %150 = tpu.matmul %148, %149, %cst_54 {dimension_numbers = #tpu.dot_dimension_numbers<[1], [0], [0], [1], [0, 0, 1, 1], [], []>} : vector<1x64xbf16>, vector<64x64xbf16>, vector<1x64xf32> -> vector<1x64xf32>
    %151 = arith.addf %146, %150 : vector<1x64xf32>
    %152 = vector.extract_strided_slice %111 {offsets = [8, 0], sizes = [1, 64], strides = [1, 1]} : vector<9x64xf32> to vector<1x64xf32>
    %153 = arith.truncf %152 : vector<1x64xf32> to vector<1x64xbf16>
    %154 = vector.extract_strided_slice %16 {offsets = [512, 0], sizes = [64, 64], strides = [1, 1]} : vector<576x64xbf16> to vector<64x64xbf16>
    %cst_55 = arith.constant dense<0.000000e+00> : vector<1x64xf32>
    %155 = tpu.matmul %153, %154, %cst_55 {dimension_numbers = #tpu.dot_dimension_numbers<[1], [0], [0], [1], [0, 0, 1, 1], [], []>} : vector<1x64xbf16>, vector<64x64xbf16>, vector<1x64xf32> -> vector<1x64xf32>
    %156 = arith.addf %151, %155 : vector<1x64xf32>
    %cst_56 = arith.constant 0.000000e+00 : f32
    %157 = vector.broadcast %cst_56 : f32 to vector<1x64xf32>
    %158 = arith.cmpf oge, %156, %157 : vector<1x64xf32>
    %cst_57 = arith.constant 0.00999999977 : f32
    %159 = vector.broadcast %cst_57 : f32 to vector<1x64xf32>
    %160 = arith.mulf %159, %156 : vector<1x64xf32>
    %161 = arith.select %158, %156, %160 : vector<1x64xi1>, vector<1x64xf32>
    %162 = arith.truncf %161 : vector<1x64xf32> to vector<1x64xbf16>
    %cst_58 = arith.constant dense<0.000000e+00> : vector<1x32xf32>
    %163 = tpu.matmul %162, %18, %cst_58 {dimension_numbers = #tpu.dot_dimension_numbers<[1], [0], [0], [1], [0, 0, 1, 1], [], []>} : vector<1x64xbf16>, vector<64x32xbf16>, vector<1x32xf32> -> vector<1x32xf32>
    %164 = arith.addf %19, %163 : vector<1x32xf32>
    %cst_59 = arith.constant 0.000000e+00 : f32
    %165 = vector.broadcast %cst_59 : f32 to vector<1x32xf32>
    %166 = arith.maximumf %164, %165 : vector<1x32xf32>
    %167 = arith.truncf %166 : vector<1x32xf32> to vector<1x32xbf16>
    %cst_60 = arith.constant dense<0.000000e+00> : vector<1x128xf32>
    %168 = tpu.matmul %167, %20, %cst_60 {dimension_numbers = #tpu.dot_dimension_numbers<[1], [0], [0], [1], [0, 0, 1, 1], [], []>} : vector<1x32xbf16>, vector<32x128xbf16>, vector<1x128xf32> -> vector<1x128xf32>
    %169 = arith.addf %168, %21 : vector<1x128xf32>
    %cst_61 = arith.constant 0.000000e+00 : f32
    %170 = vector.broadcast %cst_61 : f32 to vector<1x128xf32>
    %171 = arith.maximumf %169, %170 : vector<1x128xf32>
    %172 = vector.extract_strided_slice %11 {offsets = [64, 0], sizes = [64, 32], strides = [1, 1]} : vector<128x32xbf16> to vector<64x32xbf16>
    %cst_62 = arith.constant dense<0.000000e+00> : vector<144x32xf32>
    %173 = tpu.matmul %12, %172, %cst_62 {dimension_numbers = #tpu.dot_dimension_numbers<[1], [0], [0], [1], [0, 0, 1, 1], [], []>} : vector<144x64xbf16>, vector<64x32xbf16>, vector<144x32xf32> -> vector<144x32xf32>
    %174 = vector.extract_strided_slice %173 {offsets = [0, 0], sizes = [9, 32], strides = [1, 1]} : vector<144x32xf32> to vector<9x32xf32>
    %175 = arith.truncf %174 : vector<9x32xf32> to vector<9x32xbf16>
    %176 = vector.extract_strided_slice %13 {offsets = [0, 0], sizes = [32, 64], strides = [1, 1]} : vector<512x64xbf16> to vector<32x64xbf16>
    %cst_63 = arith.constant dense<0.000000e+00> : vector<9x64xf32>
    %177 = tpu.matmul %175, %176, %cst_63 {dimension_numbers = #tpu.dot_dimension_numbers<[1], [0], [0], [1], [0, 0, 1, 1], [], []>} : vector<9x32xbf16>, vector<32x64xbf16>, vector<9x64xf32> -> vector<9x64xf32>
    %178 = vector.broadcast %14 : vector<1x64xf32> to vector<9x64xf32>
    %179 = arith.addf %178, %177 : vector<9x64xf32>
    %180 = vector.extract_strided_slice %173 {offsets = [9, 0], sizes = [9, 32], strides = [1, 1]} : vector<144x32xf32> to vector<9x32xf32>
    %181 = arith.truncf %180 : vector<9x32xf32> to vector<9x32xbf16>
    %182 = vector.extract_strided_slice %13 {offsets = [32, 0], sizes = [32, 64], strides = [1, 1]} : vector<512x64xbf16> to vector<32x64xbf16>
    %cst_64 = arith.constant dense<0.000000e+00> : vector<9x64xf32>
    %183 = tpu.matmul %181, %182, %cst_64 {dimension_numbers = #tpu.dot_dimension_numbers<[1], [0], [0], [1], [0, 0, 1, 1], [], []>} : vector<9x32xbf16>, vector<32x64xbf16>, vector<9x64xf32> -> vector<9x64xf32>
    %184 = arith.addf %179, %183 : vector<9x64xf32>
    %185 = vector.extract_strided_slice %173 {offsets = [18, 0], sizes = [9, 32], strides = [1, 1]} : vector<144x32xf32> to vector<9x32xf32>
    %186 = arith.truncf %185 : vector<9x32xf32> to vector<9x32xbf16>
    %187 = vector.extract_strided_slice %13 {offsets = [64, 0], sizes = [32, 64], strides = [1, 1]} : vector<512x64xbf16> to vector<32x64xbf16>
    %cst_65 = arith.constant dense<0.000000e+00> : vector<9x64xf32>
    %188 = tpu.matmul %186, %187, %cst_65 {dimension_numbers = #tpu.dot_dimension_numbers<[1], [0], [0], [1], [0, 0, 1, 1], [], []>} : vector<9x32xbf16>, vector<32x64xbf16>, vector<9x64xf32> -> vector<9x64xf32>
    %189 = arith.addf %184, %188 : vector<9x64xf32>
    %190 = vector.extract_strided_slice %173 {offsets = [27, 0], sizes = [9, 32], strides = [1, 1]} : vector<144x32xf32> to vector<9x32xf32>
    %191 = arith.truncf %190 : vector<9x32xf32> to vector<9x32xbf16>
    %192 = vector.extract_strided_slice %13 {offsets = [96, 0], sizes = [32, 64], strides = [1, 1]} : vector<512x64xbf16> to vector<32x64xbf16>
    %cst_66 = arith.constant dense<0.000000e+00> : vector<9x64xf32>
    %193 = tpu.matmul %191, %192, %cst_66 {dimension_numbers = #tpu.dot_dimension_numbers<[1], [0], [0], [1], [0, 0, 1, 1], [], []>} : vector<9x32xbf16>, vector<32x64xbf16>, vector<9x64xf32> -> vector<9x64xf32>
    %194 = arith.addf %189, %193 : vector<9x64xf32>
    %195 = vector.extract_strided_slice %173 {offsets = [36, 0], sizes = [9, 32], strides = [1, 1]} : vector<144x32xf32> to vector<9x32xf32>
    %196 = arith.truncf %195 : vector<9x32xf32> to vector<9x32xbf16>
    %197 = vector.extract_strided_slice %13 {offsets = [128, 0], sizes = [32, 64], strides = [1, 1]} : vector<512x64xbf16> to vector<32x64xbf16>
    %cst_67 = arith.constant dense<0.000000e+00> : vector<9x64xf32>
    %198 = tpu.matmul %196, %197, %cst_67 {dimension_numbers = #tpu.dot_dimension_numbers<[1], [0], [0], [1], [0, 0, 1, 1], [], []>} : vector<9x32xbf16>, vector<32x64xbf16>, vector<9x64xf32> -> vector<9x64xf32>
    %199 = arith.addf %194, %198 : vector<9x64xf32>
    %200 = vector.extract_strided_slice %173 {offsets = [45, 0], sizes = [9, 32], strides = [1, 1]} : vector<144x32xf32> to vector<9x32xf32>
    %201 = arith.truncf %200 : vector<9x32xf32> to vector<9x32xbf16>
    %202 = vector.extract_strided_slice %13 {offsets = [160, 0], sizes = [32, 64], strides = [1, 1]} : vector<512x64xbf16> to vector<32x64xbf16>
    %cst_68 = arith.constant dense<0.000000e+00> : vector<9x64xf32>
    %203 = tpu.matmul %201, %202, %cst_68 {dimension_numbers = #tpu.dot_dimension_numbers<[1], [0], [0], [1], [0, 0, 1, 1], [], []>} : vector<9x32xbf16>, vector<32x64xbf16>, vector<9x64xf32> -> vector<9x64xf32>
    %204 = arith.addf %199, %203 : vector<9x64xf32>
    %205 = vector.extract_strided_slice %173 {offsets = [54, 0], sizes = [9, 32], strides = [1, 1]} : vector<144x32xf32> to vector<9x32xf32>
    %206 = arith.truncf %205 : vector<9x32xf32> to vector<9x32xbf16>
    %207 = vector.extract_strided_slice %13 {offsets = [192, 0], sizes = [32, 64], strides = [1, 1]} : vector<512x64xbf16> to vector<32x64xbf16>
    %cst_69 = arith.constant dense<0.000000e+00> : vector<9x64xf32>
    %208 = tpu.matmul %206, %207, %cst_69 {dimension_numbers = #tpu.dot_dimension_numbers<[1], [0], [0], [1], [0, 0, 1, 1], [], []>} : vector<9x32xbf16>, vector<32x64xbf16>, vector<9x64xf32> -> vector<9x64xf32>
    %209 = arith.addf %204, %208 : vector<9x64xf32>
    %210 = vector.extract_strided_slice %173 {offsets = [63, 0], sizes = [9, 32], strides = [1, 1]} : vector<144x32xf32> to vector<9x32xf32>
    %211 = arith.truncf %210 : vector<9x32xf32> to vector<9x32xbf16>
    %212 = vector.extract_strided_slice %13 {offsets = [224, 0], sizes = [32, 64], strides = [1, 1]} : vector<512x64xbf16> to vector<32x64xbf16>
    %cst_70 = arith.constant dense<0.000000e+00> : vector<9x64xf32>
    %213 = tpu.matmul %211, %212, %cst_70 {dimension_numbers = #tpu.dot_dimension_numbers<[1], [0], [0], [1], [0, 0, 1, 1], [], []>} : vector<9x32xbf16>, vector<32x64xbf16>, vector<9x64xf32> -> vector<9x64xf32>
    %214 = arith.addf %209, %213 : vector<9x64xf32>
    %215 = vector.extract_strided_slice %173 {offsets = [72, 0], sizes = [9, 32], strides = [1, 1]} : vector<144x32xf32> to vector<9x32xf32>
    %216 = arith.truncf %215 : vector<9x32xf32> to vector<9x32xbf16>
    %217 = vector.extract_strided_slice %13 {offsets = [256, 0], sizes = [32, 64], strides = [1, 1]} : vector<512x64xbf16> to vector<32x64xbf16>
    %cst_71 = arith.constant dense<0.000000e+00> : vector<9x64xf32>
    %218 = tpu.matmul %216, %217, %cst_71 {dimension_numbers = #tpu.dot_dimension_numbers<[1], [0], [0], [1], [0, 0, 1, 1], [], []>} : vector<9x32xbf16>, vector<32x64xbf16>, vector<9x64xf32> -> vector<9x64xf32>
    %219 = arith.addf %214, %218 : vector<9x64xf32>
    %220 = vector.extract_strided_slice %173 {offsets = [81, 0], sizes = [9, 32], strides = [1, 1]} : vector<144x32xf32> to vector<9x32xf32>
    %221 = arith.truncf %220 : vector<9x32xf32> to vector<9x32xbf16>
    %222 = vector.extract_strided_slice %13 {offsets = [288, 0], sizes = [32, 64], strides = [1, 1]} : vector<512x64xbf16> to vector<32x64xbf16>
    %cst_72 = arith.constant dense<0.000000e+00> : vector<9x64xf32>
    %223 = tpu.matmul %221, %222, %cst_72 {dimension_numbers = #tpu.dot_dimension_numbers<[1], [0], [0], [1], [0, 0, 1, 1], [], []>} : vector<9x32xbf16>, vector<32x64xbf16>, vector<9x64xf32> -> vector<9x64xf32>
    %224 = arith.addf %219, %223 : vector<9x64xf32>
    %225 = vector.extract_strided_slice %173 {offsets = [90, 0], sizes = [9, 32], strides = [1, 1]} : vector<144x32xf32> to vector<9x32xf32>
    %226 = arith.truncf %225 : vector<9x32xf32> to vector<9x32xbf16>
    %227 = vector.extract_strided_slice %13 {offsets = [320, 0], sizes = [32, 64], strides = [1, 1]} : vector<512x64xbf16> to vector<32x64xbf16>
    %cst_73 = arith.constant dense<0.000000e+00> : vector<9x64xf32>
    %228 = tpu.matmul %226, %227, %cst_73 {dimension_numbers = #tpu.dot_dimension_numbers<[1], [0], [0], [1], [0, 0, 1, 1], [], []>} : vector<9x32xbf16>, vector<32x64xbf16>, vector<9x64xf32> -> vector<9x64xf32>
    %229 = arith.addf %224, %228 : vector<9x64xf32>
    %230 = vector.extract_strided_slice %173 {offsets = [99, 0], sizes = [9, 32], strides = [1, 1]} : vector<144x32xf32> to vector<9x32xf32>
    %231 = arith.truncf %230 : vector<9x32xf32> to vector<9x32xbf16>
    %232 = vector.extract_strided_slice %13 {offsets = [352, 0], sizes = [32, 64], strides = [1, 1]} : vector<512x64xbf16> to vector<32x64xbf16>
    %cst_74 = arith.constant dense<0.000000e+00> : vector<9x64xf32>
    %233 = tpu.matmul %231, %232, %cst_74 {dimension_numbers = #tpu.dot_dimension_numbers<[1], [0], [0], [1], [0, 0, 1, 1], [], []>} : vector<9x32xbf16>, vector<32x64xbf16>, vector<9x64xf32> -> vector<9x64xf32>
    %234 = arith.addf %229, %233 : vector<9x64xf32>
    %235 = vector.extract_strided_slice %173 {offsets = [108, 0], sizes = [9, 32], strides = [1, 1]} : vector<144x32xf32> to vector<9x32xf32>
    %236 = arith.truncf %235 : vector<9x32xf32> to vector<9x32xbf16>
    %237 = vector.extract_strided_slice %13 {offsets = [384, 0], sizes = [32, 64], strides = [1, 1]} : vector<512x64xbf16> to vector<32x64xbf16>
    %cst_75 = arith.constant dense<0.000000e+00> : vector<9x64xf32>
    %238 = tpu.matmul %236, %237, %cst_75 {dimension_numbers = #tpu.dot_dimension_numbers<[1], [0], [0], [1], [0, 0, 1, 1], [], []>} : vector<9x32xbf16>, vector<32x64xbf16>, vector<9x64xf32> -> vector<9x64xf32>
    %239 = arith.addf %234, %238 : vector<9x64xf32>
    %240 = vector.extract_strided_slice %173 {offsets = [117, 0], sizes = [9, 32], strides = [1, 1]} : vector<144x32xf32> to vector<9x32xf32>
    %241 = arith.truncf %240 : vector<9x32xf32> to vector<9x32xbf16>
    %242 = vector.extract_strided_slice %13 {offsets = [416, 0], sizes = [32, 64], strides = [1, 1]} : vector<512x64xbf16> to vector<32x64xbf16>
    %cst_76 = arith.constant dense<0.000000e+00> : vector<9x64xf32>
    %243 = tpu.matmul %241, %242, %cst_76 {dimension_numbers = #tpu.dot_dimension_numbers<[1], [0], [0], [1], [0, 0, 1, 1], [], []>} : vector<9x32xbf16>, vector<32x64xbf16>, vector<9x64xf32> -> vector<9x64xf32>
    %244 = arith.addf %239, %243 : vector<9x64xf32>
    %245 = vector.extract_strided_slice %173 {offsets = [126, 0], sizes = [9, 32], strides = [1, 1]} : vector<144x32xf32> to vector<9x32xf32>
    %246 = arith.truncf %245 : vector<9x32xf32> to vector<9x32xbf16>
    %247 = vector.extract_strided_slice %13 {offsets = [448, 0], sizes = [32, 64], strides = [1, 1]} : vector<512x64xbf16> to vector<32x64xbf16>
    %cst_77 = arith.constant dense<0.000000e+00> : vector<9x64xf32>
    %248 = tpu.matmul %246, %247, %cst_77 {dimension_numbers = #tpu.dot_dimension_numbers<[1], [0], [0], [1], [0, 0, 1, 1], [], []>} : vector<9x32xbf16>, vector<32x64xbf16>, vector<9x64xf32> -> vector<9x64xf32>
    %249 = arith.addf %244, %248 : vector<9x64xf32>
    %250 = vector.extract_strided_slice %173 {offsets = [135, 0], sizes = [9, 32], strides = [1, 1]} : vector<144x32xf32> to vector<9x32xf32>
    %251 = arith.truncf %250 : vector<9x32xf32> to vector<9x32xbf16>
    %252 = vector.extract_strided_slice %13 {offsets = [480, 0], sizes = [32, 64], strides = [1, 1]} : vector<512x64xbf16> to vector<32x64xbf16>
    %cst_78 = arith.constant dense<0.000000e+00> : vector<9x64xf32>
    %253 = tpu.matmul %251, %252, %cst_78 {dimension_numbers = #tpu.dot_dimension_numbers<[1], [0], [0], [1], [0, 0, 1, 1], [], []>} : vector<9x32xbf16>, vector<32x64xbf16>, vector<9x64xf32> -> vector<9x64xf32>
    %254 = arith.addf %249, %253 : vector<9x64xf32>
    %cst_79 = arith.constant 0.000000e+00 : f32
    %255 = vector.broadcast %cst_79 : f32 to vector<9x64xf32>
    %256 = arith.cmpf oge, %254, %255 : vector<9x64xf32>
    %cst_80 = arith.constant 0.00999999977 : f32
    %257 = vector.broadcast %cst_80 : f32 to vector<9x64xf32>
    %258 = arith.mulf %257, %254 : vector<9x64xf32>
    %259 = arith.select %256, %254, %258 : vector<9x64xi1>, vector<9x64xf32>
    %260 = arith.truncf %259 : vector<9x64xf32> to vector<9x64xbf16>
    %cst_81 = arith.constant dense<0.000000e+00> : vector<9x64xf32>
    %261 = tpu.matmul %15, %260, %cst_81 {dimension_numbers = #tpu.dot_dimension_numbers<[1], [0], [0], [1], [0, 0, 1, 1], [], []>} : vector<9x9xbf16>, vector<9x64xbf16>, vector<9x64xf32> -> vector<9x64xf32>
    %262 = vector.extract_strided_slice %261 {offsets = [0, 0], sizes = [1, 64], strides = [1, 1]} : vector<9x64xf32> to vector<1x64xf32>
    %263 = arith.truncf %262 : vector<1x64xf32> to vector<1x64xbf16>
    %264 = vector.extract_strided_slice %16 {offsets = [0, 0], sizes = [64, 64], strides = [1, 1]} : vector<576x64xbf16> to vector<64x64xbf16>
    %cst_82 = arith.constant dense<0.000000e+00> : vector<1x64xf32>
    %265 = tpu.matmul %263, %264, %cst_82 {dimension_numbers = #tpu.dot_dimension_numbers<[1], [0], [0], [1], [0, 0, 1, 1], [], []>} : vector<1x64xbf16>, vector<64x64xbf16>, vector<1x64xf32> -> vector<1x64xf32>
    %266 = arith.addf %17, %265 : vector<1x64xf32>
    %267 = vector.extract_strided_slice %261 {offsets = [1, 0], sizes = [1, 64], strides = [1, 1]} : vector<9x64xf32> to vector<1x64xf32>
    %268 = arith.truncf %267 : vector<1x64xf32> to vector<1x64xbf16>
    %269 = vector.extract_strided_slice %16 {offsets = [64, 0], sizes = [64, 64], strides = [1, 1]} : vector<576x64xbf16> to vector<64x64xbf16>
    %cst_83 = arith.constant dense<0.000000e+00> : vector<1x64xf32>
    %270 = tpu.matmul %268, %269, %cst_83 {dimension_numbers = #tpu.dot_dimension_numbers<[1], [0], [0], [1], [0, 0, 1, 1], [], []>} : vector<1x64xbf16>, vector<64x64xbf16>, vector<1x64xf32> -> vector<1x64xf32>
    %271 = arith.addf %266, %270 : vector<1x64xf32>
    %272 = vector.extract_strided_slice %261 {offsets = [2, 0], sizes = [1, 64], strides = [1, 1]} : vector<9x64xf32> to vector<1x64xf32>
    %273 = arith.truncf %272 : vector<1x64xf32> to vector<1x64xbf16>
    %274 = vector.extract_strided_slice %16 {offsets = [128, 0], sizes = [64, 64], strides = [1, 1]} : vector<576x64xbf16> to vector<64x64xbf16>
    %cst_84 = arith.constant dense<0.000000e+00> : vector<1x64xf32>
    %275 = tpu.matmul %273, %274, %cst_84 {dimension_numbers = #tpu.dot_dimension_numbers<[1], [0], [0], [1], [0, 0, 1, 1], [], []>} : vector<1x64xbf16>, vector<64x64xbf16>, vector<1x64xf32> -> vector<1x64xf32>
    %276 = arith.addf %271, %275 : vector<1x64xf32>
    %277 = vector.extract_strided_slice %261 {offsets = [3, 0], sizes = [1, 64], strides = [1, 1]} : vector<9x64xf32> to vector<1x64xf32>
    %278 = arith.truncf %277 : vector<1x64xf32> to vector<1x64xbf16>
    %279 = vector.extract_strided_slice %16 {offsets = [192, 0], sizes = [64, 64], strides = [1, 1]} : vector<576x64xbf16> to vector<64x64xbf16>
    %cst_85 = arith.constant dense<0.000000e+00> : vector<1x64xf32>
    %280 = tpu.matmul %278, %279, %cst_85 {dimension_numbers = #tpu.dot_dimension_numbers<[1], [0], [0], [1], [0, 0, 1, 1], [], []>} : vector<1x64xbf16>, vector<64x64xbf16>, vector<1x64xf32> -> vector<1x64xf32>
    %281 = arith.addf %276, %280 : vector<1x64xf32>
    %282 = vector.extract_strided_slice %261 {offsets = [4, 0], sizes = [1, 64], strides = [1, 1]} : vector<9x64xf32> to vector<1x64xf32>
    %283 = arith.truncf %282 : vector<1x64xf32> to vector<1x64xbf16>
    %284 = vector.extract_strided_slice %16 {offsets = [256, 0], sizes = [64, 64], strides = [1, 1]} : vector<576x64xbf16> to vector<64x64xbf16>
    %cst_86 = arith.constant dense<0.000000e+00> : vector<1x64xf32>
    %285 = tpu.matmul %283, %284, %cst_86 {dimension_numbers = #tpu.dot_dimension_numbers<[1], [0], [0], [1], [0, 0, 1, 1], [], []>} : vector<1x64xbf16>, vector<64x64xbf16>, vector<1x64xf32> -> vector<1x64xf32>
    %286 = arith.addf %281, %285 : vector<1x64xf32>
    %287 = vector.extract_strided_slice %261 {offsets = [5, 0], sizes = [1, 64], strides = [1, 1]} : vector<9x64xf32> to vector<1x64xf32>
    %288 = arith.truncf %287 : vector<1x64xf32> to vector<1x64xbf16>
    %289 = vector.extract_strided_slice %16 {offsets = [320, 0], sizes = [64, 64], strides = [1, 1]} : vector<576x64xbf16> to vector<64x64xbf16>
    %cst_87 = arith.constant dense<0.000000e+00> : vector<1x64xf32>
    %290 = tpu.matmul %288, %289, %cst_87 {dimension_numbers = #tpu.dot_dimension_numbers<[1], [0], [0], [1], [0, 0, 1, 1], [], []>} : vector<1x64xbf16>, vector<64x64xbf16>, vector<1x64xf32> -> vector<1x64xf32>
    %291 = arith.addf %286, %290 : vector<1x64xf32>
    %292 = vector.extract_strided_slice %261 {offsets = [6, 0], sizes = [1, 64], strides = [1, 1]} : vector<9x64xf32> to vector<1x64xf32>
    %293 = arith.truncf %292 : vector<1x64xf32> to vector<1x64xbf16>
    %294 = vector.extract_strided_slice %16 {offsets = [384, 0], sizes = [64, 64], strides = [1, 1]} : vector<576x64xbf16> to vector<64x64xbf16>
    %cst_88 = arith.constant dense<0.000000e+00> : vector<1x64xf32>
    %295 = tpu.matmul %293, %294, %cst_88 {dimension_numbers = #tpu.dot_dimension_numbers<[1], [0], [0], [1], [0, 0, 1, 1], [], []>} : vector<1x64xbf16>, vector<64x64xbf16>, vector<1x64xf32> -> vector<1x64xf32>
    %296 = arith.addf %291, %295 : vector<1x64xf32>
    %297 = vector.extract_strided_slice %261 {offsets = [7, 0], sizes = [1, 64], strides = [1, 1]} : vector<9x64xf32> to vector<1x64xf32>
    %298 = arith.truncf %297 : vector<1x64xf32> to vector<1x64xbf16>
    %299 = vector.extract_strided_slice %16 {offsets = [448, 0], sizes = [64, 64], strides = [1, 1]} : vector<576x64xbf16> to vector<64x64xbf16>
    %cst_89 = arith.constant dense<0.000000e+00> : vector<1x64xf32>
    %300 = tpu.matmul %298, %299, %cst_89 {dimension_numbers = #tpu.dot_dimension_numbers<[1], [0], [0], [1], [0, 0, 1, 1], [], []>} : vector<1x64xbf16>, vector<64x64xbf16>, vector<1x64xf32> -> vector<1x64xf32>
    %301 = arith.addf %296, %300 : vector<1x64xf32>
    %302 = vector.extract_strided_slice %261 {offsets = [8, 0], sizes = [1, 64], strides = [1, 1]} : vector<9x64xf32> to vector<1x64xf32>
    %303 = arith.truncf %302 : vector<1x64xf32> to vector<1x64xbf16>
    %304 = vector.extract_strided_slice %16 {offsets = [512, 0], sizes = [64, 64], strides = [1, 1]} : vector<576x64xbf16> to vector<64x64xbf16>
    %cst_90 = arith.constant dense<0.000000e+00> : vector<1x64xf32>
    %305 = tpu.matmul %303, %304, %cst_90 {dimension_numbers = #tpu.dot_dimension_numbers<[1], [0], [0], [1], [0, 0, 1, 1], [], []>} : vector<1x64xbf16>, vector<64x64xbf16>, vector<1x64xf32> -> vector<1x64xf32>
    %306 = arith.addf %301, %305 : vector<1x64xf32>
    %cst_91 = arith.constant 0.000000e+00 : f32
    %307 = vector.broadcast %cst_91 : f32 to vector<1x64xf32>
    %308 = arith.cmpf oge, %306, %307 : vector<1x64xf32>
    %cst_92 = arith.constant 0.00999999977 : f32
    %309 = vector.broadcast %cst_92 : f32 to vector<1x64xf32>
    %310 = arith.mulf %309, %306 : vector<1x64xf32>
    %311 = arith.select %308, %306, %310 : vector<1x64xi1>, vector<1x64xf32>
    %312 = arith.truncf %311 : vector<1x64xf32> to vector<1x64xbf16>
    %cst_93 = arith.constant dense<0.000000e+00> : vector<1x32xf32>
    %313 = tpu.matmul %312, %18, %cst_93 {dimension_numbers = #tpu.dot_dimension_numbers<[1], [0], [0], [1], [0, 0, 1, 1], [], []>} : vector<1x64xbf16>, vector<64x32xbf16>, vector<1x32xf32> -> vector<1x32xf32>
    %314 = arith.addf %19, %313 : vector<1x32xf32>
    %cst_94 = arith.constant 0.000000e+00 : f32
    %315 = vector.broadcast %cst_94 : f32 to vector<1x32xf32>
    %316 = arith.maximumf %314, %315 : vector<1x32xf32>
    %317 = arith.truncf %316 : vector<1x32xf32> to vector<1x32xbf16>
    %cst_95 = arith.constant dense<0.000000e+00> : vector<1x128xf32>
    %318 = tpu.matmul %317, %20, %cst_95 {dimension_numbers = #tpu.dot_dimension_numbers<[1], [0], [0], [1], [0, 0, 1, 1], [], []>} : vector<1x32xbf16>, vector<32x128xbf16>, vector<1x128xf32> -> vector<1x128xf32>
    %319 = arith.addf %318, %21 : vector<1x128xf32>
    %cst_96 = arith.constant 0.000000e+00 : f32
    %320 = vector.broadcast %cst_96 : f32 to vector<1x128xf32>
    %321 = arith.maximumf %319, %320 : vector<1x128xf32>
    %322 = tpu.concatenate %171, %321 in 0 : vector<1x128xf32>, vector<1x128xf32> -> vector<2x128xf32>
    %c0_97 = arith.constant 0 : index
    %c0_98 = arith.constant 0 : index
    %323 = vector.load %arg14[%c0_97, %c0_98] : memref<2x128xf32, #tpu.memory_space<vmem>>, vector<2x128xf32>
    tpu.vector_store %arg14[%c0_97, %c0_98], %322 {strides = array<i32>} : memref<2x128xf32, #tpu.memory_space<vmem>>, vector<2x128xf32>,
    return
  }
  func.func @transform_0(%arg0: i32) -> (i32, i32) {
    %c0_i32 = arith.constant 0 : i32
    %c0_i32_0 = arith.constant 0 : i32
    return %arg0, %c0_i32 : i32, i32
  }
  func.func @transform_1(%arg0: i32) -> (i32, i32) {
    %c0_i32 = arith.constant 0 : i32
    %c0_i32_0 = arith.constant 0 : i32
    %c0_i32_1 = arith.constant 0 : i32
    return %c0_i32, %c0_i32_0 : i32, i32
  }
  func.func @transform_2(%arg0: i32) -> (i32, i32) {
    %c0_i32 = arith.constant 0 : i32
    %c0_i32_0 = arith.constant 0 : i32
    %c0_i32_1 = arith.constant 0 : i32
    return %c0_i32, %c0_i32_0 : i32, i32
  }
  func.func @transform_3(%arg0: i32) -> (i32, i32) {
    %c0_i32 = arith.constant 0 : i32
    %c0_i32_0 = arith.constant 0 : i32
    %c0_i32_1 = arith.constant 0 : i32
    return %c0_i32, %c0_i32_0 : i32, i32
  }
  func.func @transform_4(%arg0: i32) -> (i32, i32) {
    %c0_i32 = arith.constant 0 : i32
    %c0_i32_0 = arith.constant 0 : i32
    %c0_i32_1 = arith.constant 0 : i32
    return %c0_i32, %c0_i32_0 : i32, i32
  }
  func.func @transform_5(%arg0: i32) -> (i32, i32) {
    %c0_i32 = arith.constant 0 : i32
    %c0_i32_0 = arith.constant 0 : i32
    %c0_i32_1 = arith.constant 0 : i32
    return %c0_i32, %c0_i32_0 : i32, i32
  }
  func.func @transform_6(%arg0: i32) -> (i32, i32) {
    %c0_i32 = arith.constant 0 : i32
    %c0_i32_0 = arith.constant 0 : i32
    %c0_i32_1 = arith.constant 0 : i32
    return %c0_i32, %c0_i32_0 : i32, i32
  }
  func.func @transform_7(%arg0: i32) -> (i32, i32) {
    %c0_i32 = arith.constant 0 : i32
    %c0_i32_0 = arith.constant 0 : i32
    %c0_i32_1 = arith.constant 0 : i32
    return %c0_i32, %c0_i32_0 : i32, i32
  }
  func.func @transform_8(%arg0: i32) -> (i32, i32) {
    %c0_i32 = arith.constant 0 : i32
    %c0_i32_0 = arith.constant 0 : i32
    %c0_i32_1 = arith.constant 0 : i32
    return %c0_i32, %c0_i32_0 : i32, i32
  }
  func.func @transform_9(%arg0: i32) -> (i32, i32) {
    %c0_i32 = arith.constant 0 : i32
    %c0_i32_0 = arith.constant 0 : i32
    %c0_i32_1 = arith.constant 0 : i32
    return %c0_i32, %c0_i32_0 : i32, i32
  }
  func.func @transform_10(%arg0: i32) -> (i32, i32) {
    %c0_i32 = arith.constant 0 : i32
    %c0_i32_0 = arith.constant 0 : i32
    %c0_i32_1 = arith.constant 0 : i32
    return %c0_i32, %c0_i32_0 : i32, i32
  }
  func.func @transform_11(%arg0: i32) -> (i32, i32) {
    %c0_i32 = arith.constant 0 : i32
    %c0_i32_0 = arith.constant 0 : i32
    %c0_i32_1 = arith.constant 0 : i32
    return %c0_i32, %c0_i32_0 : i32, i32
  }
  func.func @transform_12(%arg0: i32) -> (i32, i32) {
    %c0_i32 = arith.constant 0 : i32
    %c0_i32_0 = arith.constant 0 : i32
    %c0_i32_1 = arith.constant 0 : i32
    return %c0_i32, %c0_i32_0 : i32, i32
  }
  func.func @transform_13(%arg0: i32) -> (i32, i32) {
    %c0_i32 = arith.constant 0 : i32
    %c0_i32_0 = arith.constant 0 : i32
    return %arg0, %c0_i32 : i32, i32
  }
}

</mosaic_0001>

<bundles_post_ra>
// kernel: _forward_impl.1
= control target key start
LH: loop header
LB: loop body
LE: loop exit
PB: predicated region body
PF: predicated region fallthrough
CT: control target
= control target key end

     0   :  { %s6682_s0 = inlined_call_operand.vmem [shape: bf16[128,256], index: 0, kind: input, shape index: {}]   ;;  %s6683_s1 = inlined_call_operand.vmem [shape: bf16[256,32], index: 1, kind: input, shape index: {}]   ;;  %s6684_s2 = inlined_call_operand.vmem [shape: f32[1,32], index: 2, kind: input, shape index: {}]   ;;  %s6685_s3 = inlined_call_operand.vmem [shape: bf16[144,64], index: 3, kind: input, shape index: {}]   ;;  %s6686_s4 = inlined_call_operand.vmem [shape: bf16[512,64], index: 4, kind: input, shape index: {}]   ;;  %s6687_s5 = inlined_call_operand.vmem [shape: f32[1,64], index: 5, kind: input, shape index: {}]   ;;  %s6688_s6 = inlined_call_operand.vmem [shape: bf16[9,9], index: 6, kind: input, shape index: {}]   ;;  %s6689_s7 = inlined_call_operand.vmem [shape: bf16[576,64], index: 7, kind: input, shape index: {}]   ;;  %s6690_s8 = inlined_call_operand.vmem [shape: f32[1,64], index: 8, kind: input, shape index: {}]   ;;  %s6691_s9 = inlined_call_operand.vmem [shape: bf16[64,32], index: 9, kind: input, shape index: {}]   ;;  %s6692_s10 = inlined_call_operand.vmem [shape: f32[1,32], index: 10, kind: input, shape index: {}]   ;;  %s6693_s11 = inlined_call_operand.vmem [shape: bf16[32,128], index: 11, kind: input, shape index: {}]   ;;  %s6694_s12 = inlined_call_operand.vmem [shape: f32[1,128], index: 12, kind: input, shape index: {}]   ;;  %s6695_s13 = inlined_call_operand.hbm [shape: f32[2,128], index: 13, kind: output, shape index: {}]  }
   0x1   :  { %v5229_v0 = vld [vmem:[%s6683_s1 + $0x78] sm:$0xff]   ;;  %v5231_v2 = vld [vmem:[%s6683_s1 + $0x70] sm:$0xff]   ;;  %v5233_v4 = vld [vmem:[%s6683_s1 + $0x68] sm:$0xff]  }
   0x2   :  { %v5230_v1 = vld [vmem:[%s6683_s1 + $0x38] sm:$0xff]   ;;  %4317 = vmatprep.subr.bf16.mxu0 %v5229_v0  ;;  %v5232_v3 = vld [vmem:[%s6683_s1 + $0x30] sm:$0xff]   ;;  %v5234_v5 = vld [vmem:[%s6683_s1 + $0x28] sm:$0xff]  }
   0x3   :  { %4318 = vmatpush3.bf16.msra.mxu0 %v5230_v1  ;;  %v5235_v6 = vld [vmem:[%s6683_s1 + $0x60] sm:$0xff]   ;;  %v5237_v8 = vld [vmem:[%s6683_s1 + $0x58] sm:$0xff]   ;;  %v5239_v10 = vld [vmem:[%s6683_s1 + $0x50] sm:$0xff]  }
   0x4   :  { %4319 = vmatprep.subr.bf16.mxu0 %v5231_v2  ;;  %v5236_v7 = vld [vmem:[%s6683_s1 + $0x20] sm:$0xff]   ;;  %v5238_v9 = vld [vmem:[%s6683_s1 + $0x18] sm:$0xff]   ;;  %v5240_v12 = vld [vmem:[%s6683_s1 + $0x10] sm:$0xff]  }
   0x5   :  { %v5247_v11 = vld [vmem:[%s6682_s0 + $0x4] ss:$8 sps:$4 sm:$0xff]   ;;  %v5245_v17 = vld [vmem:[%s6682_s0] ss:$8 sps:$4 sm:$0xff]   ;;  %v5248_v18 = vld [vmem:[%s6682_s0 + $0x14] ss:$8 sps:$4 sm:$0xff]  }
   0x6   :  { %309 = vmatprep.mubr.bf16.mxu0 %v5247_v11  ;;  %v5241_v13 = vld [vmem:[%s6683_s1 + $0x48] sm:$0xff]   ;;  %v5243_v15 = vld [vmem:[%s6683_s1 + $0x40] sm:$0xff]   ;;  %v5250_v19 = vld [vmem:[%s6682_s0 + $0x10] ss:$8 sps:$4 sm:$0xff]  }
   0x7   :  { %4320 = vmatpush3.bf16.msra.mxu0 %v5232_v3  ;;  %v5242_v14 = vld [vmem:[%s6683_s1 + $0x8] sm:$0xff]   ;;  %v5244_v16 = vld [vmem:[%s6683_s1] sm:$0xff]   ;;  %v5254_v22 = vld [vmem:[%s6682_s0 + $0x34] ss:$8 sps:$4 sm:$0xff]  }
   0x8   :  { %4321 = vmatprep.subr.bf16.mxu0 %v5233_v4  ;;  %v5251_v20 = vld [vmem:[%s6682_s0 + $0x24] ss:$8 sps:$4 sm:$0xff]   ;;  %v5253_v21 = vld [vmem:[%s6682_s0 + $0x20] ss:$8 sps:$4 sm:$0xff]   ;;  %v5256_v23 = vld [vmem:[%s6682_s0 + $0x30] ss:$8 sps:$4 sm:$0xff]  }
   0xb   :  { %4322 = vmatpush3.bf16.msra.mxu0 %v5234_v5 }
   0xc   :  { %4323 = vmatprep.subr.bf16.mxu0 %v5235_v6 }
   0xf   :  { %4324 = vmatpush3.bf16.msra.mxu0 %v5236_v7 }
  0x10   :  { %4325 = vmatprep.subr.bf16.mxu0 %v5237_v8 }
  0x13   :  { %4326 = vmatpush3.bf16.msra.mxu0 %v5238_v9 }
  0x14   :  { %4327 = vmatprep.subr.bf16.mxu0 %v5239_v10 }
  0x17   :  { %4328 = vmatpush3.bf16.msra.mxu0 %v5240_v12 }
  0x18   :  { %4329 = vmatprep.subr.bf16.mxu0 %v5241_v13 }
  0x1b   :  { %4330 = vmatpush3.bf16.msra.mxu0 %v5242_v14 }
  0x1c   :  { %4331 = vmatprep.subr.bf16.mxu0 %v5243_v15 }
  0x1f   :  { %4332 = vmatpush3.bf16.msra.mxu0 %v5244_v16 }
  0x22   :  { %310 = vmatmul.mubr.bf16.vlgmr.msra.gmra.mxu0 %v5245_v17 }
  0x23   :  { %317 = vmatprep.mubr.bf16.mxu0 %v5248_v18 }
  0x2a   :  { %318 = vmatmul.mubr.bf16.gmra.mxu0 %v5250_v19 }
  0x2b   :  { %325 = vmatprep.mubr.bf16.mxu0 %v5251_v20 }
  0x32   :  { %326 = vmatmul.mubr.bf16.gmra.mxu0 %v5253_v21 }
  0x33   :  { %333 = vmatprep.mubr.bf16.mxu0 %v5254_v22 }
  0x3a   :  { %334 = vmatmul.mubr.bf16.gmra.mxu0 %v5256_v23 }
  0x3b   :  { %18 = vsyncpa [#allocation3], 0  ;;  %v5453_v24 = vmov 0.0   ;;  %vm5454_vm0 = vmmov 0   ;;  %v5267_v25 = vld [vmem:[%s6686_s4 + $0x18] sm:$0xff]   ;;  %v5275_v29 = vld [vmem:[%s6686_s4 + $0x10] sm:$0xff]  }
  0x3c   :  { %4613 = vmatprep.subr.bf16.mxu1 %v5453_v24  ;;  %4665 = vmatprep.subr.bf16.mxu0 %v5453_v24  ;;  %v5268_v26 = vld [vmem:[%s6682_s0 + $0x44] ss:$8 sps:$4 sm:$0xff]   ;;  %v5270_v27 = vld [vmem:[%s6682_s0 + $0x40] ss:$8 sps:$4 sm:$0xff]   ;;  %v5271_v28 = vld [vmem:[%s6682_s0 + $0x54] ss:$8 sps:$4 sm:$0xff]  }
  0x3d   :  { %4621 = vmatprep.mubr.msk.bf16.mxu1 %vm5454_vm0, %v5453_v24  ;;  %4666 = vmatpush3.bf16.msra.mxu0 %v5267_v25  ;;  %v5274_v30 = vld [vmem:[%s6682_s0 + $0x50] ss:$8 sps:$4 sm:$0xff]   ;;  %v5276_v31 = vld [vmem:[%s6682_s0 + $0x64] ss:$8 sps:$4 sm:$0xff]   ;;  %v5278_v36 = vld [vmem:[%s6682_s0 + $0x60] ss:$8 sps:$4 sm:$0xff]  }
  0x3e   :  { %341 = vmatprep.mubr.bf16.mxu0 %v5268_v26  ;;  %4667 = vmatprep.subr.bf16.mxu0 %v5453_v24  ;;  %v5632_v49 = vld [vmem:[%s6684_s2] ss:$0 sm:$0xff]  ;;  %vm647_vm9 = vcmask 523264   ;;  %v5266_v23 = vld [vmem:[%s6686_s4 + $0x8] sm:$0xff]   ;;  %vm793_vm10 = vcmask 261120   ;;  %s5456_s18 = smov [#allocation2]  }
  0x3f   :  { %v5257_v22 = vld [vmem:[%s6685_s3] sm:$0xff]   ;;  %v5258_v26 = vld [vmem:[%s6685_s3 + $0x8] sm:$0xff]   ;;  %s4117_s19 = sshll.u32 %s5456_s18, 4  ;;  %s4118_s19 = int_to_ptr.vmem [resolvable:$true] %s4117_s19 }
  0x40   :  { %v5273_v25 = vld [vmem:[%s6686_s4] sm:$0xff]   ;;  %s5431_s20 = scalar_lea.vmem %s4118_s19, 32  ;;  %p5436_p1 = scmp.lt.s32.totalorder %s4118_s19, %s4118_s19 }
  0x41   :  { %4668 = vmatpush3.bf16.msra.mxu0 %v5275_v29  ;;  %v5261_v29 = vld [vmem:[%s6685_s3 + $0x20] sm:$0xff]   ;;  %p5432_p0 = scmp.ne.s32.totalorder %s4118_s19, %s5431_s20  ;;  %p5437_p2 = scmp.lt.s32.totalorder %s5431_s20, %s5431_s20 }
  0x42   :  { %342 = vmatmul.mubr.bf16.gmra.mxu0 %v5270_v27  ;;  %4681 = vmatprep.subr.bf16.mxu0 %v5453_v24  ;;  %v5259_v27 = vld [vmem:[%s6685_s3 + $0x10] sm:$0xff]  }
  0x43   :  { %349 = vmatprep.mubr.bf16.mxu0 %v5271_v28  ;;  %v5260_v28 = vld [vmem:[%s6685_s3 + $0x18] sm:$0xff]   ;;  %p5438_p3 = por %p5437_p2, %p5436_p1 }
  0x45   :  { %p5439_p4 = pnand %p5438_p3, %p5432_p0 }
  0x4a   :  { %350 = vmatmul.mubr.bf16.gmra.mxu0 %v5274_v30  ;;  %v5262_v30 = vld [vmem:[%s6685_s3 + $0x28] sm:$0xff]  }
  0x4b   :  { %357 = vmatprep.mubr.bf16.mxu0 %v5276_v31  ;;  %v5263_v31 = vld [vmem:[%s6685_s3 + $0x30] sm:$0xff]  }
  0x52   :  { %358 = vmatmul.mubr.bf16.gmra.mxu0 %v5278_v36 }
  0xe2   :  { %v4333_v32 = vpop.f32.mrf.mxu0 }
  0xe4   :  { %v4334_v33 = vpop.f32.mrf.mxu0 }
  0xe5   :  { %v4335_v1 = vadd.f32 %v4334_v33, %v4333_v32  ;;  %v5264_v32 = vld [vmem:[%s6685_s3 + $0x38] sm:$0xff]   ;;  %v5265_v33 = vld [vmem:[%s6685_s3 + $0x40] sm:$0xff]  }
  0xe6   :  { %v4336_v34 = vpop.f32.mrf.mxu0 }
  0xe7   :  { %v312_v10 = vadd.f32 %v4335_v1, %v5632_v49 }
  0xe8   :  { %v4337_v35 = vpop.f32.mrf.mxu0 }
  0xe9   :  { %v4338_v61 = vadd.f32 %v4337_v35, %v4336_v34  ;;  %v390_v16 = vmul.f32 0.01, %v312_v10  ;;  %vm374_vm8 = vcmp.ge.f32.partialorder %v312_v10, 0.0  ;;  %v5279_v34 = vld [vmem:[%s6682_s0 + $0x74] ss:$8 sps:$4 sm:$0xff]  }
  0xea   :  { %v4339_v37 = vpop.f32.mrf.mxu0  ;;  %v5281_v35 = vld [vmem:[%s6682_s0 + $0x70] ss:$8 sps:$4 sm:$0xff]   ;;  %365 = vmatprep.mubr.bf16.mxu0 %v5279_v34 }
  0xeb   :  { %v315_v7 = vadd.f32 %v4338_v61, %v5632_v49  ;;  %v406_v20 = vsel %vm374_vm8, %v312_v10, %v390_v16  ;;  %366 = vmatmul.mubr.bf16.gmra.mxu0 %v5281_v35  ;;  %v5287_v10 = vld [vmem:[%s6686_s4 + $0x40] sm:$0xff]   ;;  %v5292_v35 = vld [vmem:[%s6686_s4 + $0x78] sm:$0xff]   ;;  %vm1817_vm8 = vcmask 72704  }
  0xec   :  { %v4340_v38 = vpop.f32.mrf.mxu0  ;;  %4669 = vmatprep.mubr.msk.bf16.mxu0 %vm5454_vm0, %v5453_v24 }
  0xed   :  { %v4341_v57 = vadd.f32 %v4340_v38, %v4339_v37  ;;  %v391_v14 = vmul.f32 0.01, %v315_v7  ;;  %vm375_vm7 = vcmp.ge.f32.partialorder %v315_v7, 0.0 }
  0xee   :  { %v4342_v39 = vpop.f32.mrf.mxu0 }
  0xef   :  { %v320_v2 = vadd.f32 %v4341_v57, %v5632_v49  ;;  %v407_v19 = vsel %vm375_vm7, %v315_v7, %v391_v14  ;;  %v5283_v57 = vld [vmem:[%s6686_s4 + $0x20] sm:$0xff]  }
  0xf0   :  { %v4343_v40 = vpop.f32.mrf.mxu0  ;;  %v422_v21 = vpack.c.bf16 %v407_v19, %v406_v20  ;;  %v5289_v19 = vld [vmem:[%s6686_s4 + $0x68] sm:$0xff]  }
  0xf1   :  { %v4344_v54 = vadd.f32 %v4343_v40, %v4342_v39  ;;  %v392_v11 = vmul.f32 0.01, %v320_v2  ;;  %vm376_vm6 = vcmp.ge.f32.partialorder %v320_v2, 0.0 }
  0xf2   :  { %v4345_v41 = vpop.f32.mrf.mxu0 }
  0xf3   :  { %v323_v62 = vadd.f32 %v4344_v54, %v5632_v49  ;;  %v408_v17 = vsel %vm376_vm6, %v320_v2, %v392_v11  ;;  %v5284_v2 = vld [vmem:[%s6686_s4 + $0x38] sm:$0xff]   ;;  %vm1822_vm6 = vcmask 1044480  }
  0xf4   :  { %v4346_v42 = vpop.f32.mrf.mxu0 }
  0xf5   :  { %v4347_v51 = vadd.f32 %v4346_v42, %v4345_v41  ;;  %v393_v8 = vmul.f32 0.01, %v323_v62  ;;  %vm377_vm5 = vcmp.ge.f32.partialorder %v323_v62, 0.0 }
  0xf6   :  { %v4348_v43 = vpop.f32.mrf.mxu0 }
  0xf7   :  { %v328_v58 = vadd.f32 %v4347_v51, %v5632_v49  ;;  %v409_v15 = vsel %vm377_vm5, %v323_v62, %v393_v8 }
  0xf8   :  { %v4349_v44 = vpop.f32.mrf.mxu0  ;;  %v423_v18 = vpack.c.bf16 %v409_v15, %v408_v17 }
  0xf9   :  { %v4350_v47 = vadd.f32 %v4349_v44, %v4348_v43  ;;  %v394_v3 = vmul.f32 0.01, %v328_v58  ;;  %vm378_vm4 = vcmp.ge.f32.partialorder %v328_v58, 0.0 }
  0xfa   :  { %v4351_v45 = vpop.f32.mrf.mxu0 }
  0xfb   :  { %v331_v55 = vadd.f32 %v4350_v47, %v5632_v49  ;;  %v410_v12 = vsel %vm378_vm4, %v328_v58, %v394_v3  ;;  %v5285_v3 = vld [vmem:[%s6686_s4 + $0x48] sm:$0xff]   ;;  %vm1821_vm4 = vcmask 1043456  }
  0xfc   :  { %v4352_v46 = vpop.f32.mrf.mxu0 }
  0xfd   :  { %v4353_v48 = vadd.f32 %v4352_v46, %v4351_v45  ;;  %v395_v63 = vmul.f32 0.01, %v331_v55  ;;  %vm379_vm3 = vcmp.ge.f32.partialorder %v331_v55, 0.0 }
  0xfe   :  { %v4354_v50 = vpop.f32.mrf.mxu0 }
  0xff   :  { %v336_v52 = vadd.f32 %v4353_v48, %v5632_v49  ;;  %v411_v9 = vsel %vm379_vm3, %v331_v55, %v395_v63 }
 0x100   :  { %v4355_v53 = vpop.f32.mrf.mxu0  ;;  %v424_v13 = vpack.c.bf16 %v411_v9, %v410_v12  ;;  %v5286_v9 = vld [vmem:[%s6686_s4 + $0x30] sm:$0xff]  }
 0x101   :  { %v4356_v56 = vadd.f32 %v4355_v53, %v4354_v50  ;;  %v396_v60 = vmul.f32 0.01, %v336_v52  ;;  %vm380_vm1 = vcmp.ge.f32.partialorder %v336_v52, 0.0  ;;  %v5282_v53 = vld [vmem:[%s6686_s4 + $0x28] sm:$0xff]  }
 0x102   :  { %v4357_v36 = vpop.f32.mrf.mxu0 }
 0x103   :  { %v339_v59 = vadd.f32 %v4356_v56, %v5632_v49  ;;  %v412_v4 = vsel %vm380_vm1, %v336_v52, %v396_v60 }
 0x104   :  { %v4358_v37 = vpop.f32.mrf.mxu0 }
 0x105   :  { %vm381_vm2 = vcmp.ge.f32.partialorder %v339_v59, 0.0  ;;  %v397_v0 = vmul.f32 0.01, %v339_v59  ;;  %v5716_v38 = vadd.f32 %v4358_v37, %v4357_v36  ;;  %v5293_v36 = vld [vmem:[%s6686_s4 + $0x88] sm:$0xff]  }
 0x106   :  { %v5718_v39 = vpop.f32.mrf.mxu0 }
 0x107   :  { %v413_v5 = vsel %vm381_vm2, %v339_v59, %v397_v0 }
 0x108   :  { %v425_v6 = vpack.c.bf16 %v413_v5, %v412_v4  ;;  %v5720_v40 = vpop.f32.mrf.mxu0 }
 0x10a   :  { %4614 = vmatpush3.bf16.msra.mxu1 %v425_v6  ;;  %v4363_v41 = vpop.f32.mrf.mxu0 }
 0x10b   :  { %4615 = vmatprep.subr.bf16.mxu1 %v5453_v24 }
 0x10c   :  { %v4364_v42 = vpop.f32.mrf.mxu0 }
 0x10d   :  { %v5722_v43 = vadd.f32 %v4364_v42, %v4363_v41 }
 0x10e   :  { %4616 = vmatpush3.bf16.msra.mxu1 %v424_v13  ;;  %v5724_v44 = vpop.f32.mrf.mxu0 }
 0x10f   :  { %4617 = vmatprep.subr.bf16.mxu1 %v5453_v24 }
 0x110   :  { %v5726_v45 = vpop.f32.mrf.mxu0 }
 0x112   :  { %4618 = vmatpush3.bf16.msra.mxu1 %v423_v18  ;;  %v4369_v46 = vpop.f32.mrf.mxu0  ;;  %v5288_v18 = vld [vmem:[%s6686_s4 + $0x58] sm:$0xff]  }
 0x113   :  { %4619 = vmatprep.subr.bf16.mxu1 %v5453_v24 }
 0x114   :  { %v4370_v47 = vpop.f32.mrf.mxu0 }
 0x115   :  { %v5728_v48 = vadd.f32 %v4370_v47, %v4369_v46 }
 0x116   :  { %4620 = vmatpush3.bf16.msra.mxu1 %v422_v21 }
 0x117   :  { %4657 = vmatprep.subr.bf16.mxu1 %v5453_v24 }
 0x119   :  { %4622 = vmatmul.mubr.msk.bf16.vlgmr.msra.gmra.mxu1 %vm647_vm9, %v5257_v22 }
 0x11a   :  { %4625 = vmatprep.mubr.msk.bf16.mxu1 %vm5454_vm0, %v5453_v24  ;;  %4658 = vmatpush3.bf16.msra.mxu1 %v5266_v23 }
 0x11b   :  { %4659 = vmatprep.subr.bf16.mxu1 %v5453_v24 }
 0x11e   :  { %4660 = vmatpush3.bf16.msra.mxu1 %v5273_v25 }
 0x11f   :  { %4673 = vmatprep.subr.bf16.mxu1 %v5453_v24 }
 0x121   :  { %4626 = vmatmul.mubr.msk.bf16.gmra.mxu1 %vm647_vm9, %v5258_v26  ;;  %v5290_v26 = vld [vmem:[%s6686_s4 + $0x50] sm:$0xff]  }
 0x122   :  { %4629 = vmatprep.mubr.msk.bf16.mxu1 %vm5454_vm0, %v5453_v24 }
 0x129   :  { %4630 = vmatmul.mubr.msk.bf16.gmra.mxu1 %vm647_vm9, %v5259_v27  ;;  %v5291_v27 = vld [vmem:[%s6686_s4 + $0x60] sm:$0xff]  }
 0x12a   :  { %4633 = vmatprep.mubr.msk.bf16.mxu1 %vm5454_vm0, %v5453_v24 }
 0x131   :  { %4634 = vmatmul.mubr.msk.bf16.gmra.mxu1 %vm647_vm9, %v5260_v28 }
 0x132   :  { %4637 = vmatprep.mubr.msk.bf16.mxu1 %vm5454_vm0, %v5453_v24 }
 0x139   :  { %4638 = vmatmul.mubr.msk.bf16.gmra.mxu1 %vm647_vm9, %v5261_v29 }
 0x13a   :  { %4641 = vmatprep.mubr.msk.bf16.mxu1 %vm5454_vm0, %v5453_v24 }
 0x141   :  { %4642 = vmatmul.mubr.msk.bf16.gmra.mxu1 %vm647_vm9, %v5262_v30 }
 0x142   :  { %4645 = vmatprep.mubr.msk.bf16.mxu1 %vm5454_vm0, %v5453_v24 }
 0x149   :  { %4646 = vmatmul.mubr.msk.bf16.gmra.mxu1 %vm647_vm9, %v5263_v31 }
 0x14a   :  { %4649 = vmatprep.mubr.msk.bf16.mxu1 %vm5454_vm0, %v5453_v24 }
 0x151   :  { %4650 = vmatmul.mubr.msk.bf16.gmra.mxu1 %vm647_vm9, %v5264_v32 }
 0x152   :  { %4653 = vmatprep.mubr.msk.bf16.mxu1 %vm5454_vm0, %v5453_v24 }
 0x159   :  { %4654 = vmatmul.mubr.msk.bf16.gmra.mxu1 %vm647_vm9, %v5265_v33 }
 0x15a   :  { %4661 = vmatprep.mubr.msk.bf16.mxu1 %vm5454_vm0, %v5453_v24 }
 0x1d9   :  { %v709_v50 = vpop.f32.mrf.mxu1 }
 0x1db   :  { %v4623_v51 = vpop.f32.mrf.mxu1 }
 0x1dc   :  { %v5295_v51 = vld [vmem:[%s6686_s4 + $0x80] sm:$0xff]  }
 0x1dd   :  { %v712_v52 = vpop.f32.mrf.mxu1 }
 0x1de   :  { %v780_v54 = vpack.c.bf16 %v712_v52, %v709_v50  ;;  %v5294_v50 = vld [vmem:[%s6686_s4 + $0x70] sm:$0xff]  }
 0x1df   :  { %v4624_v55 = vpop.f32.mrf.mxu1 }
 0x1e0   :  { %4662 = vmatmul.mubr.msk.bf16.vlgmr.msra.gmra.mxu1 %vm793_vm10, %v780_v54 }
 0x1e1   :  { %v717_v56 = vpop.f32.mrf.mxu1  ;;  %4674 = vmatpush3.bf16.msra.mxu1 %v5282_v53  ;;  %4677 = vmatprep.mubr.msk.bf16.mxu1 %vm5454_vm0, %v5453_v24 }
 0x1e2   :  { %v846_v58 = vpack.c.bf16 %v717_v56, %v712_v52  ;;  %4675 = vmatprep.subr.bf16.mxu1 %v5453_v24 }
 0x1e3   :  { %v4627_v59 = vpop.f32.mrf.mxu1 }
 0x1e4   :  { %v850_v60 = vshll.u32 %v846_v58, 16  ;;  %v848_v62 = vshrl.u32 %v846_v58, 16  ;;  %v5296_v58 = vld [vmem:[%s6686_s4 + $0x98] sm:$0xff]  }
 0x1e5   :  { %v720_v61 = vpop.f32.mrf.mxu1  ;;  %4676 = vmatpush3.bf16.msra.mxu1 %v5283_v57 }
 0x1e6   :  { %v852_v63 = vrot.slane %v850_v60, 1  ;;  %v912_v0 = vpack.c.bf16 %v720_v61, %v717_v56  ;;  %4689 = vmatprep.subr.bf16.mxu1 %v5453_v24 }
 0x1e7   :  { %v4628_v1 = vpop.f32.mrf.mxu1 }
 0x1e8   :  { %v853_v4 = vor.u32 %v852_v63, %v848_v62  ;;  %v914_v5 = vrot.slane %v912_v0, 1  ;;  %v5298_v0 = vld [vmem:[%s6686_s4 + $0x90] sm:$0xff]  }
 0x1e9   :  { %v725_v6 = vpop.f32.mrf.mxu1 }
 0x1ea   :  { %v973_v7 = vpack.c.bf16 %v725_v6, %v720_v61  ;;  %4670 = vmatmul.mubr.msk.bf16.vlgmr.msra.gmra.mxu0 %vm793_vm10, %v853_v4  ;;  %4678 = vmatmul.mubr.msk.bf16.vlgmr.msra.gmra.mxu1 %vm793_vm10, %v914_v5  ;;  %v5813_v61 = vld [vmem:[%s6686_s4 + $0xa8] sm:$0xff]   ;;  %v4362_v5 = vadd.f32 %v5720_v40, %v5718_v39  ;;  %v344_v40 = vadd.f32 %v5716_v38, %v5632_v49  ;;  %v5303_v38 = vld [vmem:[%s6686_s4 + $0xc0] sm:$0xff]  }
 0x1eb   :  { %v4631_v8 = vpop.f32.mrf.mxu1  ;;  %4682 = vmatpush3.bf16.msra.mxu0 %v5284_v2  ;;  %4690 = vmatpush3.bf16.msra.mxu1 %v5285_v3  ;;  %v5827_v2 = vld [vmem:[%s6686_s4 + $0xa0] sm:$0xff]   ;;  %v5301_v39 = vld [vmem:[%s6686_s4 + $0xc8] sm:$0xff]  }
 0x1ec   :  { %v975_v11 = vshrl.u32 %v973_v7, 16  ;;  %v978_v12 = vshll.u32 %v973_v7, 16  ;;  %4683 = vmatprep.subr.bf16.mxu0 %v5453_v24  ;;  %4691 = vmatprep.subr.bf16.mxu1 %v5453_v24  ;;  %vm382_vm11 = vcmp.ge.f32.partialorder %v344_v40, 0.0 }
 0x1ed   :  { %v728_v13 = vpop.f32.mrf.mxu1  ;;  %4685 = vmatprep.mubr.msk.bf16.mxu0 %vm5454_vm0, %v5453_v24  ;;  %4693 = vmatprep.mubr.msk.bf16.mxu1 %vm5454_vm0, %v5453_v24 }
 0x1ee   :  { %v977_v14 = vrot.slane %v975_v11, 1  ;;  %v980_v15 = vrot.slane %v978_v12, 2  ;;  %v1040_v16 = vpack.c.bf16 %v728_v13, %v725_v6  ;;  %v5300_v12 = vld [vmem:[%s6686_s4 + $0xb8] sm:$0xff]  }
 0x1ef   :  { %v4632_v17 = vpop.f32.mrf.mxu1  ;;  %4684 = vmatpush3.bf16.msra.mxu0 %v5286_v9  ;;  %4692 = vmatpush3.bf16.msra.mxu1 %v5287_v10 }
 0x1f0   :  { %v981_v20 = vor.u32 %v980_v15, %v977_v14  ;;  %v1042_v21 = vrot.slane %v1040_v16, 2  ;;  %4697 = vmatprep.subr.bf16.mxu0 %v5453_v24  ;;  %4705 = vmatprep.subr.bf16.mxu1 %v5453_v24 }
 0x1f1   :  { %v733_v22 = vpop.f32.mrf.mxu1 }
 0x1f2   :  { %v1101_v23 = vpack.c.bf16 %v733_v22, %v728_v13  ;;  %4686 = vmatmul.mubr.msk.bf16.vlgmr.msra.gmra.mxu0 %vm793_vm10, %v981_v20  ;;  %4694 = vmatmul.mubr.msk.bf16.vlgmr.msra.gmra.mxu1 %vm793_vm10, %v1042_v21  ;;  %v347_v13 = vadd.f32 %v4362_v5, %v5632_v49  ;;  %v398_v20 = vmul.f32 0.01, %v344_v40 }
 0x1f3   :  { %v4635_v25 = vpop.f32.mrf.mxu1  ;;  %4698 = vmatpush3.bf16.msra.mxu0 %v5288_v18  ;;  %4706 = vmatpush3.bf16.msra.mxu1 %v5289_v19  ;;  %v5302_v19 = vld [vmem:[%s6686_s4 + $0xb0] sm:$0xff]  }
 0x1f4   :  { %v1103_v28 = vshrl.u32 %v1101_v23, 16  ;;  %v1106_v29 = vshll.u32 %v1101_v23, 16  ;;  %4699 = vmatprep.subr.bf16.mxu0 %v5453_v24  ;;  %4707 = vmatprep.subr.bf16.mxu1 %v5453_v24  ;;  %v399_v21 = vmul.f32 0.01, %v347_v13  ;;  %vm383_vm12 = vcmp.ge.f32.partialorder %v347_v13, 0.0 }
 0x1f5   :  { %v736_v30 = vpop.f32.mrf.mxu1  ;;  %4701 = vmatprep.mubr.msk.bf16.mxu0 %vm5454_vm0, %v5453_v24  ;;  %4709 = vmatprep.mubr.msk.bf16.mxu1 %vm5454_vm0, %v5453_v24 }
 0x1f6   :  { %v1105_v31 = vrot.slane %v1103_v28, 2  ;;  %v1108_v32 = vrot.slane %v1106_v29, 3  ;;  %v1168_v33 = vpack.c.bf16 %v736_v30, %v733_v22  ;;  %v4368_v22 = vadd.f32 %v5726_v45, %v5724_v44 }
 0x1f7   :  { %v4636_v34 = vpop.f32.mrf.mxu1  ;;  %4700 = vmatpush3.bf16.msra.mxu0 %v5290_v26  ;;  %4708 = vmatpush3.bf16.msra.mxu1 %v5291_v27  ;;  %v4372_v26 = vpop.f32.mrf.mxu0  ;;  %v352_v44 = vadd.f32 %v5722_v43, %v5632_v49 }
 0x1f8   :  { %v1109_v37 = vor.u32 %v1108_v32, %v1105_v31  ;;  %v1170_v41 = vrot.slane %v1168_v33, 3  ;;  %4713 = vmatprep.subr.bf16.mxu0 %v5453_v24  ;;  %4721 = vmatprep.subr.bf16.mxu1 %v5453_v24  ;;  %v5304_v31 = vld [vmem:[%s6686_s4 + $0xd8] sm:$0xff]   ;;  %v5305_v32 = vld [vmem:[%s6686_s4 + $0xe8] sm:$0xff]   ;;  %v5870_v33 = vsel %vm382_vm11, %v344_v40, %v398_v20  ;;  %v5872_v34 = vsel %vm383_vm12, %v347_v13, %v399_v21 }
 0x1f9   :  { %v741_v42 = vpop.f32.mrf.mxu1  ;;  %v4373_v43 = vpop.f32.mrf.mxu0  ;;  %vm384_vm13 = vcmp.ge.f32.partialorder %v352_v44, 0.0 }
 0x1fa   :  { %v1229_v46 = vpack.c.bf16 %v741_v42, %v736_v30  ;;  %4702 = vmatmul.mubr.msk.bf16.vlgmr.msra.gmra.mxu0 %vm793_vm10, %v1109_v37  ;;  %4710 = vmatmul.mubr.msk.bf16.vlgmr.msra.gmra.mxu1 %vm793_vm10, %v1170_v41 }
 0x1fb   :  { %v4639_v47 = vpop.f32.mrf.mxu1  ;;  %4714 = vmatpush3.bf16.msra.mxu0 %v5292_v35  ;;  %4722 = vmatpush3.bf16.msra.mxu1 %v5293_v36  ;;  %v355_v35 = vadd.f32 %v4368_v22, %v5632_v49 }
 0x1fc   :  { %v1231_v52 = vshrl.u32 %v1229_v46, 16  ;;  %v1234_v53 = vshll.u32 %v1229_v46, 16  ;;  %4715 = vmatprep.subr.bf16.mxu0 %v5453_v24  ;;  %4723 = vmatprep.subr.bf16.mxu1 %v5453_v24  ;;  %v400_v46 = vmul.f32 0.01, %v352_v44  ;;  %v426_v47 = vpack.c.bf16 %v5872_v34, %v5870_v33  ;;  %v5354_v33 = vld [vmem:[%s6685_s3 + $0x8] sm:$0xff]   ;;  %v5355_v34 = vld [vmem:[%s6685_s3 + $0x10] sm:$0xff]  }
 0x1fd   :  { %v744_v54 = vpop.f32.mrf.mxu1  ;;  %4717 = vmatprep.mubr.msk.bf16.mxu0 %vm5454_vm0, %v5453_v24  ;;  %4725 = vmatprep.mubr.msk.bf16.mxu1 %vm5454_vm0, %v5453_v24  ;;  %vm385_vm14 = vcmp.ge.f32.partialorder %v355_v35, 0.0 }
 0x1fe   :  { %v1233_v55 = vrot.slane %v1231_v52, 3  ;;  %v1236_v56 = vrot.slane %v1234_v53, 4  ;;  %v5307_v52 = vld [vmem:[%s6686_s4 + $0xe0] sm:$0xff]   ;;  %v401_v53 = vmul.f32 0.01, %v355_v35 }
 0x1ff   :  { %v4640_v57 = vpop.f32.mrf.mxu1  ;;  %4716 = vmatpush3.bf16.msra.mxu0 %v5294_v50  ;;  %4724 = vmatpush3.bf16.msra.mxu1 %v5295_v51  ;;  %v5306_v51 = vld [vmem:[%s6686_s4 + $0xd0] sm:$0xff]  }
 0x200   :  { %v1237_v59 = vor.u32 %v1236_v56, %v1233_v55  ;;  %4729 = vmatprep.subr.bf16.mxu0 %v5453_v24  ;;  %4737 = vmatprep.subr.bf16.mxu1 %v5453_v24 }
 0x201   :  { %v749_v60 = vpop.f32.mrf.mxu1 }
 0x202   :  { %v1296_v62 = vpack.c.bf16 %v749_v60, %v744_v54  ;;  %4718 = vmatmul.mubr.msk.bf16.vlgmr.msra.gmra.mxu0 %vm793_vm10, %v1237_v59  ;;  %v4374_v54 = vadd.f32 %v4373_v43, %v4372_v26 }
 0x203   :  { %v4643_v63 = vpop.f32.mrf.mxu1  ;;  %4730 = vmatpush3.bf16.msra.mxu0 %v5296_v58  ;;  %4733 = vmatprep.mubr.msk.bf16.mxu0 %vm5454_vm0, %v5453_v24 }
 0x204   :  { %4726 = vmatmul.mubr.msk.bf16.vlgmr.msra.gmra.mxu1 %vm793_vm10, %v1296_v62  ;;  %4731 = vmatprep.subr.bf16.mxu0 %v5453_v24  ;;  %v5893_v62 = vsel %vm384_vm13, %v352_v44, %v400_v46 }
 0x205   :  { %v752_v1 = vpop.f32.mrf.mxu1  ;;  %4738 = vmatpush3.bf16.msra.mxu1 %v5813_v61  ;;  %4741 = vmatprep.mubr.msk.bf16.mxu1 %vm5454_vm0, %v5453_v24 }
 0x206   :  { %v1355_v3 = vpack.c.bf16 %v752_v1, %v749_v60  ;;  %4739 = vmatprep.subr.bf16.mxu1 %v5453_v24 }
 0x207   :  { %v4644_v4 = vpop.f32.mrf.mxu1  ;;  %4732 = vmatpush3.bf16.msra.mxu0 %v5298_v0  ;;  %v5308_v0 = vld [vmem:[%s6686_s4 + $0xf8] sm:$0xff]  }
 0x208   :  { %v1359_v6 = vshll.u32 %v1355_v3, 16  ;;  %4745 = vmatprep.subr.bf16.mxu0 %v5453_v24  ;;  %v1357_v8 = vshrl.u32 %v1355_v3, 16  ;;  %v360_v3 = vadd.f32 %v5728_v48, %v5632_v49  ;;  %v363_v4 = vadd.f32 %v4374_v54, %v5632_v49  ;;  %v5309_v48 = vld [vmem:[%s6686_s4 + $0xf0] sm:$0xff]  }
 0x209   :  { %v757_v7 = vpop.f32.mrf.mxu1  ;;  %4740 = vmatpush3.bf16.msra.mxu1 %v5827_v2 }
 0x20a   :  { %v1361_v9 = vrot.slane %v1359_v6, 1  ;;  %v1421_v10 = vpack.c.bf16 %v757_v7, %v752_v1  ;;  %4753 = vmatprep.subr.bf16.mxu1 %v5453_v24  ;;  %v5898_v1 = vsel %vm385_vm14, %v355_v35, %v401_v53  ;;  %vm386_vm15 = vcmp.ge.f32.partialorder %v360_v3, 0.0 }
 0x20b   :  { %v4647_v11 = vpop.f32.mrf.mxu1  ;;  %vm387_vm1 = vcmp.ge.f32.partialorder %v363_v4, 0.0 }
 0x20c   :  { %v1362_v14 = vor.u32 %v1361_v9, %v1357_v8  ;;  %v1423_v15 = vrot.slane %v1421_v10, 1  ;;  %v4375_v9 = vpop.f32.mrf.mxu0  ;;  %v427_v10 = vpack.c.bf16 %v5898_v1, %v5893_v62  ;;  %v6229_v62 = vld [vmem:[%s6693_s11 + $0x8] sm:$0xff]   ;;  %v5359_v1 = vld [vmem:[%s6685_s3 + $0x30] sm:$0xff]  }
 0x20d   :  { %v760_v16 = vpop.f32.mrf.mxu1 }
 0x20e   :  { %v1482_v17 = vpack.c.bf16 %v760_v16, %v757_v7  ;;  %4734 = vmatmul.mubr.msk.bf16.vlgmr.msra.gmra.mxu0 %vm793_vm10, %v1362_v14  ;;  %4742 = vmatmul.mubr.msk.bf16.vlgmr.msra.gmra.mxu1 %vm793_vm10, %v1423_v15  ;;  %v4376_v14 = vpop.f32.mrf.mxu0 }
 0x20f   :  { %v4648_v18 = vpop.f32.mrf.mxu1  ;;  %4746 = vmatpush3.bf16.msra.mxu0 %v5300_v12  ;;  %4754 = vmatpush3.bf16.msra.mxu1 %v5301_v39  ;;  %v402_v12 = vmul.f32 0.01, %v360_v3  ;;  %v403_v39 = vmul.f32 0.01, %v363_v4  ;;  %v4377_v15 = vadd.f32 %v4376_v14, %v4375_v9 }
 0x210   :  { %v1484_v23 = vshrl.u32 %v1482_v17, 16  ;;  %v1487_v25 = vshll.u32 %v1482_v17, 16  ;;  %4747 = vmatprep.subr.bf16.mxu0 %v5453_v24  ;;  %4755 = vmatprep.subr.bf16.mxu1 %v5453_v24  ;;  %v4378_v18 = vpop.f32.mrf.mxu0 }
 0x211   :  { %v765_v27 = vpop.f32.mrf.mxu1  ;;  %4749 = vmatprep.mubr.msk.bf16.mxu0 %vm5454_vm0, %v5453_v24  ;;  %4757 = vmatprep.mubr.msk.bf16.mxu1 %vm5454_vm0, %v5453_v24  ;;  %v368_v20 = vadd.f32 %v4377_v15, %v5632_v49 }
 0x212   :  { %v1486_v28 = vrot.slane %v1484_v23, 1  ;;  %v1489_v29 = vrot.slane %v1487_v25, 2  ;;  %v1549_v30 = vpack.c.bf16 %v765_v27, %v760_v16  ;;  %v4379_v22 = vpop.f32.mrf.mxu0 }
 0x213   :  { %v4651_v45 = vpop.f32.mrf.mxu1  ;;  %4748 = vmatpush3.bf16.msra.mxu0 %v5302_v19  ;;  %4756 = vmatpush3.bf16.msra.mxu1 %v5303_v38  ;;  %v5917_v19 = vsel %vm386_vm15, %v360_v3, %v402_v12  ;;  %v5919_v38 = vsel %vm387_vm1, %v363_v4, %v403_v39  ;;  %v4380_v23 = vadd.f32 %v4379_v22, %v4378_v18  ;;  %v404_v25 = vmul.f32 0.01, %v368_v20 }
 0x214   :  { %v1490_v36 = vor.u32 %v1489_v29, %v1486_v28  ;;  %v1551_v37 = vrot.slane %v1549_v30, 2  ;;  %4761 = vmatprep.subr.bf16.mxu0 %v5453_v24  ;;  %4769 = vmatprep.subr.bf16.mxu1 %v5453_v24  ;;  %v428_v26 = vpack.c.bf16 %v5919_v38, %v5917_v19  ;;  %vm388_vm2 = vcmp.ge.f32.partialorder %v368_v20, 0.0  ;;  %v5311_v45 = vld [vmem:[%s6689_s7 + $0x18] sm:$0xff]   ;;  %v5361_v38 = vld [vmem:[%s6685_s3 + $0x40] sm:$0xff]  }
 0x215   :  { %v768_v41 = vpop.f32.mrf.mxu1  ;;  %v5929_v29 = vsel %vm388_vm2, %v368_v20, %v404_v25  ;;  %v5360_v19 = vld [vmem:[%s6685_s3 + $0x38] sm:$0xff]  }
 0x216   :  { %v1610_v42 = vpack.c.bf16 %v768_v41, %v765_v27  ;;  %4750 = vmatmul.mubr.msk.bf16.vlgmr.msra.gmra.mxu0 %vm793_vm10, %v1490_v36  ;;  %4758 = vmatmul.mubr.msk.bf16.vlgmr.msra.gmra.mxu1 %vm793_vm10, %v1551_v37  ;;  %v371_v27 = vadd.f32 %v4380_v23, %v5632_v49  ;;  %v5313_v49 = vld [vmem:[%s6689_s7 + $0x10] sm:$0xff]  }
 0x217   :  { %v4652_v50 = vpop.f32.mrf.mxu1  ;;  %4762 = vmatpush3.bf16.msra.mxu0 %v5304_v31  ;;  %4770 = vmatpush3.bf16.msra.mxu1 %v5305_v32  ;;  %v5315_v31 = vld [vmem:[%s6689_s7 + $0x8] sm:$0xff]   ;;  %v5317_v32 = vld [vmem:[%s6689_s7] sm:$0xff]  }
 0x218   :  { %v1612_v55 = vshrl.u32 %v1610_v42, 16  ;;  %v1615_v56 = vshll.u32 %v1610_v42, 16  ;;  %4763 = vmatprep.subr.bf16.mxu0 %v5453_v24  ;;  %4771 = vmatprep.subr.bf16.mxu1 %v5453_v24  ;;  %vm389_vm3 = vcmp.ge.f32.partialorder %v371_v27, 0.0  ;;  %v405_v28 = vmul.f32 0.01, %v371_v27 }
 0x219   :  { %v773_v57 = vpop.f32.mrf.mxu1  ;;  %4765 = vmatprep.mubr.msk.bf16.mxu0 %vm5454_vm0, %v5453_v24  ;;  %4773 = vmatprep.mubr.msk.bf16.mxu1 %vm5454_vm0, %v5453_v24 }
 0x21a   :  { %v1614_v58 = vrot.slane %v1612_v55, 2  ;;  %v1617_v59 = vrot.slane %v1615_v56, 3  ;;  %v1677_v60 = vpack.c.bf16 %v773_v57, %v768_v41  ;;  %v5931_v30 = vsel %vm389_vm3, %v371_v27, %v405_v28 }
 0x21b   :  { %v4655_v63 = vpop.f32.mrf.mxu1  ;;  %4764 = vmatpush3.bf16.msra.mxu0 %v5306_v51  ;;  %4772 = vmatpush3.bf16.msra.mxu1 %v5307_v52  ;;  %v429_v44 = vpack.c.bf16 %v5931_v30, %v5929_v29  ;;  %v5353_v29 = vld [vmem:[%s6685_s3] sm:$0xff]  }
 0x21c   :  { %v1618_v5 = vor.u32 %v1617_v59, %v1614_v58  ;;  %v1679_v6 = vrot.slane %v1677_v60, 3  ;;  %4777 = vmatprep.subr.bf16.mxu0 %v5453_v24  ;;  %4785 = vmatprep.subr.bf16.mxu1 %v5453_v24  ;;  %v4179_v63 = vld [vmem:[%s6687_s5] ss:$0 sm:$0xff] }
 0x21d   :  { %v776_v7 = vpop.f32.mrf.mxu1 }
 0x21e   :  { %v1738_v8 = vpack.c.bf16 %v776_v7, %v773_v57  ;;  %4766 = vmatmul.mubr.msk.bf16.vlgmr.msra.gmra.mxu0 %vm793_vm10, %v1618_v5  ;;  %4774 = vmatmul.mubr.msk.bf16.vlgmr.msra.gmra.mxu1 %vm793_vm10, %v1679_v6 }
 0x21f   :  { %v4656_v11 = vpop.f32.mrf.mxu1  ;;  %4778 = vmatpush3.bf16.msra.mxu0 %v5308_v0  ;;  %4781 = vmatprep.mubr.msk.bf16.mxu0 %vm5454_vm0, %v5453_v24 }
 0x220   :  { %v1740_v40 = vshrl.u32 %v1738_v8, 16  ;;  %v1743_v13 = vshll.u32 %v1738_v8, 16  ;;  %4779 = vmatprep.subr.bf16.mxu0 %v5453_v24  ;;  %4787 = vmatprep.mubr.msk.bf16.mxu1 %vm5454_vm0, %v5453_v24 }
 0x222   :  { %v1742_v16 = vrot.slane %v1740_v40, 3  ;;  %v1745_v17 = vrot.slane %v1743_v13, 4 }
 0x223   :  { %4780 = vmatpush3.bf16.msra.mxu0 %v5309_v48 }
 0x224   :  { %v1746_v21 = vor.u32 %v1745_v17, %v1742_v16  ;;  %4791 = vmatprep.subr.bf16.mxu0 %v5453_v24 }
 0x226   :  { %4782 = vmatmul.mubr.msk.bf16.vlgmr.msra.gmra.mxu0 %vm793_vm10, %v1746_v21 }
 0x227   :  { %4799 = vmatprep.mubr.msk.bf16.mxu0 %vm5454_vm0, %v5453_v24  ;;  %4792 = vmatpush3.bf16.msra.mxu0 %v5311_v45 }
 0x228   :  { %4793 = vmatprep.subr.bf16.mxu0 %v5453_v24 }
 0x22b   :  { %4794 = vmatpush3.bf16.msra.mxu0 %v5313_v49 }
 0x22c   :  { %4795 = vmatprep.subr.bf16.mxu0 %v5453_v24 }
 0x22f   :  { %4796 = vmatpush3.bf16.msra.mxu0 %v5315_v31 }
 0x230   :  { %4797 = vmatprep.subr.bf16.mxu0 %v5453_v24 }
 0x233   :  { %4798 = vmatpush3.bf16.msra.mxu0 %v5317_v32 }
 0x234   :  { %4815 = vmatprep.subr.bf16.mxu0 %v5453_v24 }
 0x2a0   :  { %v831_v35 = vpop.f32.mrf.mxu1 }
 0x2a1   :  { %v844_v6 = vadd.f32 %v4179_v63, %v831_v35 }
 0x2a2   :  { %v4663_v36 = vpop.f32.mrf.mxu1 }
 0x2a4   :  { %v834_v37 = vpop.f32.mrf.mxu1 }
 0x2a5   :  { %v845_v12 = vadd.f32 %v4179_v63, %v834_v37 }
 0x2a6   :  { %v4664_v43 = vpop.f32.mrf.mxu1 }
 0x2aa   :  { %v903_v41 = vpop.f32.mrf.mxu0  ;;  %v964_v42 = vpop.f32.mrf.mxu1 }
 0x2ab   :  { %v910_v9 = vadd.f32 %v903_v41, %v844_v6 }
 0x2ac   :  { %v4671_v46 = vpop.f32.mrf.mxu0  ;;  %v4679_v50 = vpop.f32.mrf.mxu1 }
 0x2ad   :  { %v971_v13 = vadd.f32 %v964_v42, %v910_v9 }
 0x2ae   :  { %v906_v51 = vpop.f32.mrf.mxu0  ;;  %v967_v52 = vpop.f32.mrf.mxu1 }
 0x2af   :  { %v911_v14 = vadd.f32 %v906_v51, %v845_v12 }
 0x2b0   :  { %v4672_v53 = vpop.f32.mrf.mxu0  ;;  %v4680_v54 = vpop.f32.mrf.mxu1 }
 0x2b1   :  { %v972_v20 = vadd.f32 %v967_v52, %v911_v14 }
 0x2b2   :  { %v1031_v55 = vpop.f32.mrf.mxu0  ;;  %v1092_v56 = vpop.f32.mrf.mxu1 }
 0x2b3   :  { %v1038_v16 = vadd.f32 %v1031_v55, %v971_v13 }
 0x2b4   :  { %v4687_v57 = vpop.f32.mrf.mxu0  ;;  %v4695_v58 = vpop.f32.mrf.mxu1 }
 0x2b5   :  { %v1099_v23 = vadd.f32 %v1092_v56, %v1038_v16 }
 0x2b6   :  { %v1034_v59 = vpop.f32.mrf.mxu0  ;;  %v1095_v60 = vpop.f32.mrf.mxu1 }
 0x2b7   :  { %v1039_v25 = vadd.f32 %v1034_v59, %v972_v20 }
 0x2b8   :  { %v4688_v0 = vpop.f32.mrf.mxu0  ;;  %v4696_v3 = vpop.f32.mrf.mxu1 }
 0x2b9   :  { %v1100_v31 = vadd.f32 %v1095_v60, %v1039_v25 }
 0x2ba   :  { %v1159_v4 = vpop.f32.mrf.mxu0  ;;  %v1220_v5 = vpop.f32.mrf.mxu1 }
 0x2bb   :  { %v1166_v45 = vadd.f32 %v1159_v4, %v1099_v23 }
 0x2bc   :  { %v4703_v7 = vpop.f32.mrf.mxu0  ;;  %v4711_v8 = vpop.f32.mrf.mxu1 }
 0x2bd   :  { %v1227_v32 = vadd.f32 %v1220_v5, %v1166_v45 }
 0x2be   :  { %v1162_v11 = vpop.f32.mrf.mxu0  ;;  %v1223_v48 = vpop.f32.mrf.mxu1 }
 0x2bf   :  { %v1167_v35 = vadd.f32 %v1162_v11, %v1100_v31 }
 0x2c0   :  { %v4704_v39 = vpop.f32.mrf.mxu0  ;;  %v4712_v40 = vpop.f32.mrf.mxu1 }
 0x2c1   :  { %v1228_v46 = vadd.f32 %v1223_v48, %v1167_v35  ;;  %v5455_v35 = vmov 65535  }
 0x2c2   :  { %v1287_v15 = vpop.f32.mrf.mxu0 }
 0x2c3   :  { %v1294_v43 = vadd.f32 %v1287_v15, %v1227_v32 }
 0x2c4   :  { %v4719_v17 = vpop.f32.mrf.mxu0  ;;  %v1346_v18 = vpop.f32.mrf.mxu1 }
 0x2c5   :  { %v1353_v52 = vadd.f32 %v1346_v18, %v1294_v43 }
 0x2c6   :  { %v1290_v21 = vpop.f32.mrf.mxu0  ;;  %v4727_v22 = vpop.f32.mrf.mxu1 }
 0x2c7   :  { %v1295_v53 = vadd.f32 %v1290_v21, %v1228_v46 }
 0x2c8   :  { %v4720_v27 = vpop.f32.mrf.mxu0  ;;  %v1349_v28 = vpop.f32.mrf.mxu1 }
 0x2c9   :  { %v1354_v59 = vadd.f32 %v1349_v28, %v1295_v53  ;;  %v5314_v53 = vld [vmem:[%s6689_s7 + $0x30] sm:$0xff]  }
 0x2ca   :  { %v4728_v49 = vpop.f32.mrf.mxu1 }
 0x2ce   :  { %v1412_v36 = vpop.f32.mrf.mxu0  ;;  %v1473_v37 = vpop.f32.mrf.mxu1 }
 0x2cf   :  { %v1419_v56 = vadd.f32 %v1412_v36, %v1353_v52  ;;  %v1823_v36 = vsel %vm1821_vm4, 4294967295, %v5455_v35  ;;  %v5312_v52 = vld [vmem:[%s6689_s7 + $0x38] sm:$0xff]  }
 0x2d0   :  { %v4735_v41 = vpop.f32.mrf.mxu0  ;;  %v4743_v42 = vpop.f32.mrf.mxu1 }
 0x2d1   :  { %v1480_v0 = vadd.f32 %v1473_v37, %v1419_v56  ;;  %v5954_v42 = vsel %vm1822_vm6, %v1823_v36, 0  ;;  %v5344_v36 = vld [vmem:[%s6689_s7 + $0x110] sm:$0xff]  }
 0x2d2   :  { %v1415_v50 = vpop.f32.mrf.mxu0  ;;  %v1476_v51 = vpop.f32.mrf.mxu1 }
 0x2d3   :  { %v1420_v3 = vadd.f32 %v1415_v50, %v1354_v59 }
 0x2d4   :  { %v4736_v54 = vpop.f32.mrf.mxu0  ;;  %v4744_v55 = vpop.f32.mrf.mxu1 }
 0x2d5   :  { %v1481_v9 = vadd.f32 %v1476_v51, %v1420_v3  ;;  %v5310_v51 = vld [vmem:[%s6688_s6] sm:$0x1f]   ;;  %v5316_v54 = vld [vmem:[%s6689_s7 + $0x28] sm:$0xff]   ;;  %v5321_v3 = vld [vmem:[%s6689_s7 + $0x50] sm:$0xff]  }
 0x2d6   :  { %v1540_v57 = vpop.f32.mrf.mxu0  ;;  %v1601_v58 = vpop.f32.mrf.mxu1  ;;  %v5318_v55 = vld [vmem:[%s6689_s7 + $0x20] sm:$0xff]  }
 0x2d7   :  { %v1547_v6 = vadd.f32 %v1540_v57, %v1480_v0  ;;  %v5319_v57 = vld [vmem:[%s6689_s7 + $0x58] sm:$0xff]  }
 0x2d8   :  { %v4751_v63 = vpop.f32.mrf.mxu0  ;;  %v4759_v60 = vpop.f32.mrf.mxu1 }
 0x2d9   :  { %v1608_v12 = vadd.f32 %v1601_v58, %v1547_v6  ;;  %v5320_v63 = vld [vmem:[%s6689_s7 + $0x78] sm:$0xff]   ;;  %v5323_v6 = vld [vmem:[%s6689_s7 + $0x48] sm:$0xff]  }
 0x2da   :  { %v1543_v4 = vpop.f32.mrf.mxu0  ;;  %v1604_v5 = vpop.f32.mrf.mxu1 }
 0x2db   :  { %v1548_v39 = vadd.f32 %v1543_v4, %v1481_v9  ;;  %v5326_v9 = vld [vmem:[%s6689_s7 + $0x60] sm:$0xff]  }
 0x2dc   :  { %v4752_v7 = vpop.f32.mrf.mxu0  ;;  %v4760_v8 = vpop.f32.mrf.mxu1 }
 0x2dd   :  { %v1609_v17 = vadd.f32 %v1604_v5, %v1548_v39  ;;  %v5322_v5 = vld [vmem:[%s6689_s7 + $0x70] sm:$0xff]   ;;  %v5324_v7 = vld [vmem:[%s6689_s7 + $0x68] sm:$0xff]   ;;  %v5325_v8 = vld [vmem:[%s6689_s7 + $0x40] sm:$0xff]  }
 0x2de   :  { %v1668_v11 = vpop.f32.mrf.mxu0  ;;  %v1729_v48 = vpop.f32.mrf.mxu1 }
 0x2df   :  { %v1675_v14 = vadd.f32 %v1668_v11, %v1608_v12  ;;  %v5327_v11 = vld [vmem:[%s6689_s7 + $0x98] sm:$0xff]  }
 0x2e0   :  { %v4767_v40 = vpop.f32.mrf.mxu0  ;;  %v4775_v13 = vpop.f32.mrf.mxu1  ;;  %v5328_v12 = vld [vmem:[%s6689_s7 + $0xb8] sm:$0xff]  }
 0x2e1   :  { %v1736_v21 = vadd.f32 %v1729_v48, %v1675_v14  ;;  %v5329_v40 = vld [vmem:[%s6689_s7 + $0x90] sm:$0xff]   ;;  %v5331_v14 = vld [vmem:[%s6689_s7 + $0x88] sm:$0xff]  }
 0x2e2   :  { %v1671_v15 = vpop.f32.mrf.mxu0  ;;  %v1732_v16 = vpop.f32.mrf.mxu1  ;;  %v5330_v13 = vld [vmem:[%s6689_s7 + $0xb0] sm:$0xff]  }
 0x2e3   :  { %v1676_v22 = vadd.f32 %v1671_v15, %v1609_v17  ;;  %v5332_v15 = vld [vmem:[%s6689_s7 + $0xa8] sm:$0xff]   ;;  %v5334_v17 = vld [vmem:[%s6689_s7 + $0xa0] sm:$0xff]  }
 0x2e4   :  { %v4768_v18 = vpop.f32.mrf.mxu0  ;;  %v4776_v20 = vpop.f32.mrf.mxu1 }
 0x2e5   :  { %v1737_v28 = vadd.f32 %v1732_v16, %v1676_v22  ;;  %v5333_v16 = vld [vmem:[%s6689_s7 + $0x80] sm:$0xff]   ;;  %v5335_v18 = vld [vmem:[%s6689_s7 + $0xd8] sm:$0xff]  }
 0x2e6   :  { %v1796_v23 = vpop.f32.mrf.mxu0 }
 0x2e7   :  { %v1803_v25 = vadd.f32 %v1796_v23, %v1736_v21  ;;  %v5336_v21 = vld [vmem:[%s6689_s7 + $0xf8] sm:$0xff]   ;;  %v5337_v23 = vld [vmem:[%s6689_s7 + $0xd0] sm:$0xff]  }
 0x2e8   :  { %v4783_v27 = vpop.f32.mrf.mxu0 }
 0x2e9   :  { %v1807_v49 = vmul.f32 0.01, %v1803_v25  ;;  %vm1805_vm5 = vcmp.ge.f32.partialorder %v1803_v25, 0.0  ;;  %v5339_v27 = vld [vmem:[%s6689_s7 + $0xc8] sm:$0xff]  }
 0x2ea   :  { %v1799_v45 = vpop.f32.mrf.mxu0 }
 0x2eb   :  { %v1804_v31 = vadd.f32 %v1799_v45, %v1737_v28  ;;  %v1809_v43 = vsel %vm1805_vm5, %v1803_v25, %v1807_v49  ;;  %v5338_v25 = vld [vmem:[%s6689_s7 + $0xf0] sm:$0xff]   ;;  %v5340_v28 = vld [vmem:[%s6689_s7 + $0xe8] sm:$0xff]   ;;  %v5341_v45 = vld [vmem:[%s6689_s7 + $0xc0] sm:$0xff]  }
 0x2ec   :  { %v4784_v32 = vpop.f32.mrf.mxu0  ;;  %v5342_v49 = vld [vmem:[%s6689_s7 + $0xe0] sm:$0xff]  }
 0x2ed   :  { %vm1806_vm7 = vcmp.ge.f32.partialorder %v1804_v31, 0.0  ;;  %v1808_v37 = vmul.f32 0.01, %v1804_v31 }
 0x2ef   :  { %v1810_v41 = vsel %vm1806_vm7, %v1804_v31, %v1808_v37  ;;  %v5343_v31 = vld [vmem:[%s6689_s7 + $0x118] sm:$0xff]   ;;  %v5345_v37 = vld [vmem:[%s6689_s7 + $0x108] sm:$0xff]  }
 0x2f0   :  { %v1811_v46 = vpack.c.bf16 %v1810_v41, %v1809_v43  ;;  %v5346_v43 = vld [vmem:[%s6689_s7 + $0x100] sm:$0xff]  }
 0x2f2   :  { %v1826_v50 = vand.u32 %v5954_v42, %v1811_v46  ;;  %v6139_v46 = vld [vmem:[%s6691_s9 + $0x18] sm:$0xff]  }
 0x2f4   :  { %4786 = vmatpush3.bf16.msra.mxu1 %v1826_v50  ;;  %v6145_v50 = vld [vmem:[%s6691_s9 + $0x10] sm:$0xff]  }
 0x2f5   :  { %4803 = vmatprep.subr.bf16.mxu1 %v5453_v24 }
 0x2f7   :  { %4788 = vmatmul.mubr.msk.bf16.vlgmr.msra.gmra.mxu1 %vm1817_vm8, %v5310_v51  ;;  %v6153_v51 = vld [vmem:[%s6691_s9 + $0x8] sm:$0xff]  }
 0x2f8   :  { %4804 = vmatpush3.bf16.msra.mxu1 %v5312_v52  ;;  %4811 = vmatprep.mubr.msk.bf16.mxu1 %vm5454_vm0, %v5453_v24  ;;  %v6160_v52 = vld [vmem:[%s6691_s9] sm:$0xff]  }
 0x2f9   :  { %4805 = vmatprep.subr.bf16.mxu1 %v5453_v24 }
 0x2fc   :  { %4806 = vmatpush3.bf16.msra.mxu1 %v5314_v53 }
 0x2fd   :  { %4807 = vmatprep.subr.bf16.mxu1 %v5453_v24 }
 0x300   :  { %4808 = vmatpush3.bf16.msra.mxu1 %v5316_v54 }
 0x301   :  { %4809 = vmatprep.subr.bf16.mxu1 %v5453_v24 }
 0x304   :  { %4810 = vmatpush3.bf16.msra.mxu1 %v5318_v55 }
 0x305   :  { %4827 = vmatprep.subr.bf16.mxu1 %v5453_v24 }
 0x3b7   :  { %v1862_v56 = vpop.f32.mrf.mxu1 }
 0x3b8   :  { %v5983_v58 = vpack.c.bf16 %v1862_v56, %v1862_v56 }
 0x3b9   :  { %v4789_v59 = vpop.f32.mrf.mxu1 }
 0x3ba   :  { %4800 = vmatmul.mubr.msk.bf16.vlgmr.msra.gmra.mxu0 %vm647_vm9, %v5983_v58  ;;  %v5991_v60 = vshrl.u32 %v5983_v58, 16  ;;  %v2009_v48 = vrot.slane %v5983_v58, 1  ;;  %v2147_v20 = vrot.slane %v5983_v58, 2  ;;  %v2285_v32 = vrot.slane %v5983_v58, 3 }
 0x3bb   :  { %4816 = vmatpush3.bf16.msra.mxu0 %v5319_v57  ;;  %v5993_v0 = vpop.f32.mrf.mxu1  ;;  %4823 = vmatprep.mubr.msk.bf16.mxu0 %vm5454_vm0, %v5453_v24 }
 0x3bc   :  { %4812 = vmatmul.mubr.msk.bf16.vlgmr.msra.gmra.mxu1 %vm647_vm9, %v5991_v60  ;;  %4817 = vmatprep.subr.bf16.mxu0 %v5453_v24  ;;  %v2078_v39 = vrot.slane %v5991_v60, 1  ;;  %v2216_v22 = vrot.slane %v5991_v60, 2  ;;  %v2354_v35 = vrot.slane %v5991_v60, 3  ;;  %v2423_v41 = vpack.c.bf16 %v5993_v0, %v5993_v0 }
 0x3bd   :  { %4828 = vmatpush3.bf16.msra.mxu1 %v5320_v63  ;;  %v4790_v4 = vpop.f32.mrf.mxu1  ;;  %4835 = vmatprep.mubr.msk.bf16.mxu1 %vm5454_vm0, %v5453_v24 }
 0x3be   :  { %4829 = vmatprep.subr.bf16.mxu1 %v5453_v24 }
 0x3bf   :  { %4818 = vmatpush3.bf16.msra.mxu0 %v5321_v3 }
 0x3c0   :  { %4819 = vmatprep.subr.bf16.mxu0 %v5453_v24 }
 0x3c1   :  { %4830 = vmatpush3.bf16.msra.mxu1 %v5322_v5 }
 0x3c2   :  { %4831 = vmatprep.subr.bf16.mxu1 %v5453_v24 }
 0x3c3   :  { %4820 = vmatpush3.bf16.msra.mxu0 %v5323_v6 }
 0x3c4   :  { %4821 = vmatprep.subr.bf16.mxu0 %v5453_v24 }
 0x3c5   :  { %4832 = vmatpush3.bf16.msra.mxu1 %v5324_v7 }
 0x3c6   :  { %4833 = vmatprep.subr.bf16.mxu1 %v5453_v24 }
 0x3c7   :  { %4822 = vmatpush3.bf16.msra.mxu0 %v5325_v8 }
 0x3c8   :  { %4839 = vmatprep.subr.bf16.mxu0 %v5453_v24 }
 0x3c9   :  { %4834 = vmatpush3.bf16.msra.mxu1 %v5326_v9 }
 0x3ca   :  { %4824 = vmatmul.mubr.msk.bf16.vlgmr.msra.gmra.mxu0 %vm647_vm9, %v2009_v48  ;;  %4851 = vmatprep.subr.bf16.mxu1 %v5453_v24 }
 0x3cb   :  { %4840 = vmatpush3.bf16.msra.mxu0 %v5327_v11  ;;  %4847 = vmatprep.mubr.msk.bf16.mxu0 %vm5454_vm0, %v5453_v24 }
 0x3cc   :  { %4836 = vmatmul.mubr.msk.bf16.vlgmr.msra.gmra.mxu1 %vm647_vm9, %v2078_v39  ;;  %4841 = vmatprep.subr.bf16.mxu0 %v5453_v24 }
 0x3cd   :  { %4852 = vmatpush3.bf16.msra.mxu1 %v5328_v12  ;;  %4859 = vmatprep.mubr.msk.bf16.mxu1 %vm5454_vm0, %v5453_v24 }
 0x3ce   :  { %4853 = vmatprep.subr.bf16.mxu1 %v5453_v24 }
 0x3cf   :  { %4842 = vmatpush3.bf16.msra.mxu0 %v5329_v40  ;;  %v587_v40 = vld [vmem:[%s6690_s8] sm:$0x1] }
 0x3d0   :  { %4843 = vmatprep.subr.bf16.mxu0 %v5453_v24 }
 0x3d1   :  { %4854 = vmatpush3.bf16.msra.mxu1 %v5330_v13 }
 0x3d2   :  { %4855 = vmatprep.subr.bf16.mxu1 %v5453_v24 }
 0x3d3   :  { %4844 = vmatpush3.bf16.msra.mxu0 %v5331_v14 }
 0x3d4   :  { %4845 = vmatprep.subr.bf16.mxu0 %v5453_v24 }
 0x3d5   :  { %4856 = vmatpush3.bf16.msra.mxu1 %v5332_v15 }
 0x3d6   :  { %4857 = vmatprep.subr.bf16.mxu1 %v5453_v24 }
 0x3d7   :  { %4846 = vmatpush3.bf16.msra.mxu0 %v5333_v16 }
 0x3d8   :  { %4863 = vmatprep.subr.bf16.mxu0 %v5453_v24 }
 0x3d9   :  { %4858 = vmatpush3.bf16.msra.mxu1 %v5334_v17 }
 0x3da   :  { %4848 = vmatmul.mubr.msk.bf16.vlgmr.msra.gmra.mxu0 %vm647_vm9, %v2147_v20  ;;  %4875 = vmatprep.subr.bf16.mxu1 %v5453_v24 }
 0x3db   :  { %4864 = vmatpush3.bf16.msra.mxu0 %v5335_v18  ;;  %4871 = vmatprep.mubr.msk.bf16.mxu0 %vm5454_vm0, %v5453_v24 }
 0x3dc   :  { %4860 = vmatmul.mubr.msk.bf16.vlgmr.msra.gmra.mxu1 %vm647_vm9, %v2216_v22  ;;  %4865 = vmatprep.subr.bf16.mxu0 %v5453_v24 }
 0x3dd   :  { %4876 = vmatpush3.bf16.msra.mxu1 %v5336_v21  ;;  %4883 = vmatprep.mubr.msk.bf16.mxu1 %vm5454_vm0, %v5453_v24 }
 0x3de   :  { %4877 = vmatprep.subr.bf16.mxu1 %v5453_v24 }
 0x3df   :  { %4866 = vmatpush3.bf16.msra.mxu0 %v5337_v23 }
 0x3e0   :  { %4867 = vmatprep.subr.bf16.mxu0 %v5453_v24 }
 0x3e1   :  { %4878 = vmatpush3.bf16.msra.mxu1 %v5338_v25 }
 0x3e2   :  { %4879 = vmatprep.subr.bf16.mxu1 %v5453_v24 }
 0x3e3   :  { %4868 = vmatpush3.bf16.msra.mxu0 %v5339_v27 }
 0x3e4   :  { %4869 = vmatprep.subr.bf16.mxu0 %v5453_v24 }
 0x3e5   :  { %4880 = vmatpush3.bf16.msra.mxu1 %v5340_v28 }
 0x3e6   :  { %4881 = vmatprep.subr.bf16.mxu1 %v5453_v24 }
 0x3e7   :  { %4870 = vmatpush3.bf16.msra.mxu0 %v5341_v45 }
 0x3e8   :  { %4887 = vmatprep.subr.bf16.mxu0 %v5453_v24 }
 0x3e9   :  { %4882 = vmatpush3.bf16.msra.mxu1 %v5342_v49 }
 0x3ea   :  { %4872 = vmatmul.mubr.msk.bf16.vlgmr.msra.gmra.mxu0 %vm647_vm9, %v2285_v32  ;;  %4899 = vmatprep.subr.bf16.mxu1 %v5453_v24 }
 0x3eb   :  { %4888 = vmatpush3.bf16.msra.mxu0 %v5343_v31  ;;  %4895 = vmatprep.mubr.msk.bf16.mxu0 %vm5454_vm0, %v5453_v24 }
 0x3ec   :  { %4884 = vmatmul.mubr.msk.bf16.vlgmr.msra.gmra.mxu1 %vm647_vm9, %v2354_v35  ;;  %4889 = vmatprep.subr.bf16.mxu0 %v5453_v24 }
 0x3ed   :  { %4907 = vmatprep.mubr.msk.bf16.mxu1 %vm5454_vm0, %v5453_v24  ;;  %4900 = vmatpush3.bf16.msra.mxu1 %v6139_v46 }
 0x3ee   :  { %4901 = vmatprep.subr.bf16.mxu1 %v5453_v24 }
 0x3ef   :  { %4890 = vmatpush3.bf16.msra.mxu0 %v5344_v36 }
 0x3f0   :  { %4891 = vmatprep.subr.bf16.mxu0 %v5453_v24 }
 0x3f1   :  { %4902 = vmatpush3.bf16.msra.mxu1 %v6145_v50 }
 0x3f2   :  { %4903 = vmatprep.subr.bf16.mxu1 %v5453_v24 }
 0x3f3   :  { %4892 = vmatpush3.bf16.msra.mxu0 %v5345_v37 }
 0x3f4   :  { %4893 = vmatprep.subr.bf16.mxu0 %v5453_v24 }
 0x3f5   :  { %4904 = vmatpush3.bf16.msra.mxu1 %v6153_v51 }
 0x3f6   :  { %4905 = vmatprep.subr.bf16.mxu1 %v5453_v24 }
 0x3f7   :  { %4894 = vmatpush3.bf16.msra.mxu0 %v5346_v43 }
 0x3f8   :  { %4911 = vmatprep.subr.bf16.mxu0 %v5453_v24 }
 0x3f9   :  { %4906 = vmatpush3.bf16.msra.mxu1 %v6160_v52 }
 0x3fa   :  { %4896 = vmatmul.mubr.msk.bf16.vlgmr.msra.gmra.mxu0 %vm647_vm9, %v2423_v41  ;;  %4919 = vmatprep.subr.bf16.mxu1 %v5453_v24 }
 0x3fb   :  { %4915 = vmatprep.mubr.msk.bf16.mxu0 %vm5454_vm0, %v5453_v24  ;;  %4912 = vmatpush3.bf16.msra.mxu0 %v6229_v62 }
 0x3fc   :  { %4913 = vmatprep.subr.bf16.mxu0 %v5453_v24 }
 0x47a   :  { %v1931_v53 = vpop.f32.mrf.mxu0 }
 0x47b   :  { %v1937_v16 = vadd.f32 %v1931_v53, %v587_v40 }
 0x47c   :  { %v4801_v54 = vpop.f32.mrf.mxu0  ;;  %v2001_v55 = vpop.f32.mrf.mxu1 }
 0x47d   :  { %v2007_v17 = vadd.f32 %v2001_v55, %v1937_v16 }
 0x47e   :  { %v1934_v56 = vpop.f32.mrf.mxu0  ;;  %v4813_v57 = vpop.f32.mrf.mxu1 }
 0x480   :  { %v4802_v58 = vpop.f32.mrf.mxu0  ;;  %v2004_v59 = vpop.f32.mrf.mxu1 }
 0x482   :  { %v4814_v63 = vpop.f32.mrf.mxu1 }
 0x48a   :  { %v2071_v60 = vpop.f32.mrf.mxu0 }
 0x48b   :  { %v2077_v18 = vadd.f32 %v2071_v60, %v2007_v17 }
 0x48c   :  { %v4825_v0 = vpop.f32.mrf.mxu0  ;;  %v2140_v3 = vpop.f32.mrf.mxu1 }
 0x48d   :  { %v2146_v23 = vadd.f32 %v2140_v3, %v2077_v18  ;;  %v5362_v3 = vld [vmem:[%s6686_s4 + $0x8] sm:$0xff]  }
 0x48e   :  { %v2074_v4 = vpop.f32.mrf.mxu0  ;;  %v4837_v5 = vpop.f32.mrf.mxu1 }
 0x48f   :  { %v5363_v4 = vld [vmem:[%s6686_s4] sm:$0xff]  }
 0x490   :  { %v4826_v6 = vpop.f32.mrf.mxu0  ;;  %v2143_v7 = vpop.f32.mrf.mxu1 }
 0x492   :  { %v4838_v8 = vpop.f32.mrf.mxu1 }
 0x49a   :  { %v2209_v9 = vpop.f32.mrf.mxu0 }
 0x49b   :  { %v2215_v28 = vadd.f32 %v2209_v9, %v2146_v23 }
 0x49c   :  { %v4849_v11 = vpop.f32.mrf.mxu0  ;;  %v2278_v48 = vpop.f32.mrf.mxu1 }
 0x49d   :  { %v2284_v32 = vadd.f32 %v2278_v48, %v2215_v28  ;;  %v5364_v48 = vld [vmem:[%s6686_s4 + $0x18] sm:$0xff]  }
 0x49e   :  { %v2212_v12 = vpop.f32.mrf.mxu0  ;;  %v4861_v39 = vpop.f32.mrf.mxu1 }
 0x4a0   :  { %v4850_v13 = vpop.f32.mrf.mxu0  ;;  %v2281_v14 = vpop.f32.mrf.mxu1 }
 0x4a1   :  { %v5365_v14 = vld [vmem:[%s6686_s4 + $0x10] sm:$0xff]  }
 0x4a2   :  { %v4862_v15 = vpop.f32.mrf.mxu1 }
 0x4aa   :  { %v2347_v20 = vpop.f32.mrf.mxu0 }
 0x4ab   :  { %v2353_v35 = vadd.f32 %v2347_v20, %v2284_v32 }
 0x4ac   :  { %v4873_v21 = vpop.f32.mrf.mxu0  ;;  %v2416_v22 = vpop.f32.mrf.mxu1 }
 0x4ad   :  { %v2422_v36 = vadd.f32 %v2416_v22, %v2353_v35  ;;  %v5366_v22 = vld [vmem:[%s6686_s4 + $0x28] sm:$0xff]  }
 0x4ae   :  { %v2350_v25 = vpop.f32.mrf.mxu0  ;;  %v4885_v27 = vpop.f32.mrf.mxu1 }
 0x4b0   :  { %v4874_v45 = vpop.f32.mrf.mxu0  ;;  %v2419_v49 = vpop.f32.mrf.mxu1 }
 0x4b1   :  { %v5367_v45 = vld [vmem:[%s6686_s4 + $0x20] sm:$0xff]  }
 0x4b2   :  { %v4886_v31 = vpop.f32.mrf.mxu1 }
 0x4ba   :  { %v2485_v37 = vpop.f32.mrf.mxu0 }
 0x4bb   :  { %v2491_v43 = vadd.f32 %v2485_v37, %v2422_v36  ;;  %v5368_v36 = vld [vmem:[%s6686_s4 + $0x38] sm:$0xff]  }
 0x4bc   :  { %v4897_v41 = vpop.f32.mrf.mxu0 }
 0x4bd   :  { %vm2492_vm11 = vcmp.ge.f32.partialorder %v2491_v43, 0.0  ;;  %v2493_v53 = vmul.f32 0.01, %v2491_v43 }
 0x4be   :  { %v2488_v54 = vpop.f32.mrf.mxu0 }
 0x4bf   :  { %v2494_v55 = vsel %vm2492_vm11, %v2491_v43, %v2493_v53  ;;  %v5369_v54 = vld [vmem:[%s6686_s4 + $0x30] sm:$0xff]  }
 0x4c0   :  { %v2495_v56 = vpack.c.bf16 %v2494_v55, %v2494_v55  ;;  %v4898_v57 = vpop.f32.mrf.mxu0 }
 0x4c2   :  { %4908 = vmatmul.mubr.msk.bf16.vlgmr.msra.gmra.mxu1 %vm647_vm9, %v2495_v56 }
 0x4c3   :  { %4920 = vmatpush3.bf16.msra.mxu1 %v429_v44  ;;  %4927 = vmatprep.mubr.msk.bf16.mxu1 %vm5454_vm0, %v5453_v24 }
 0x4c4   :  { %4921 = vmatprep.subr.bf16.mxu1 %v5453_v24 }
 0x4c7   :  { %4922 = vmatpush3.bf16.msra.mxu1 %v428_v26  ;;  %v6261_v26 = vld [vmem:[%s6692_s10] sm:$0x1] }
 0x4c8   :  { %4923 = vmatprep.subr.bf16.mxu1 %v5453_v24 }
 0x4cb   :  { %4924 = vmatpush3.bf16.msra.mxu1 %v427_v10  ;;  %v6242_v10 = vld [vmem:[%s6693_s11] sm:$0xff]  }
 0x4cc   :  { %4925 = vmatprep.subr.bf16.mxu1 %v5453_v24  ;;  %4914 = vmatpush3.bf16.msra.mxu0 %v6242_v10 }
 0x4cd   :  { %4963 = vmatprep.subr.bf16.mxu0 %v5453_v24 }
 0x4cf   :  { %4926 = vmatpush3.bf16.msra.mxu1 %v426_v47  ;;  %v5358_v47 = vld [vmem:[%s6685_s3 + $0x28] sm:$0xff]  }
 0x4d0   :  { %5043 = vmatprep.subr.bf16.mxu1 %v5453_v24 }
 0x4d2   :  { %4928 = vmatmul.mubr.msk.bf16.vlgmr.msra.gmra.mxu1 %vm647_vm9, %v5353_v29  ;;  %v5370_v29 = vld [vmem:[%s6686_s4 + $0x48] sm:$0xff]  }
 0x4d3   :  { %4931 = vmatprep.mubr.msk.bf16.mxu1 %vm5454_vm0, %v5453_v24  ;;  %5044 = vmatpush3.bf16.msra.mxu1 %v5813_v61  ;;  %v5356_v61 = vld [vmem:[%s6685_s3 + $0x18] sm:$0xff]  }
 0x4d4   :  { %5045 = vmatprep.subr.bf16.mxu1 %v5453_v24 }
 0x4d7   :  { %5046 = vmatpush3.bf16.msra.mxu1 %v5827_v2  ;;  %v5357_v2 = vld [vmem:[%s6685_s3 + $0x20] sm:$0xff]  }
 0x4d8   :  { %5059 = vmatprep.subr.bf16.mxu1 %v5453_v24 }
 0x4da   :  { %4932 = vmatmul.mubr.msk.bf16.gmra.mxu1 %vm647_vm9, %v5354_v33 }
 0x4db   :  { %4935 = vmatprep.mubr.msk.bf16.mxu1 %vm5454_vm0, %v5453_v24 }
 0x4e2   :  { %4936 = vmatmul.mubr.msk.bf16.gmra.mxu1 %vm647_vm9, %v5355_v34 }
 0x4e3   :  { %4939 = vmatprep.mubr.msk.bf16.mxu1 %vm5454_vm0, %v5453_v24 }
 0x4ea   :  { %4940 = vmatmul.mubr.msk.bf16.gmra.mxu1 %vm647_vm9, %v5356_v61 }
 0x4eb   :  { %4943 = vmatprep.mubr.msk.bf16.mxu1 %vm5454_vm0, %v5453_v24 }
 0x4f2   :  { %4944 = vmatmul.mubr.msk.bf16.gmra.mxu1 %vm647_vm9, %v5357_v2 }
 0x4f3   :  { %4947 = vmatprep.mubr.msk.bf16.mxu1 %vm5454_vm0, %v5453_v24 }
 0x4fa   :  { %4948 = vmatmul.mubr.msk.bf16.gmra.mxu1 %vm647_vm9, %v5358_v47  ;;  %v5371_v47 = vld [vmem:[%s6686_s4 + $0x40] sm:$0xff]  }
 0x4fb   :  { %4951 = vmatprep.mubr.msk.bf16.mxu1 %vm5454_vm0, %v5453_v24 }
 0x502   :  { %4952 = vmatmul.mubr.msk.bf16.gmra.mxu1 %vm647_vm9, %v5359_v1 }
 0x503   :  { %4955 = vmatprep.mubr.msk.bf16.mxu1 %vm5454_vm0, %v5453_v24 }
 0x50a   :  { %4956 = vmatmul.mubr.msk.bf16.gmra.mxu1 %vm647_vm9, %v5360_v19 }
 0x50b   :  { %4959 = vmatprep.mubr.msk.bf16.mxu1 %vm5454_vm0, %v5453_v24 }
 0x512   :  { %4960 = vmatmul.mubr.msk.bf16.gmra.mxu1 %vm647_vm9, %v5361_v38 }
 0x513   :  { %5047 = vmatprep.mubr.msk.bf16.mxu1 %vm5454_vm0, %v5453_v24 }
 0x582   :  { %v2557_v30 = vpop.f32.mrf.mxu1 }
 0x583   :  { %v2563_v44 = vadd.f32 %v2557_v30, %v6261_v26 }
 0x584   :  { %v4909_v58 = vpop.f32.mrf.mxu1 }
 0x585   :  { %v2564_v59 = vmax.f32 %v2563_v44, 0.0  ;;  %v5372_v58 = vld [vmem:[%s6686_s4 + $0x58] sm:$0xff]  }
 0x586   :  { %v2560_v63 = vpop.f32.mrf.mxu1 }
 0x587   :  { %v2565_v60 = vpack.c.bf16 %v2564_v59, %v2564_v59 }
 0x588   :  { %v4910_v0 = vpop.f32.mrf.mxu1 }
 0x589   :  { %4916 = vmatmul.mubr.msk.bf16.vlgmr.msra.gmra.mxu0 %vm793_vm10, %v2565_v60 }
 0x58a   :  { %4964 = vmatpush3.bf16.msra.mxu0 %v5362_v3  ;;  %4967 = vmatprep.mubr.msk.bf16.mxu0 %vm5454_vm0, %v5453_v24  ;;  %v5373_v3 = vld [vmem:[%s6686_s4 + $0x50] sm:$0xff]  }
 0x58b   :  { %4965 = vmatprep.subr.bf16.mxu0 %v5453_v24 }
 0x58e   :  { %4966 = vmatpush3.bf16.msra.mxu0 %v5363_v4 }
 0x58f   :  { %4971 = vmatprep.subr.bf16.mxu0 %v5453_v24 }
 0x592   :  { %v2656_v5 = vpop.f32.mrf.mxu1 }
 0x594   :  { %v4929_v6 = vpop.f32.mrf.mxu1 }
 0x596   :  { %v2659_v7 = vpop.f32.mrf.mxu1 }
 0x597   :  { %v2727_v8 = vpack.c.bf16 %v2659_v7, %v2656_v5 }
 0x598   :  { %v4930_v9 = vpop.f32.mrf.mxu1 }
 0x599   :  { %4968 = vmatmul.mubr.msk.bf16.vlgmr.msra.gmra.mxu0 %vm793_vm10, %v2727_v8  ;;  %v5374_v8 = vld [vmem:[%s6686_s4 + $0x68] sm:$0xff]  }
 0x59a   :  { %v2664_v11 = vpop.f32.mrf.mxu1  ;;  %4972 = vmatpush3.bf16.msra.mxu0 %v5364_v48  ;;  %4975 = vmatprep.mubr.msk.bf16.mxu0 %vm5454_vm0, %v5453_v24 }
 0x59b   :  { %v2774_v12 = vpack.c.bf16 %v2664_v11, %v2659_v7  ;;  %4973 = vmatprep.subr.bf16.mxu0 %v5453_v24 }
 0x59c   :  { %v4933_v39 = vpop.f32.mrf.mxu1 }
 0x59d   :  { %v2778_v40 = vshll.u32 %v2774_v12, 16  ;;  %v2776_v15 = vshrl.u32 %v2774_v12, 16 }
 0x59e   :  { %v2667_v13 = vpop.f32.mrf.mxu1  ;;  %4974 = vmatpush3.bf16.msra.mxu0 %v5365_v14  ;;  %v5376_v14 = vld [vmem:[%s6686_s4 + $0xc8] sm:$0xff]  }
 0x59f   :  { %v2780_v16 = vrot.slane %v2778_v40, 1  ;;  %4979 = vmatprep.subr.bf16.mxu0 %v5453_v24  ;;  %v2828_v23 = vpack.c.bf16 %v2667_v13, %v2664_v11  ;;  %v5375_v40 = vld [vmem:[%s6686_s4 + $0x60] sm:$0xff]  }
 0x5a0   :  { %v4934_v17 = vpop.f32.mrf.mxu1 }
 0x5a1   :  { %v2781_v18 = vor.u32 %v2780_v16, %v2776_v15  ;;  %v2830_v49 = vrot.slane %v2828_v23, 1 }
 0x5a2   :  { %v2672_v20 = vpop.f32.mrf.mxu1 }
 0x5a3   :  { %4976 = vmatmul.mubr.msk.bf16.vlgmr.msra.gmra.mxu0 %vm793_vm10, %v2781_v18  ;;  %v2877_v25 = vpack.c.bf16 %v2672_v20, %v2667_v13 }
 0x5a4   :  { %v4937_v21 = vpop.f32.mrf.mxu1  ;;  %4980 = vmatpush3.bf16.msra.mxu0 %v5366_v22  ;;  %4983 = vmatprep.mubr.msk.bf16.mxu0 %vm5454_vm0, %v5453_v24 }
 0x5a5   :  { %4981 = vmatprep.subr.bf16.mxu0 %v5453_v24  ;;  %v2879_v31 = vshrl.u32 %v2877_v25, 16  ;;  %v2882_v32 = vshll.u32 %v2877_v25, 16  ;;  %v5377_v21 = vld [vmem:[%s6686_s4 + $0x78] sm:$0xff]  }
 0x5a6   :  { %v2675_v27 = vpop.f32.mrf.mxu1 }
 0x5a7   :  { %v2881_v43 = vrot.slane %v2879_v31, 1  ;;  %v2884_v41 = vrot.slane %v2882_v32, 2  ;;  %v2932_v34 = vpack.c.bf16 %v2675_v27, %v2672_v20 }
 0x5a8   :  { %v4938_v28 = vpop.f32.mrf.mxu1  ;;  %4982 = vmatpush3.bf16.msra.mxu0 %v5367_v45 }
 0x5a9   :  { %4987 = vmatprep.subr.bf16.mxu0 %v5453_v24  ;;  %v2885_v56 = vor.u32 %v2884_v41, %v2881_v43  ;;  %v2934_v19 = vrot.slane %v2932_v34, 2  ;;  %v5378_v28 = vld [vmem:[%s6686_s4 + $0xc0] sm:$0xff]   ;;  %v5381_v43 = vld [vmem:[%s6686_s4 + $0x88] sm:$0xff]  }
 0x5aa   :  { %v6297_v35 = vpop.f32.mrf.mxu1 }
 0x5ab   :  { %4984 = vmatmul.mubr.msk.bf16.vlgmr.msra.gmra.mxu0 %vm793_vm10, %v2830_v49  ;;  %v2981_v61 = vpack.c.bf16 %v6297_v35, %v2675_v27  ;;  %v5379_v49 = vld [vmem:[%s6686_s4 + $0x70] sm:$0xff]  }
 0x5ac   :  { %4988 = vmatpush3.bf16.msra.mxu0 %v5368_v36  ;;  %4991 = vmatprep.mubr.msk.bf16.mxu0 %vm5454_vm0, %v5453_v24  ;;  %v4941_v37 = vpop.f32.mrf.mxu1 }
 0x5ad   :  { %4989 = vmatprep.subr.bf16.mxu0 %v5453_v24  ;;  %v2983_v38 = vshrl.u32 %v2981_v61, 16  ;;  %v2986_v30 = vshll.u32 %v2981_v61, 16  ;;  %v5384_v61 = vld [vmem:[%s6686_s4 + $0x98] sm:$0xff]  }
 0x5ae   :  { %v2683_v53 = vpop.f32.mrf.mxu1 }
 0x5af   :  { %v2985_v63 = vrot.slane %v2983_v38, 2  ;;  %v2988_v60 = vrot.slane %v2986_v30, 3  ;;  %v3036_v11 = vpack.c.bf16 %v2683_v53, %v6297_v35  ;;  %v5380_v35 = vld [vmem:[%s6686_s4 + $0xe8] sm:$0xff]  }
 0x5b0   :  { %4990 = vmatpush3.bf16.msra.mxu0 %v5369_v54  ;;  %v4942_v55 = vpop.f32.mrf.mxu1 }
 0x5b1   :  { %4995 = vmatprep.subr.bf16.mxu0 %v5453_v24  ;;  %v2989_v5 = vor.u32 %v2988_v60, %v2985_v63  ;;  %v3038_v15 = vrot.slane %v3036_v11, 3  ;;  %v5382_v55 = vld [vmem:[%s6686_s4 + $0xe0] sm:$0xff]   ;;  %v5389_v11 = vld [vmem:[%s6686_s4 + $0xd0] sm:$0xff]  }
 0x5b2   :  { %v2688_v57 = vpop.f32.mrf.mxu1 }
 0x5b3   :  { %4992 = vmatmul.mubr.msk.bf16.vlgmr.msra.gmra.mxu0 %vm793_vm10, %v2885_v56  ;;  %v3085_v48 = vpack.c.bf16 %v2688_v57, %v2683_v53  ;;  %v5383_v57 = vld [vmem:[%s6686_s4 + $0x80] sm:$0xff]  }
 0x5b4   :  { %4996 = vmatpush3.bf16.msra.mxu0 %v5370_v29  ;;  %4999 = vmatprep.mubr.msk.bf16.mxu0 %vm5454_vm0, %v5453_v24  ;;  %v4945_v33 = vpop.f32.mrf.mxu1 }
 0x5b5   :  { %4997 = vmatprep.subr.bf16.mxu0 %v5453_v24  ;;  %v3087_v16 = vshrl.u32 %v3085_v48, 16  ;;  %v3090_v17 = vshll.u32 %v3085_v48, 16 }
 0x5b6   :  { %v6318_v2 = vpop.f32.mrf.mxu1 }
 0x5b7   :  { %v3089_v23 = vrot.slane %v3087_v16, 3  ;;  %v3092_v25 = vrot.slane %v3090_v17, 4  ;;  %v5392_v17 = vld [vmem:[%s6689_s7 + $0x18] sm:$0xff]  }
 0x5b8   :  { %4998 = vmatpush3.bf16.msra.mxu0 %v5371_v47  ;;  %v4946_v1 = vpop.f32.mrf.mxu1 }
 0x5b9   :  { %5003 = vmatprep.subr.bf16.mxu0 %v5453_v24  ;;  %v3093_v32 = vor.u32 %v3092_v25, %v3089_v23 }
 0x5ba   :  { %v6324_v44 = vpop.f32.mrf.mxu1 }
 0x5bb   :  { %5000 = vmatmul.mubr.msk.bf16.vlgmr.msra.gmra.mxu0 %vm793_vm10, %v2934_v19  ;;  %v3140_v33 = vpack.c.bf16 %v6324_v44, %v6318_v2  ;;  %v5385_v19 = vld [vmem:[%s6686_s4 + $0x90] sm:$0xff]  }
 0x5bc   :  { %5004 = vmatpush3.bf16.msra.mxu0 %v5372_v58  ;;  %5007 = vmatprep.mubr.msk.bf16.mxu0 %vm5454_vm0, %v5453_v24  ;;  %v4949_v59 = vpop.f32.mrf.mxu1  ;;  %v5386_v58 = vld [vmem:[%s6686_s4 + $0xb8] sm:$0xff]  }
 0x5bd   :  { %5005 = vmatprep.subr.bf16.mxu0 %v5453_v24 }
 0x5be   :  { %v2699_v0 = vpop.f32.mrf.mxu1 }
 0x5bf   :  { %v3187_v53 = vpack.c.bf16 %v2699_v0, %v6324_v44 }
 0x5c0   :  { %5006 = vmatpush3.bf16.msra.mxu0 %v5373_v3  ;;  %v4950_v4 = vpop.f32.mrf.mxu1 }
 0x5c1   :  { %5011 = vmatprep.subr.bf16.mxu0 %v5453_v24  ;;  %v3191_v34 = vshll.u32 %v3187_v53, 16  ;;  %v3189_v47 = vshrl.u32 %v3187_v53, 16 }
 0x5c2   :  { %v6337_v6 = vpop.f32.mrf.mxu1 }
 0x5c3   :  { %5008 = vmatmul.mubr.msk.bf16.vlgmr.msra.gmra.mxu0 %vm793_vm10, %v2989_v5  ;;  %v3241_v7 = vpack.c.bf16 %v6337_v6, %v2699_v0  ;;  %v3193_v1 = vrot.slane %v3191_v34, 1  ;;  %v5387_v0 = vld [vmem:[%s6686_s4 + $0xb0] sm:$0xff]  }
 0x5c4   :  { %5012 = vmatpush3.bf16.msra.mxu0 %v5374_v8  ;;  %5015 = vmatprep.mubr.msk.bf16.mxu0 %vm5454_vm0, %v5453_v24  ;;  %v4953_v9 = vpop.f32.mrf.mxu1 }
 0x5c5   :  { %5013 = vmatprep.subr.bf16.mxu0 %v5453_v24  ;;  %v3243_v12 = vrot.slane %v3241_v7, 1  ;;  %v3194_v38 = vor.u32 %v3193_v1, %v3189_v47 }
 0x5c6   :  { %v6348_v39 = vpop.f32.mrf.mxu1 }
 0x5c7   :  { %5048 = vmatmul.mubr.msk.bf16.vlgmr.msra.gmra.mxu1 %vm793_vm10, %v3243_v12  ;;  %v3290_v2 = vpack.c.bf16 %v6348_v39, %v6337_v6  ;;  %v5388_v6 = vld [vmem:[%s6686_s4 + $0xd8] sm:$0xff]  }
 0x5c8   :  { %5014 = vmatpush3.bf16.msra.mxu0 %v5375_v40  ;;  %v4954_v13 = vpop.f32.mrf.mxu1  ;;  %5060 = vmatpush3.bf16.msra.mxu1 %v5376_v14  ;;  %v5390_v40 = vld [vmem:[%s6686_s4 + $0xf8] sm:$0xff]  }
 0x5c9   :  { %5019 = vmatprep.subr.bf16.mxu0 %v5453_v24  ;;  %5061 = vmatprep.subr.bf16.mxu1 %v5453_v24  ;;  %v3292_v30 = vshrl.u32 %v3290_v2, 16  ;;  %v3295_v44 = vshll.u32 %v3290_v2, 16 }
 0x5ca   :  { %v6359_v18 = vpop.f32.mrf.mxu1  ;;  %5063 = vmatprep.mubr.msk.bf16.mxu1 %vm5454_vm0, %v5453_v24 }
 0x5cb   :  { %5016 = vmatmul.mubr.msk.bf16.vlgmr.msra.gmra.mxu0 %vm793_vm10, %v3038_v15  ;;  %v3345_v20 = vpack.c.bf16 %v6359_v18, %v6348_v39  ;;  %v3294_v59 = vrot.slane %v3292_v30, 1  ;;  %v3297_v63 = vrot.slane %v3295_v44, 2  ;;  %v5391_v15 = vld [vmem:[%s6686_s4 + $0xf0] sm:$0xff]  }
 0x5cc   :  { %5020 = vmatpush3.bf16.msra.mxu0 %v5377_v21  ;;  %5023 = vmatprep.mubr.msk.bf16.mxu0 %vm5454_vm0, %v5453_v24  ;;  %v4957_v22 = vpop.f32.mrf.mxu1  ;;  %v5395_v21 = vld [vmem:[%s6689_s7] sm:$0xff]  }
 0x5cd   :  { %5021 = vmatprep.subr.bf16.mxu0 %v5453_v24  ;;  %v3347_v27 = vrot.slane %v3345_v20, 2  ;;  %5062 = vmatpush3.bf16.msra.mxu1 %v5378_v28  ;;  %v3298_v3 = vor.u32 %v3297_v63, %v3294_v59  ;;  %v5394_v20 = vld [vmem:[%s6689_s7 + $0x8] sm:$0xff]  }
 0x5ce   :  { %v2715_v45 = vpop.f32.mrf.mxu1  ;;  %5075 = vmatprep.subr.bf16.mxu1 %v5453_v24 }
 0x5cf   :  { %v3394_v60 = vpack.c.bf16 %v2715_v45, %v6359_v18  ;;  %v5393_v18 = vld [vmem:[%s6689_s7 + $0x10] sm:$0xff]  }
 0x5d0   :  { %5022 = vmatpush3.bf16.msra.mxu0 %v5379_v49  ;;  %5064 = vmatmul.mubr.msk.bf16.vlgmr.msra.gmra.mxu1 %vm793_vm10, %v3347_v27  ;;  %v4958_v31 = vpop.f32.mrf.mxu1 }
 0x5d1   :  { %5027 = vmatprep.subr.bf16.mxu0 %v5453_v24  ;;  %5076 = vmatpush3.bf16.msra.mxu1 %v5380_v35  ;;  %v3396_v4 = vshrl.u32 %v3394_v60, 16  ;;  %v3399_v5 = vshll.u32 %v3394_v60, 16 }
 0x5d2   :  { %v2720_v36 = vpop.f32.mrf.mxu1  ;;  %5077 = vmatprep.subr.bf16.mxu1 %v5453_v24  ;;  %5079 = vmatprep.mubr.msk.bf16.mxu1 %vm5454_vm0, %v5453_v24 }
 0x5d3   :  { %5024 = vmatmul.mubr.msk.bf16.vlgmr.msra.gmra.mxu0 %vm793_vm10, %v3093_v32  ;;  %v3449_v37 = vpack.c.bf16 %v2720_v36, %v2715_v45  ;;  %v3398_v7 = vrot.slane %v3396_v4, 2  ;;  %v3401_v8 = vrot.slane %v3399_v5, 3  ;;  %v5396_v32 = vld [vmem:[%s6687_s5] ss:$0 sm:$0xff] }
 0x5d4   :  { %5028 = vmatpush3.bf16.msra.mxu0 %v5381_v43  ;;  %5031 = vmatprep.mubr.msk.bf16.mxu0 %vm5454_vm0, %v5453_v24  ;;  %v4961_v41 = vpop.f32.mrf.mxu1 }
 0x5d5   :  { %5029 = vmatprep.subr.bf16.mxu0 %v5453_v24  ;;  %v3451_v54 = vrot.slane %v3449_v37, 3  ;;  %5078 = vmatpush3.bf16.msra.mxu1 %v5382_v55  ;;  %v3402_v48 = vor.u32 %v3401_v8, %v3398_v7 }
 0x5d6   :  { %v2723_v56 = vpop.f32.mrf.mxu1  ;;  %5091 = vmatprep.subr.bf16.mxu1 %v5453_v24 }
 0x5d7   :  { %v3498_v9 = vpack.c.bf16 %v2723_v56, %v2720_v36 }
 0x5d8   :  { %5030 = vmatpush3.bf16.msra.mxu0 %v5383_v57  ;;  %5080 = vmatmul.mubr.msk.bf16.vlgmr.msra.gmra.mxu1 %vm793_vm10, %v3451_v54  ;;  %v4962_v29 = vpop.f32.mrf.mxu1 }
 0x5d9   :  { %5035 = vmatprep.subr.bf16.mxu0 %v5453_v24  ;;  %5093 = vmatprep.mubr.msk.bf16.mxu1 %vm5454_vm0, %v5453_v24  ;;  %v3500_v12 = vshrl.u32 %v3498_v9, 16  ;;  %v3503_v39 = vshll.u32 %v3498_v9, 16 }
 0x5db   :  { %5032 = vmatmul.mubr.msk.bf16.vlgmr.msra.gmra.mxu0 %vm793_vm10, %v3140_v33  ;;  %v3502_v13 = vrot.slane %v3500_v12, 3  ;;  %v3505_v14 = vrot.slane %v3503_v39, 4 }
 0x5dc   :  { %5036 = vmatpush3.bf16.msra.mxu0 %v5384_v61  ;;  %5039 = vmatprep.mubr.msk.bf16.mxu0 %vm5454_vm0, %v5453_v24 }
 0x5dd   :  { %5037 = vmatprep.subr.bf16.mxu0 %v5453_v24  ;;  %v3506_v16 = vor.u32 %v3505_v14, %v3502_v13 }
 0x5e0   :  { %5038 = vmatpush3.bf16.msra.mxu0 %v5385_v19 }
 0x5e1   :  { %5051 = vmatprep.subr.bf16.mxu0 %v5453_v24 }
 0x5e3   :  { %5040 = vmatmul.mubr.msk.bf16.vlgmr.msra.gmra.mxu0 %vm793_vm10, %v3194_v38 }
 0x5e4   :  { %5052 = vmatpush3.bf16.msra.mxu0 %v5386_v58  ;;  %5055 = vmatprep.mubr.msk.bf16.mxu0 %vm5454_vm0, %v5453_v24 }
 0x5e5   :  { %5053 = vmatprep.subr.bf16.mxu0 %v5453_v24 }
 0x5e8   :  { %5054 = vmatpush3.bf16.msra.mxu0 %v5387_v0 }
 0x5e9   :  { %5067 = vmatprep.subr.bf16.mxu0 %v5453_v24 }
 0x5eb   :  { %5056 = vmatmul.mubr.msk.bf16.vlgmr.msra.gmra.mxu0 %vm793_vm10, %v3298_v3 }
 0x5ec   :  { %5068 = vmatpush3.bf16.msra.mxu0 %v5388_v6  ;;  %5071 = vmatprep.mubr.msk.bf16.mxu0 %vm5454_vm0, %v5453_v24 }
 0x5ed   :  { %5069 = vmatprep.subr.bf16.mxu0 %v5453_v24 }
 0x5f0   :  { %5070 = vmatpush3.bf16.msra.mxu0 %v5389_v11 }
 0x5f1   :  { %5083 = vmatprep.subr.bf16.mxu0 %v5453_v24 }
 0x5f3   :  { %5072 = vmatmul.mubr.msk.bf16.vlgmr.msra.gmra.mxu0 %vm793_vm10, %v3402_v48 }
 0x5f4   :  { %5084 = vmatpush3.bf16.msra.mxu0 %v5390_v40  ;;  %5087 = vmatprep.mubr.msk.bf16.mxu0 %vm5454_vm0, %v5453_v24 }
 0x5f5   :  { %5085 = vmatprep.subr.bf16.mxu0 %v5453_v24 }
 0x5f8   :  { %5086 = vmatpush3.bf16.msra.mxu0 %v5391_v15 }
 0x5f9   :  { %5097 = vmatprep.subr.bf16.mxu0 %v5453_v24 }
 0x5fb   :  { %5088 = vmatmul.mubr.msk.bf16.vlgmr.msra.gmra.mxu0 %vm793_vm10, %v3506_v16 }
 0x5fc   :  { %5098 = vmatpush3.bf16.msra.mxu0 %v5392_v17  ;;  %5105 = vmatprep.mubr.msk.bf16.mxu0 %vm5454_vm0, %v5453_v24 }
 0x5fd   :  { %5099 = vmatprep.subr.bf16.mxu0 %v5453_v24 }
 0x600   :  { %5100 = vmatpush3.bf16.msra.mxu0 %v5393_v18 }
 0x601   :  { %5101 = vmatprep.subr.bf16.mxu0 %v5453_v24 }
 0x604   :  { %5102 = vmatpush3.bf16.msra.mxu0 %v5394_v20 }
 0x605   :  { %5103 = vmatprep.subr.bf16.mxu0 %v5453_v24 }
 0x608   :  { %5104 = vmatpush3.bf16.msra.mxu0 %v5395_v21 }
 0x609   :  { %5121 = vmatprep.subr.bf16.mxu0 %v5453_v24 }
 0x649   :  { %v6474_v22 = vpop.f32.mrf.mxu0 }
 0x64b   :  { %v4917_v23 = vpop.f32.mrf.mxu0 }
 0x64d   :  { %v2618_v25 = vpop.f32.mrf.mxu0 }
 0x64f   :  { %v4918_v27 = vpop.f32.mrf.mxu0 }
 0x659   :  { %v2765_v28 = vpop.f32.mrf.mxu0 }
 0x65a   :  { %v2772_v35 = vadd.f32 %v5396_v32, %v2765_v28 }
 0x65b   :  { %v4969_v45 = vpop.f32.mrf.mxu0 }
 0x65d   :  { %v2768_v49 = vpop.f32.mrf.mxu0 }
 0x65e   :  { %v2773_v16 = vadd.f32 %v5396_v32, %v2768_v49 }
 0x65f   :  { %v4970_v31 = vpop.f32.mrf.mxu0 }
 0x663   :  { %v2819_v36 = vpop.f32.mrf.mxu0 }
 0x664   :  { %v2826_v37 = vadd.f32 %v2819_v36, %v2772_v35 }
 0x665   :  { %v4977_v43 = vpop.f32.mrf.mxu0 }
 0x667   :  { %v2822_v41 = vpop.f32.mrf.mxu0 }
 0x668   :  { %v2827_v21 = vadd.f32 %v2822_v41, %v2773_v16 }
 0x669   :  { %v4978_v53 = vpop.f32.mrf.mxu0 }
 0x66b   :  { %v2868_v54 = vpop.f32.mrf.mxu0 }
 0x66c   :  { %v2875_v17 = vadd.f32 %v2868_v54, %v2826_v37 }
 0x66d   :  { %v4985_v55 = vpop.f32.mrf.mxu0 }
 0x66f   :  { %v2871_v56 = vpop.f32.mrf.mxu0 }
 0x670   :  { %v2876_v28 = vadd.f32 %v2871_v56, %v2827_v21 }
 0x671   :  { %v4986_v57 = vpop.f32.mrf.mxu0 }
 0x673   :  { %v2923_v29 = vpop.f32.mrf.mxu0 }
 0x674   :  { %v2930_v23 = vadd.f32 %v2923_v29, %v2875_v17 }
 0x675   :  { %v4993_v33 = vpop.f32.mrf.mxu0 }
 0x677   :  { %v2926_v34 = vpop.f32.mrf.mxu0 }
 0x678   :  { %v2931_v35 = vadd.f32 %v2926_v34, %v2876_v28 }
 0x679   :  { %v4994_v61 = vpop.f32.mrf.mxu0 }
 0x67b   :  { %v2972_v47 = vpop.f32.mrf.mxu0 }
 0x67c   :  { %v2979_v45 = vadd.f32 %v2972_v47, %v2930_v23 }
 0x67d   :  { %v5001_v1 = vpop.f32.mrf.mxu0 }
 0x67f   :  { %v2975_v2 = vpop.f32.mrf.mxu0 }
 0x680   :  { %v2980_v53 = vadd.f32 %v2975_v2, %v2931_v35  ;;  %v5402_v35 = vld [vmem:[%s6689_s7 + $0x58] sm:$0xff]  }
 0x681   :  { %v5002_v19 = vpop.f32.mrf.mxu0 }
 0x683   :  { %v3027_v38 = vpop.f32.mrf.mxu0 }
 0x684   :  { %v3034_v36 = vadd.f32 %v3027_v38, %v2979_v45 }
 0x685   :  { %v5009_v30 = vpop.f32.mrf.mxu0 }
 0x687   :  { %v3030_v44 = vpop.f32.mrf.mxu0  ;;  %v3281_v58 = vpop.f32.mrf.mxu1 }
 0x688   :  { %v3035_v33 = vadd.f32 %v3030_v44, %v2980_v53 }
 0x689   :  { %v5010_v59 = vpop.f32.mrf.mxu0  ;;  %v5049_v63 = vpop.f32.mrf.mxu1 }
 0x68b   :  { %v3076_v60 = vpop.f32.mrf.mxu0  ;;  %v3284_v0 = vpop.f32.mrf.mxu1 }
 0x68c   :  { %v3083_v55 = vadd.f32 %v3076_v60, %v3034_v36 }
 0x68d   :  { %v5017_v3 = vpop.f32.mrf.mxu0  ;;  %v5050_v4 = vpop.f32.mrf.mxu1 }
 0x68f   :  { %v3079_v5 = vpop.f32.mrf.mxu0 }
 0x690   :  { %v3385_v6 = vpop.f32.mrf.mxu1  ;;  %v3084_v49 = vadd.f32 %v3079_v5, %v3035_v33  ;;  %v5406_v33 = vld [vmem:[%s6689_s7 + $0x48] sm:$0xff]  }
 0x691   :  { %v5018_v7 = vpop.f32.mrf.mxu0 }
 0x692   :  { %v5065_v8 = vpop.f32.mrf.mxu1 }
 0x693   :  { %v3131_v9 = vpop.f32.mrf.mxu0 }
 0x694   :  { %v3388_v11 = vpop.f32.mrf.mxu1  ;;  %v3138_v61 = vadd.f32 %v3131_v9, %v3083_v55  ;;  %v5404_v55 = vld [vmem:[%s6689_s7 + $0x50] sm:$0xff]  }
 0x695   :  { %v5025_v48 = vpop.f32.mrf.mxu0 }
 0x696   :  { %v5066_v12 = vpop.f32.mrf.mxu1 }
 0x697   :  { %v3134_v39 = vpop.f32.mrf.mxu0 }
 0x698   :  { %v3489_v40 = vpop.f32.mrf.mxu1  ;;  %v3139_v54 = vadd.f32 %v3134_v39, %v3084_v49 }
 0x699   :  { %v5026_v13 = vpop.f32.mrf.mxu0 }
 0x69a   :  { %v5081_v14 = vpop.f32.mrf.mxu1 }
 0x69b   :  { %v3178_v15 = vpop.f32.mrf.mxu0 }
 0x69c   :  { %v3492_v18 = vpop.f32.mrf.mxu1  ;;  %v3185_v32 = vadd.f32 %v3178_v15, %v3138_v61  ;;  %v5407_v61 = vld [vmem:[%s6689_s7 + $0x68] sm:$0xff]  }
 0x69d   :  { %v5033_v20 = vpop.f32.mrf.mxu0 }
 0x69e   :  { %v5082_v25 = vpop.f32.mrf.mxu1 }
 0x69f   :  { %v3181_v27 = vpop.f32.mrf.mxu0  ;;  %v5401_v25 = vld [vmem:[%s6689_s7 + $0x20] sm:$0xff]  }
 0x6a0   :  { %v3186_v19 = vadd.f32 %v3181_v27, %v3139_v54  ;;  %v5410_v54 = vld [vmem:[%s6689_s7 + $0x98] sm:$0xff]  }
 0x6a1   :  { %v5034_v31 = vpop.f32.mrf.mxu0 }
 0x6a3   :  { %v3232_v43 = vpop.f32.mrf.mxu0 }
 0x6a4   :  { %v3239_v41 = vadd.f32 %v3232_v43, %v3185_v32  ;;  %v5403_v43 = vld [vmem:[%s6689_s7 + $0x78] sm:$0xff]   ;;  %v5409_v32 = vld [vmem:[%s6689_s7 + $0x60] sm:$0xff]  }
 0x6a5   :  { %v5041_v57 = vpop.f32.mrf.mxu0 }
 0x6a6   :  { %v3288_v47 = vadd.f32 %v3281_v58, %v3239_v41  ;;  %v5405_v57 = vld [vmem:[%s6689_s7 + $0x70] sm:$0xff]   ;;  %v5411_v41 = vld [vmem:[%s6689_s7 + $0xb8] sm:$0xff]  }
 0x6a7   :  { %v3235_v1 = vpop.f32.mrf.mxu0 }
 0x6a8   :  { %v3240_v56 = vadd.f32 %v3235_v1, %v3186_v19  ;;  %v5408_v1 = vld [vmem:[%s6689_s7 + $0x40] sm:$0xff]   ;;  %v5413_v19 = vld [vmem:[%s6689_s7 + $0xb0] sm:$0xff]  }
 0x6a9   :  { %v5042_v37 = vpop.f32.mrf.mxu0 }
 0x6aa   :  { %v3289_v63 = vadd.f32 %v3284_v0, %v3240_v56  ;;  %v5415_v56 = vld [vmem:[%s6689_s7 + $0xa8] sm:$0xff]  }
 0x6ab   :  { %v3336_v29 = vpop.f32.mrf.mxu0 }
 0x6ac   :  { %v3343_v34 = vadd.f32 %v3336_v29, %v3288_v47  ;;  %v5412_v29 = vld [vmem:[%s6689_s7 + $0x90] sm:$0xff]   ;;  %v5416_v47 = vld [vmem:[%s6689_s7 + $0x80] sm:$0xff]  }
 0x6ad   :  { %v5057_v30 = vpop.f32.mrf.mxu0 }
 0x6ae   :  { %v3392_v3 = vadd.f32 %v3385_v6, %v3343_v34  ;;  %v5414_v30 = vld [vmem:[%s6689_s7 + $0x88] sm:$0xff]   ;;  %v5417_v34 = vld [vmem:[%s6689_s7 + $0xa0] sm:$0xff]  }
 0x6af   :  { %v3339_v59 = vpop.f32.mrf.mxu0 }
 0x6b0   :  { %v3344_v60 = vadd.f32 %v3339_v59, %v3289_v63  ;;  %v5418_v63 = vld [vmem:[%s6689_s7 + $0xd8] sm:$0xff]  }
 0x6b1   :  { %v5058_v38 = vpop.f32.mrf.mxu0 }
 0x6b2   :  { %v3393_v5 = vadd.f32 %v3388_v11, %v3344_v60  ;;  %v5397_v11 = vld [vmem:[%s6688_s6] sm:$0x1f]   ;;  %v5420_v60 = vld [vmem:[%s6689_s7 + $0xd0] sm:$0xff]  }
 0x6b3   :  { %v3440_v2 = vpop.f32.mrf.mxu0 }
 0x6b4   :  { %v3447_v4 = vadd.f32 %v3440_v2, %v3392_v3  ;;  %v5419_v2 = vld [vmem:[%s6689_s7 + $0xf8] sm:$0xff]   ;;  %v5421_v3 = vld [vmem:[%s6689_s7 + $0xf0] sm:$0xff]  }
 0x6b5   :  { %v5073_v44 = vpop.f32.mrf.mxu0 }
 0x6b6   :  { %v3496_v48 = vadd.f32 %v3489_v40, %v3447_v4  ;;  %v5398_v40 = vld [vmem:[%s6689_s7 + $0x38] sm:$0xff]   ;;  %v5422_v44 = vld [vmem:[%s6689_s7 + $0xc8] sm:$0xff]  }
 0x6b7   :  { %v3443_v7 = vpop.f32.mrf.mxu0  ;;  %v5423_v4 = vld [vmem:[%s6689_s7 + $0xe8] sm:$0xff]  }
 0x6b8   :  { %v3448_v9 = vadd.f32 %v3443_v7, %v3393_v5  ;;  %v5424_v7 = vld [vmem:[%s6689_s7 + $0xc0] sm:$0xff]  }
 0x6b9   :  { %v5074_v8 = vpop.f32.mrf.mxu0 }
 0x6ba   :  { %v3497_v14 = vadd.f32 %v3492_v18, %v3448_v9  ;;  %v5400_v18 = vld [vmem:[%s6689_s7 + $0x28] sm:$0xff]   ;;  %v5425_v8 = vld [vmem:[%s6689_s7 + $0xe0] sm:$0xff]  }
 0x6bb   :  { %v3544_v12 = vpop.f32.mrf.mxu0 }
 0x6bc   :  { %v3551_v39 = vadd.f32 %v3544_v12, %v3496_v48  ;;  %v5426_v48 = vld [vmem:[%s6689_s7 + $0x118] sm:$0xff]   ;;  %v5427_v12 = vld [vmem:[%s6689_s7 + $0x110] sm:$0xff]  }
 0x6bd   :  { %v5089_v13 = vpop.f32.mrf.mxu0 }
 0x6be   :  { %v3555_v58 = vmul.f32 0.01, %v3551_v39  ;;  %vm3553_vm12 = vcmp.ge.f32.partialorder %v3551_v39, 0.0 }
 0x6bf   :  { %v3547_v15 = vpop.f32.mrf.mxu0 }
 0x6c0   :  { %v3552_v16 = vadd.f32 %v3547_v15, %v3497_v14  ;;  %v3557_v20 = vsel %vm3553_vm12, %v3551_v39, %v3555_v58  ;;  %v5429_v39 = vld [vmem:[%s6689_s7 + $0x100] sm:$0xff]  }
 0x6c1   :  { %v5090_v17 = vpop.f32.mrf.mxu0 }
 0x6c2   :  { %vm3554_vm13 = vcmp.ge.f32.partialorder %v3552_v16, 0.0  ;;  %v3556_v0 = vmul.f32 0.01, %v3552_v16 }
 0x6c4   :  { %v3558_v6 = vsel %vm3554_vm13, %v3552_v16, %v3556_v0 }
 0x6c5   :  { %v3559_v21 = vpack.c.bf16 %v3558_v6, %v3557_v20 }
 0x6c7   :  { %v3561_v23 = vand.u32 %v3559_v21, %v5954_v42  ;;  %v5399_v42 = vld [vmem:[%s6689_s7 + $0x30] sm:$0xff]  }
 0x6c9   :  { %5092 = vmatpush3.bf16.msra.mxu1 %v3561_v23 }
 0x6ca   :  { %5109 = vmatprep.subr.bf16.mxu1 %v5453_v24 }
 0x6cc   :  { %5094 = vmatmul.mubr.msk.bf16.vlgmr.msra.gmra.mxu1 %vm1817_vm8, %v5397_v11 }
 0x6cd   :  { %5110 = vmatpush3.bf16.msra.mxu1 %v5398_v40  ;;  %5117 = vmatprep.mubr.msk.bf16.mxu1 %vm5454_vm0, %v5453_v24 }
 0x6ce   :  { %5111 = vmatprep.subr.bf16.mxu1 %v5453_v24 }
 0x6d1   :  { %5112 = vmatpush3.bf16.msra.mxu1 %v5399_v42 }
 0x6d2   :  { %5113 = vmatprep.subr.bf16.mxu1 %v5453_v24 }
 0x6d5   :  { %5114 = vmatpush3.bf16.msra.mxu1 %v5400_v18 }
 0x6d6   :  { %5115 = vmatprep.subr.bf16.mxu1 %v5453_v24 }
 0x6d9   :  { %5116 = vmatpush3.bf16.msra.mxu1 %v5401_v25 }
 0x6da   :  { %5133 = vmatprep.subr.bf16.mxu1 %v5453_v24 }
 0x78c   :  { %v3597_v27 = vpop.f32.mrf.mxu1 }
 0x78d   :  { %v6503_v28 = vpack.c.bf16 %v3597_v27, %v3597_v27 }
 0x78e   :  { %v5095_v45 = vpop.f32.mrf.mxu1 }
 0x78f   :  { %v6506_v31 = vshrl.u32 %v6503_v28, 16  ;;  %5106 = vmatmul.mubr.msk.bf16.vlgmr.msra.gmra.mxu0 %vm647_vm9, %v6503_v28  ;;  %v3696_v49 = vrot.slane %v6503_v28, 1  ;;  %v3786_v59 = vrot.slane %v6503_v28, 2  ;;  %v3876_v5 = vrot.slane %v6503_v28, 3 }
 0x790   :  { %5122 = vmatpush3.bf16.msra.mxu0 %v5402_v35  ;;  %v6513_v36 = vpop.f32.mrf.mxu1  ;;  %5129 = vmatprep.mubr.msk.bf16.mxu0 %vm5454_vm0, %v5453_v24 }
 0x791   :  { %5118 = vmatmul.mubr.msk.bf16.vlgmr.msra.gmra.mxu1 %vm647_vm9, %v6506_v31  ;;  %5123 = vmatprep.subr.bf16.mxu0 %v5453_v24  ;;  %v3741_v37 = vrot.slane %v6506_v31, 1  ;;  %v3831_v38 = vrot.slane %v6506_v31, 2  ;;  %v3921_v9 = vrot.slane %v6506_v31, 3  ;;  %v5430_v31 = vld [vmem:[%s6690_s8] sm:$0x1] }
 0x792   :  { %5134 = vmatpush3.bf16.msra.mxu1 %v5403_v43  ;;  %v5096_v53 = vpop.f32.mrf.mxu1  ;;  %5141 = vmatprep.mubr.msk.bf16.mxu1 %vm5454_vm0, %v5453_v24 }
 0x793   :  { %5135 = vmatprep.subr.bf16.mxu1 %v5453_v24 }
 0x794   :  { %5124 = vmatpush3.bf16.msra.mxu0 %v5404_v55 }
 0x795   :  { %5125 = vmatprep.subr.bf16.mxu0 %v5453_v24 }
 0x796   :  { %5136 = vmatpush3.bf16.msra.mxu1 %v5405_v57 }
 0x797   :  { %5137 = vmatprep.subr.bf16.mxu1 %v5453_v24 }
 0x798   :  { %5126 = vmatpush3.bf16.msra.mxu0 %v5406_v33 }
 0x799   :  { %5127 = vmatprep.subr.bf16.mxu0 %v5453_v24 }
 0x79a   :  { %5138 = vmatpush3.bf16.msra.mxu1 %v5407_v61 }
 0x79b   :  { %5139 = vmatprep.subr.bf16.mxu1 %v5453_v24 }
 0x79c   :  { %5128 = vmatpush3.bf16.msra.mxu0 %v5408_v1 }
 0x79d   :  { %5145 = vmatprep.subr.bf16.mxu0 %v5453_v24 }
 0x79e   :  { %5140 = vmatpush3.bf16.msra.mxu1 %v5409_v32 }
 0x79f   :  { %5130 = vmatmul.mubr.msk.bf16.vlgmr.msra.gmra.mxu0 %vm647_vm9, %v3696_v49  ;;  %5157 = vmatprep.subr.bf16.mxu1 %v5453_v24 }
 0x7a0   :  { %5146 = vmatpush3.bf16.msra.mxu0 %v5410_v54  ;;  %5153 = vmatprep.mubr.msk.bf16.mxu0 %vm5454_vm0, %v5453_v24 }
 0x7a1   :  { %5142 = vmatmul.mubr.msk.bf16.vlgmr.msra.gmra.mxu1 %vm647_vm9, %v3741_v37  ;;  %5147 = vmatprep.subr.bf16.mxu0 %v5453_v24 }
 0x7a2   :  { %5158 = vmatpush3.bf16.msra.mxu1 %v5411_v41  ;;  %5165 = vmatprep.mubr.msk.bf16.mxu1 %vm5454_vm0, %v5453_v24 }
 0x7a3   :  { %5159 = vmatprep.subr.bf16.mxu1 %v5453_v24 }
 0x7a4   :  { %5148 = vmatpush3.bf16.msra.mxu0 %v5412_v29 }
 0x7a5   :  { %5149 = vmatprep.subr.bf16.mxu0 %v5453_v24 }
 0x7a6   :  { %5160 = vmatpush3.bf16.msra.mxu1 %v5413_v19 }
 0x7a7   :  { %5161 = vmatprep.subr.bf16.mxu1 %v5453_v24 }
 0x7a8   :  { %5150 = vmatpush3.bf16.msra.mxu0 %v5414_v30 }
 0x7a9   :  { %5151 = vmatprep.subr.bf16.mxu0 %v5453_v24 }
 0x7aa   :  { %5162 = vmatpush3.bf16.msra.mxu1 %v5415_v56 }
 0x7ab   :  { %5163 = vmatprep.subr.bf16.mxu1 %v5453_v24 }
 0x7ac   :  { %5152 = vmatpush3.bf16.msra.mxu0 %v5416_v47 }
 0x7ad   :  { %5169 = vmatprep.subr.bf16.mxu0 %v5453_v24 }
 0x7ae   :  { %5164 = vmatpush3.bf16.msra.mxu1 %v5417_v34 }
 0x7af   :  { %5154 = vmatmul.mubr.msk.bf16.vlgmr.msra.gmra.mxu0 %vm647_vm9, %v3786_v59  ;;  %5181 = vmatprep.subr.bf16.mxu1 %v5453_v24 }
 0x7b0   :  { %5170 = vmatpush3.bf16.msra.mxu0 %v5418_v63  ;;  %5177 = vmatprep.mubr.msk.bf16.mxu0 %vm5454_vm0, %v5453_v24 }
 0x7b1   :  { %5166 = vmatmul.mubr.msk.bf16.vlgmr.msra.gmra.mxu1 %vm647_vm9, %v3831_v38  ;;  %5171 = vmatprep.subr.bf16.mxu0 %v5453_v24 }
 0x7b2   :  { %5182 = vmatpush3.bf16.msra.mxu1 %v5419_v2  ;;  %5189 = vmatprep.mubr.msk.bf16.mxu1 %vm5454_vm0, %v5453_v24 }
 0x7b3   :  { %5183 = vmatprep.subr.bf16.mxu1 %v5453_v24 }
 0x7b4   :  { %5172 = vmatpush3.bf16.msra.mxu0 %v5420_v60 }
 0x7b5   :  { %5173 = vmatprep.subr.bf16.mxu0 %v5453_v24 }
 0x7b6   :  { %5184 = vmatpush3.bf16.msra.mxu1 %v5421_v3 }
 0x7b7   :  { %5185 = vmatprep.subr.bf16.mxu1 %v5453_v24 }
 0x7b8   :  { %5174 = vmatpush3.bf16.msra.mxu0 %v5422_v44 }
 0x7b9   :  { %5175 = vmatprep.subr.bf16.mxu0 %v5453_v24 }
 0x7ba   :  { %5186 = vmatpush3.bf16.msra.mxu1 %v5423_v4 }
 0x7bb   :  { %5187 = vmatprep.subr.bf16.mxu1 %v5453_v24 }
 0x7bc   :  { %5176 = vmatpush3.bf16.msra.mxu0 %v5424_v7 }
 0x7bd   :  { %5193 = vmatprep.subr.bf16.mxu0 %v5453_v24 }
 0x7be   :  { %5188 = vmatpush3.bf16.msra.mxu1 %v5425_v8 }
 0x7bf   :  { %5178 = vmatmul.mubr.msk.bf16.vlgmr.msra.gmra.mxu0 %vm647_vm9, %v3876_v5  ;;  %5205 = vmatprep.subr.bf16.mxu1 %v5453_v24 }
 0x7c0   :  { %5194 = vmatpush3.bf16.msra.mxu0 %v5426_v48  ;;  %5201 = vmatprep.mubr.msk.bf16.mxu0 %vm5454_vm0, %v5453_v24 }
 0x7c1   :  { %5190 = vmatmul.mubr.msk.bf16.vlgmr.msra.gmra.mxu1 %vm647_vm9, %v3921_v9  ;;  %5195 = vmatprep.subr.bf16.mxu0 %v5453_v24  ;;  %v601_v9 = vld [vmem:[%s6694_s12] sm:$0x1] }
 0x7c2   :  { %5206 = vmatpush3.bf16.msra.mxu1 %v6139_v46  ;;  %5213 = vmatprep.mubr.msk.bf16.mxu1 %vm5454_vm0, %v5453_v24  ;;  %v5428_v46 = vld [vmem:[%s6689_s7 + $0x108] sm:$0xff]  }
 0x7c3   :  { %5207 = vmatprep.subr.bf16.mxu1 %v5453_v24 }
 0x7c4   :  { %5196 = vmatpush3.bf16.msra.mxu0 %v5427_v12  ;;  %v2616_v12 = vadd.f32 %v6474_v22, %v601_v9 }
 0x7c5   :  { %5197 = vmatprep.subr.bf16.mxu0 %v5453_v24 }
 0x7c6   :  { %5208 = vmatpush3.bf16.msra.mxu1 %v6145_v50  ;;  %v3966_v50 = vpack.c.bf16 %v6513_v36, %v6513_v36 }
 0x7c7   :  { %5209 = vmatprep.subr.bf16.mxu1 %v5453_v24 }
 0x7c8   :  { %5198 = vmatpush3.bf16.msra.mxu0 %v5428_v46 }
 0x7c9   :  { %5199 = vmatprep.subr.bf16.mxu0 %v5453_v24 }
 0x7ca   :  { %5210 = vmatpush3.bf16.msra.mxu1 %v6153_v51 }
 0x7cb   :  { %5211 = vmatprep.subr.bf16.mxu1 %v5453_v24 }
 0x7cc   :  { %5200 = vmatpush3.bf16.msra.mxu0 %v5429_v39 }
 0x7cd   :  { %5217 = vmatprep.subr.bf16.mxu0 %v5453_v24 }
 0x7ce   :  { %5212 = vmatpush3.bf16.msra.mxu1 %v6160_v52 }
 0x7cf   :  { %5202 = vmatmul.mubr.msk.bf16.vlgmr.msra.gmra.mxu0 %vm647_vm9, %v3966_v50 }
 0x7d0   :  { %5218 = vmatpush3.bf16.msra.mxu0 %v6229_v62  ;;  %5221 = vmatprep.mubr.msk.bf16.mxu0 %vm5454_vm0, %v5453_v24 }
 0x7d1   :  { %5219 = vmatprep.subr.bf16.mxu0 %v5453_v24 }
 0x7d4   :  { %5220 = vmatpush3.bf16.msra.mxu0 %v6242_v10 }
 0x84f   :  { %v3642_v51 = vpop.f32.mrf.mxu0 }
 0x850   :  { %v3648_v35 = vadd.f32 %v5430_v31, %v3642_v51  ;;  %v2621_v51 = vmax.f32 %v2616_v12, 0.0 }
 0x851   :  { %v5107_v13 = vpop.f32.mrf.mxu0  ;;  %v3688_v14 = vpop.f32.mrf.mxu1 }
 0x852   :  { %v3694_v36 = vadd.f32 %v3688_v14, %v3648_v35 }
 0x853   :  { %v3645_v15 = vpop.f32.mrf.mxu0  ;;  %v5119_v58 = vpop.f32.mrf.mxu1 }
 0x855   :  { %v5108_v16 = vpop.f32.mrf.mxu0  ;;  %v3691_v17 = vpop.f32.mrf.mxu1 }
 0x857   :  { %v5120_v0 = vpop.f32.mrf.mxu1 }
 0x85f   :  { %v3734_v52 = vpop.f32.mrf.mxu0 }
 0x860   :  { %v3740_v43 = vadd.f32 %v3734_v52, %v3694_v36 }
 0x861   :  { %v5131_v20 = vpop.f32.mrf.mxu0  ;;  %v3779_v6 = vpop.f32.mrf.mxu1 }
 0x862   :  { %v3785_v33 = vadd.f32 %v3779_v6, %v3740_v43 }
 0x863   :  { %v3737_v21 = vpop.f32.mrf.mxu0  ;;  %v5143_v62 = vpop.f32.mrf.mxu1 }
 0x865   :  { %v5132_v23 = vpop.f32.mrf.mxu0  ;;  %v3782_v11 = vpop.f32.mrf.mxu1 }
 0x867   :  { %v5144_v40 = vpop.f32.mrf.mxu1 }
 0x86f   :  { %v3824_v42 = vpop.f32.mrf.mxu0 }
 0x870   :  { %v3830_v49 = vadd.f32 %v3824_v42, %v3785_v33 }
 0x871   :  { %v5155_v24 = vpop.f32.mrf.mxu0  ;;  %v3869_v18 = vpop.f32.mrf.mxu1 }
 0x872   :  { %v3875_v41 = vadd.f32 %v3869_v18, %v3830_v49 }
 0x873   :  { %v3827_v10 = vpop.f32.mrf.mxu0  ;;  %v5167_v25 = vpop.f32.mrf.mxu1 }
 0x875   :  { %v5156_v27 = vpop.f32.mrf.mxu0  ;;  %v3872_v28 = vpop.f32.mrf.mxu1 }
 0x877   :  { %v5168_v45 = vpop.f32.mrf.mxu1 }
 0x87f   :  { %v3914_v53 = vpop.f32.mrf.mxu0 }
 0x880   :  { %v3920_v29 = vadd.f32 %v3914_v53, %v3875_v41 }
 0x881   :  { %v5179_v55 = vpop.f32.mrf.mxu0  ;;  %v3959_v57 = vpop.f32.mrf.mxu1 }
 0x882   :  { %v3965_v19 = vadd.f32 %v3959_v57, %v3920_v29 }
 0x883   :  { %v3917_v61 = vpop.f32.mrf.mxu0  ;;  %v5191_v1 = vpop.f32.mrf.mxu1 }
 0x885   :  { %v5180_v32 = vpop.f32.mrf.mxu0  ;;  %v3962_v37 = vpop.f32.mrf.mxu1 }
 0x887   :  { %v5192_v54 = vpop.f32.mrf.mxu1 }
 0x88f   :  { %v4004_v30 = vpop.f32.mrf.mxu0 }
 0x890   :  { %v4010_v56 = vadd.f32 %v4004_v30, %v3965_v19 }
 0x891   :  { %v5203_v47 = vpop.f32.mrf.mxu0 }
 0x892   :  { %vm4011_vm0 = vcmp.ge.f32.partialorder %v4010_v56, 0.0  ;;  %v4012_v59 = vmul.f32 0.01, %v4010_v56 }
 0x893   :  { %v4007_v34 = vpop.f32.mrf.mxu0 }
 0x894   :  { %v4013_v38 = vsel %vm4011_vm0, %v4010_v56, %v4012_v59 }
 0x895   :  { %v4014_v63 = vpack.c.bf16 %v4013_v38, %v4013_v38  ;;  %v5204_v2 = vpop.f32.mrf.mxu0 }
 0x897   :  { %5214 = vmatmul.mubr.msk.bf16.vlgmr.msra.gmra.mxu1 %vm647_vm9, %v4014_v63  ;;  %vm4108_vm9 = vcmask 1040384  }
 0x957   :  { %v4052_v60 = vpop.f32.mrf.mxu1 }
 0x958   :  { %v4058_v3 = vadd.f32 %v4052_v60, %v6261_v26 }
 0x959   :  { %v5215_v44 = vpop.f32.mrf.mxu1 }
 0x95a   :  { %v4059_v4 = vmax.f32 %v4058_v3, 0.0 }
 0x95b   :  { %v4055_v7 = vpop.f32.mrf.mxu1 }
 0x95c   :  { %v4060_v5 = vpack.c.bf16 %v4059_v4, %v4059_v4 }
 0x95d   :  { %v5216_v8 = vpop.f32.mrf.mxu1 }
 0x95e   :  { %5222 = vmatmul.mubr.msk.bf16.vlgmr.msra.gmra.mxu0 %vm793_vm10, %v4060_v5 }
 0xa1e   :  { %v4098_v48 = vpop.f32.mrf.mxu0 }
 0xa1f   :  { %v4099_v46 = vadd.f32 %v4098_v48, %v601_v9 }
 0xa20   :  { %v5223_v39 = vpop.f32.mrf.mxu0 }
 0xa21   :  { %v4104_v50 = vmax.f32 %v4099_v46, 0.0 }
 0xa22   :  { %v4101_v26 = vpop.f32.mrf.mxu0 }
 0xa23   :  { %v4106_v13 = vrot.slane %v4104_v50, 7 }
 0xa24   :  { %v5224_v14 = vpop.f32.mrf.mxu0 }
 0xa25   :  { %v4109_v15 = vsel %vm4108_vm9, %v2621_v51, %v4106_v13 }
 0xa26   :  { %4110 = vst [vmem:[#allocation2] sm:$0x3] %v4109_v15 }
 0xa27   :  { %5442 = shalt.err (!%p5439_p4)
}
 0xa28   :  { %4120 = dma.vmem_to_hbm [thread:$0]  %s4118_s19, 32, %s6695_s13, [#allocation3]  }
 0xa29   :  { %5451 = dma.done.wait [#allocation3], 32  }
 0xa2a   :  { %5452 = vsyncadd [#allocation3], 4294967264 }
 0xa2b   :  { %4124 = vsyncpa [#allocation3], 1 }

</bundles_post_ra>
